<compile_context>
chip_gen: v7x
topology: tpu7x:2x2x1
jax: 0.10.0
libtpu: 0.0.40
codegen_flags: <defaults>
</compile_context>

<pallas_src>
import functools

import jax
import jax.numpy as jnp
from jax import lax
from jax.experimental import pallas as pl
from jax.experimental.pallas import tpu as pltpu

MIB = 1024 * 1024


# ---------------------------------------------------------------------------
# Kernel 1: hoisted input projection, both directions in one MXU dot.
#   gates_x = x @ [Wih_f | Wih_b] + [b_f | b_b]     (x flattened to (T*B, E))
# Output gx is stored bf16 (f32 accumulation inside the dot).
# ---------------------------------------------------------------------------
def input_proj_kernel(x_ref, wih_ref, b_ref, gx_ref):
    G = gx_ref.shape[-1]                                   # 4H
    gates = jnp.dot(x_ref[...], wih_ref[...],
                    preferred_element_type=jnp.float32) + b_ref[...]
    gx_ref[0] = gates[:, :G].astype(gx_ref.dtype)          # forward gates
    gx_ref[1] = gates[:, G:].astype(gx_ref.dtype)          # backward gates


def input_projection(x_tm, wih_packed, bias_packed):
    """x_tm: (T,B,E) bf16; wih_packed: (E,8H) bf16; bias_packed: (1,8H) f32.
    Returns gx: (2, T, B, 4H) bf16 (dir 0 = forward, dir 1 = backward)."""
    T, B, E = x_tm.shape
    G2 = wih_packed.shape[1]                 # 8H
    G = G2 // 2                              # 4H
    TB = T * B
    tm = max(B, (min(TB, 512) // B) * B)     # row tile: multiple of B, <= 512
    while TB % tm != 0:
        tm -= B
    x2d = x_tm.reshape(TB, E)

    # VMEM budget: x blocks (2 bufs, bf16) + single-buffered Wih/bias +
    # gx output blocks (2 bufs, both directions, bf16).
    vmem_need = 2 * tm * E * 2 + E * G2 * 2 + G2 * 4 + 2 * 2 * tm * G * 2
    vmem_limit = int(min(100 * MIB, max(32 * MIB, 1.5 * vmem_need)))

    gx = pl.pallas_call(
        input_proj_kernel,
        out_shape=jax.ShapeDtypeStruct((2, TB, G), jnp.bfloat16),
        grid_spec=pltpu.PrefetchScalarGridSpec(
            num_scalar_prefetch=0,
            grid=(TB // tm,),
            in_specs=[
                pl.BlockSpec((tm, E), lambda i: (i, 0)),           # x rows
                pl.BlockSpec((E, G2), lambda i: (0, 0),
                             pipeline_mode=pl.Buffered(1)),        # Wih packed
                pl.BlockSpec((1, G2), lambda i: (0, 0),
                             pipeline_mode=pl.Buffered(1)),        # bias packed
            ],
            out_specs=pl.BlockSpec((2, tm, G), lambda i: (0, i, 0))),
        compiler_params=pltpu.CompilerParams(
            dimension_semantics=("parallel",),
            vmem_limit_bytes=vmem_limit),
    )(x2d, wih_packed, bias_packed)
    return gx.reshape(2, T, B, G)


# ---------------------------------------------------------------------------
# Kernel 2: LSTM recurrence over precomputed input gates.
# Grid = (direction, time-block). Each grid step runs tt timesteps of ONE
# direction; the direction axis is "parallel" so v7x puts one direction on
# each TensorCore. Whh is DMA'd once per direction from HBM into a single
# VMEM scratch buffer; only h @ Whh hits the MXU per step.
# ---------------------------------------------------------------------------
def bilstm_recurrent_kernel(lens_ref, gx_ref, whh_hbm, out_ref,
                            whh_vmem, h, c, dma_sem, *, tt, seq_len):
    d = pl.program_id(0)              # 0 = forward, 1 = backward
    s = pl.program_id(1)              # which block of tt timesteps
    H = h.shape[1]

    @pl.when(s == 0)
    def _():
        # One weight DMA per direction; reset the recurrent state.
        cp = pltpu.make_async_copy(whh_hbm.at[d], whh_vmem, dma_sem)
        cp.start()
        h[...] = jnp.zeros_like(h)
        c[...] = jnp.zeros_like(c)
        cp.wait()

    lens = lens_ref[...]              # (B, H) int32, lane-dense
    whh = whh_vmem[...]               # (H, 4H) bf16, resident for this direction

    def _sigmoid(x):                  # single EUP op instead of exp + divide
        return 0.5 * jnp.tanh(0.5 * x) + 0.5

    def step(j, carry):
        base = s * tt + j
        row = (1 - d) * j + d * (tt - 1 - j)            # backward walks block reversed
        t = (1 - d) * base + d * (seq_len - 1 - base)   # original timestep index

        gates = gx_ref[row].astype(jnp.float32) + jnp.dot(
            h[...].astype(whh.dtype), whh, preferred_element_type=jnp.float32)
        i_g = _sigmoid(gates[:, 0:H])
        f_g = _sigmoid(gates[:, H:2 * H])
        g_g = jnp.tanh(gates[:, 2 * H:3 * H])
        o_g = _sigmoid(gates[:, 3 * H:4 * H])
        c_new = f_g * c[...] + i_g * g_g
        h_new = o_g * jnp.tanh(c_new)

        valid = lens > t              # packed-seq mask: padded steps keep state
        h[...] = jnp.where(valid, h_new, h[...])
        c[...] = jnp.where(valid, c_new, c[...])
        return carry

    lax.fori_loop(0, tt, step, 0, unroll=True)

    @pl.when(s == pl.num_programs(1) - 1)
    def _():
        out_ref[...] = h[...]         # this direction's half of the output


def bilstm_forward(src, src_len, params, *, tt=8):
    """src: (B, T) int32 token ids, src_len: (B,) int32. Returns (B, 2H) f32."""
    emb_table = params["embedding"]
    B, T = src.shape
    E = emb_table.shape[1]
    H = params["whh_f"].shape[0]
    G = 4 * H

    tt = max(1, min(tt, T))
    while T % tt != 0:                # snap tt to a divisor of T
        tt -= 1
    nsteps = T // tt

    # TODO(synk): token-id embedding gather + time-major transpose stay in XLA
    # (jnp.take / transpose); a Pallas DMA-gather kernel is not worth it here.
    embedded = jnp.take(emb_table, src, axis=0)                      # (B, T, E)
    x_tm = jnp.transpose(embedded, (1, 0, 2)).astype(jnp.bfloat16)   # (T, B, E)

    # Lane-align the contraction dim (production E=300 -> 384); zero padding
    # keeps the matmul exact.
    E_pad = ((E + 127) // 128) * 128
    if E_pad != E:
        x_tm = jnp.pad(x_tm, ((0, 0), (0, 0), (0, E_pad - E)))

    # Pack both directions' input weights / biases -> one dot in kernel 1.
    wih = jnp.concatenate([params["wih_f"], params["wih_b"]], axis=1)   # (E, 8H)
    if E_pad != E:
        wih = jnp.pad(wih, ((0, E_pad - E), (0, 0)))
    wih = wih.astype(jnp.bfloat16)
    bias = jnp.concatenate([params["b_f"], params["b_b"]], axis=1)      # (1, 8H)

    gx = input_projection(x_tm, wih, bias)                  # (2, T, B, 4H) bf16

    # Stacked recurrent weights stay in HBM; kernel 2 DMAs one direction's
    # weight into VMEM scratch at the start of that direction.
    whh = jnp.stack([params["whh_f"], params["whh_b"]], 0).astype(jnp.bfloat16)

    # Lane-dense lengths so masking is a bool select on a (B, H) tile.
    lens_b = jnp.broadcast_to(src_len.astype(jnp.int32)[:, None], (B, H))

    # Explicit VMEM budget: gx blocks (2 bufs, bf16) + one resident Whh +
    # h/c state + lens + out. Clamped to 100 MiB (fine on v5e/v6e); on v7x the
    # parallel direction axis leaves only one Whh per TensorCore.
    vmem_need = (2 * tt * B * G * 2 + H * G * 2 + 2 * B * H * 4
                 + B * H * 4 + 2 * B * H * 4)
    vmem_limit = int(min(100 * MIB, max(32 * MIB, 1.5 * vmem_need)))

    kernel = functools.partial(bilstm_recurrent_kernel, tt=tt, seq_len=T)
    return pl.pallas_call(
        kernel,
        out_shape=jax.ShapeDtypeStruct((B, 2 * H), jnp.float32),
        grid_spec=pltpu.PrefetchScalarGridSpec(
            num_scalar_prefetch=0,
            grid=(2, nsteps),                                # (direction, time)
            in_specs=[
                pl.BlockSpec((B, H), lambda d, s: (0, 0),
                             pipeline_mode=pl.Buffered(1)),               # lens
                pl.BlockSpec((None, tt, B, G),
                             lambda d, s: (d,
                                           (1 - d) * s + d * (nsteps - 1 - s),
                                           0, 0)),                        # gx
                pl.BlockSpec(memory_space=pl.ANY),                        # Whh (HBM)
            ],
            out_specs=pl.BlockSpec((B, H), lambda d, s: (0, d)),
            scratch_shapes=[
                pltpu.VMEM((H, G), jnp.bfloat16),   # resident Whh (one direction)
                pltpu.VMEM((B, H), jnp.float32),    # h
                pltpu.VMEM((B, H), jnp.float32),    # c
                pltpu.SemaphoreType.DMA(()),        # weight-load DMA semaphore
            ]),
        compiler_params=pltpu.CompilerParams(
            # Direction axis "parallel": splits across the two TensorCores on
            # v7x; time axis is the sequential recurrence -> "arbitrary".
            dimension_semantics=("parallel", "arbitrary"),
            vmem_limit_bytes=vmem_limit),
    )(lens_b, gx, whh)


def init_params(key, vocab, E, H):
    ks = jax.random.split(key, 9)
    scale = 1.0 / float(jnp.sqrt(H))

    def u(k, shape):
        return jax.random.uniform(k, shape, jnp.float32, -scale, scale)

    emb = jax.random.normal(ks[0], (vocab, E), jnp.float32)
    emb = emb.at[1].set(0.0)  # padding_idx=1 -> zero embedding row
    return dict(
        embedding=emb,
        wih_f=u(ks[1], (E, 4 * H)),
        whh_f=u(ks[2], (H, 4 * H)),
        b_f=u(ks[3], (1, 4 * H)) + u(ks[4], (1, 4 * H)),  # b_ih + b_hh
        wih_b=u(ks[5], (E, 4 * H)),
        whh_b=u(ks[6], (H, 4 * H)),
        b_b=u(ks[7], (1, 4 * H)) + u(ks[8], (1, 4 * H)),
    )


def reference_forward(src, src_len, params):
    """Pure-JAX f32 reference mirroring packed BiLSTM semantics."""
    emb = jnp.take(params["embedding"], src, axis=0)  # (B, T, E)
    B, T, _ = emb.shape
    H = params["whh_f"].shape[0]

    def cell(x, h, c, wih, whh, b):
        gates = x @ wih + h @ whh + b
        i, f, g, o = jnp.split(gates, 4, axis=1)
        i, f, o = jax.nn.sigmoid(i), jax.nn.sigmoid(f), jax.nn.sigmoid(o)
        g = jnp.tanh(g)
        c_new = f * c + i * g
        return o * jnp.tanh(c_new), c_new

    hf = jnp.zeros((B, H), jnp.float32)
    cf = jnp.zeros((B, H), jnp.float32)
    for t in range(T):
        m = (src_len > t).astype(jnp.float32)[:, None]
        hn, cn = cell(emb[:, t], hf, cf, params["wih_f"], params["whh_f"],
                      params["b_f"])
        hf = m * hn + (1.0 - m) * hf
        cf = m * cn + (1.0 - m) * cf

    hb = jnp.zeros((B, H), jnp.float32)
    cb = jnp.zeros((B, H), jnp.float32)
    for t in range(T - 1, -1, -1):
        m = (src_len > t).astype(jnp.float32)[:, None]
        hn, cn = cell(emb[:, t], hb, cb, params["wih_b"], params["whh_b"],
                      params["b_b"])
        hb = m * hn + (1.0 - m) * hb
        cb = m * cn + (1.0 - m) * cb

    return jnp.concatenate([hf, hb], axis=1)


if __name__ == "__main__":
    B, T, E, H, VOCAB, TT = 8, 16, 128, 128, 64, 8  # small MXU/VPU-aligned demo

    key = jax.random.PRNGKey(0)
    k_par, k_tok = jax.random.split(key, 2)
    params = init_params(k_par, VOCAB, E, H)

    # Deterministic variable-length batch; positions past len get padding id 1.
    src_len = jnp.array([16, 12, 9, 16, 5, 7, 16, 3], dtype=jnp.int32)
    tokens = jax.random.randint(k_tok, (B, T), 2, VOCAB, dtype=jnp.int32)
    pos = jnp.arange(T)[None, :]
    src = jnp.where(pos < src_len[:, None], tokens, 1).astype(jnp.int32)

    fwd = jax.jit(functools.partial(bilstm_forward, tt=TT))
    out = jax.block_until_ready(fwd(src, src_len, params))

    ref = reference_forward(src, src_len, params)
    assert out.shape == (B, 2 * H), out.shape
    # bf16 weights / activations / stored input-gates (f32 accumulation and
    # state) drift slightly vs. the pure-f32 reference.
    rel_err = float(jnp.linalg.norm(out - ref) / jnp.linalg.norm(ref))
    assert rel_err < 5e-2, rel_err

    print("KERNEL_OK")
</pallas_src>

<mosaic_0001>
module attributes {stable_mosaic.version = 11 : i64} {
  func.func @input_proj_kernel(%arg0: i32, %arg1: memref<128x128xbf16, #tpu.memory_space<vmem>>, %arg2: memref<128x1024xbf16, #tpu.memory_space<vmem>>, %arg3: memref<1x1024xf32, #tpu.memory_space<vmem>>, %arg4: memref<2x128x512xbf16, #tpu.memory_space<vmem>>) attributes {dimension_semantics = [#tpu.dimension_semantics<parallel>], iteration_bounds = array<i64: 1>, scalar_prefetch = 0 : i64, scratch_operands = 0 : i64, tpu.core_type = #tpu.core_type<tc>, window_params = [{transform_indices = @transform_0, window_bounds = array<i64: 128, 128>}, {pipeline_mode = #tpu.pipeline_mode<synchronous>, transform_indices = @transform_1, window_bounds = array<i64: 128, 1024>}, {pipeline_mode = #tpu.pipeline_mode<synchronous>, transform_indices = @transform_2, window_bounds = array<i64: 1, 1024>}, {transform_indices = @transform_3, window_bounds = array<i64: 2, 128, 512>}]} {
    %c0 = arith.constant 0 : index
    %c0_0 = arith.constant 0 : index
    %0 = vector.load %arg1[%c0, %c0_0] : memref<128x128xbf16, #tpu.memory_space<vmem>>, vector<128x128xbf16>
    %c0_1 = arith.constant 0 : index
    %c0_2 = arith.constant 0 : index
    %1 = vector.load %arg2[%c0_1, %c0_2] : memref<128x1024xbf16, #tpu.memory_space<vmem>>, vector<128x1024xbf16>
    %cst = arith.constant dense<0.000000e+00> : vector<128x1024xf32>
    %2 = tpu.matmul %0, %1, %cst {dimension_numbers = #tpu.dot_dimension_numbers<[1], [0], [0], [1], [0, 0, 1, 1], [], []>} : vector<128x128xbf16>, vector<128x1024xbf16>, vector<128x1024xf32> -> vector<128x1024xf32>
    %c0_3 = arith.constant 0 : index
    %c0_4 = arith.constant 0 : index
    %3 = vector.load %arg3[%c0_3, %c0_4] : memref<1x1024xf32, #tpu.memory_space<vmem>>, vector<1x1024xf32>
    %4 = vector.broadcast %3 : vector<1x1024xf32> to vector<128x1024xf32>
    %5 = arith.addf %2, %4 : vector<128x1024xf32>
    %6 = vector.extract_strided_slice %5 {offsets = [0, 0], sizes = [128, 512], strides = [1, 1]} : vector<128x1024xf32> to vector<128x512xf32>
    %7 = arith.truncf %6 : vector<128x512xf32> to vector<128x512xbf16>
    %c0_5 = arith.constant 0 : index
    %c0_6 = arith.constant 0 : index
    %c0_7 = arith.constant 0 : index
    %8 = vector.load %arg4[%c0_5, %c0_6, %c0_7] : memref<2x128x512xbf16, #tpu.memory_space<vmem>>, vector<1x128x512xbf16>
    %9 = vector.shape_cast %8 : vector<1x128x512xbf16> to vector<128x512xbf16>
    %10 = vector.shape_cast %7 : vector<128x512xbf16> to vector<1x128x512xbf16>
    tpu.vector_store %arg4[%c0_5, %c0_6, %c0_7], %10 {strides = array<i32>} : memref<2x128x512xbf16, #tpu.memory_space<vmem>>, vector<1x128x512xbf16>,
    %11 = vector.extract_strided_slice %5 {offsets = [0, 512], sizes = [128, 512], strides = [1, 1]} : vector<128x1024xf32> to vector<128x512xf32>
    %12 = arith.truncf %11 : vector<128x512xf32> to vector<128x512xbf16>
    %c1 = arith.constant 1 : index
    %c0_8 = arith.constant 0 : index
    %c0_9 = arith.constant 0 : index
    %13 = vector.load %arg4[%c1, %c0_8, %c0_9] : memref<2x128x512xbf16, #tpu.memory_space<vmem>>, vector<1x128x512xbf16>
    %14 = vector.shape_cast %13 : vector<1x128x512xbf16> to vector<128x512xbf16>
    %15 = vector.shape_cast %12 : vector<128x512xbf16> to vector<1x128x512xbf16>
    tpu.vector_store %arg4[%c1, %c0_8, %c0_9], %15 {strides = array<i32>} : memref<2x128x512xbf16, #tpu.memory_space<vmem>>, vector<1x128x512xbf16>,
    return
  }
  func.func @transform_0(%arg0: i32) -> (i32, i32) {
    %c0_i32 = arith.constant 0 : i32
    %c0_i32_0 = arith.constant 0 : i32
    return %arg0, %c0_i32 : i32, i32
  }
  func.func @transform_1(%arg0: i32) -> (i32, i32) {
    %c0_i32 = arith.constant 0 : i32
    %c0_i32_0 = arith.constant 0 : i32
    %c0_i32_1 = arith.constant 0 : i32
    return %c0_i32, %c0_i32_0 : i32, i32
  }
  func.func @transform_2(%arg0: i32) -> (i32, i32) {
    %c0_i32 = arith.constant 0 : i32
    %c0_i32_0 = arith.constant 0 : i32
    %c0_i32_1 = arith.constant 0 : i32
    return %c0_i32, %c0_i32_0 : i32, i32
  }
  func.func @transform_3(%arg0: i32) -> (i32, i32, i32) {
    %c0_i32 = arith.constant 0 : i32
    %c0_i32_0 = arith.constant 0 : i32
    %c0_i32_1 = arith.constant 0 : i32
    return %c0_i32, %arg0, %c0_i32_0 : i32, i32, i32
  }
}

module attributes {stable_mosaic.version = 11 : i64} {
  func.func @bilstm_recurrent_kernel(%arg0: i32, %arg1: i32, %arg2: memref<8x128xi32, #tpu.memory_space<vmem>>, %arg3: memref<1x8x8x512xbf16, #tpu.memory_space<vmem>>, %arg4: memref<2x128x512xbf16, #tpu.memory_space<any>>, %arg5: memref<8x128xf32, #tpu.memory_space<vmem>>, %arg6: memref<128x512xbf16, #tpu.memory_space<vmem>>, %arg7: memref<8x128xf32, #tpu.memory_space<vmem>>, %arg8: memref<8x128xf32, #tpu.memory_space<vmem>>, %arg9: memref<!tpu.dma_semaphore, #tpu.memory_space<semaphore_mem>>) attributes {dimension_semantics = [#tpu.dimension_semantics<parallel>, #tpu.dimension_semantics<arbitrary>], iteration_bounds = array<i64: 2, 2>, scalar_prefetch = 0 : i64, scratch_operands = 4 : i64, tpu.core_type = #tpu.core_type<tc>, window_params = [{pipeline_mode = #tpu.pipeline_mode<synchronous>, transform_indices = @transform_0, window_bounds = array<i64: 8, 128>}, {transform_indices = @transform_1, window_bounds = array<i64: 1, 8, 8, 512>}, {}, {transform_indices = @transform_3, window_bounds = array<i64: 8, 128>}]} {
    %c0_i32 = arith.constant 0 : i32
    %0 = arith.cmpi eq, %arg1, %c0_i32 : i32
    %1 = arith.extui %0 : i1 to i32
    %c0_i32_0 = arith.constant 0 : i32
    %2 = arith.cmpi ne, %1, %c0_i32_0 : i32
    scf.if %2 {
      %c0_i32_245 = arith.constant 0 : i32
      %c0_i32_246 = arith.constant 0 : i32
      %488 = tpu.memref_slice %arg4[%arg0, %c0_i32_245, %c0_i32_246] : memref<2x128x512xbf16, #tpu.memory_space<any>> -> memref<1x128x512xbf16, #tpu.memory_space<any>>
      %489 = tpu.memref_squeeze %488 : memref<1x128x512xbf16, #tpu.memory_space<any>> -> memref<128x512xbf16, #tpu.memory_space<any>>
      tpu.enqueue_dma source(%489 : memref<128x512xbf16, #tpu.memory_space<any>>) target(%arg6 : memref<128x512xbf16, #tpu.memory_space<vmem>>) target_semaphore(%arg9 : memref<!tpu.dma_semaphore, #tpu.memory_space<semaphore_mem>>)
      %cst_247 = arith.constant 0.000000e+00 : f32
      %490 = vector.broadcast %cst_247 : f32 to vector<8x128xf32>
      %c0_248 = arith.constant 0 : index
      %c0_249 = arith.constant 0 : index
      %491 = vector.load %arg7[%c0_248, %c0_249] : memref<8x128xf32, #tpu.memory_space<vmem>>, vector<8x128xf32>
      tpu.vector_store %arg7[%c0_248, %c0_249], %490 {strides = array<i32>} : memref<8x128xf32, #tpu.memory_space<vmem>>, vector<8x128xf32>,
      %cst_250 = arith.constant 0.000000e+00 : f32
      %492 = vector.broadcast %cst_250 : f32 to vector<8x128xf32>
      %c0_251 = arith.constant 0 : index
      %c0_252 = arith.constant 0 : index
      %493 = vector.load %arg8[%c0_251, %c0_252] : memref<8x128xf32, #tpu.memory_space<vmem>>, vector<8x128xf32>
      tpu.vector_store %arg8[%c0_251, %c0_252], %492 {strides = array<i32>} : memref<8x128xf32, #tpu.memory_space<vmem>>, vector<8x128xf32>,
      %c0_i32_253 = arith.constant 0 : i32
      %c0_i32_254 = arith.constant 0 : i32
      %494 = tpu.memref_slice %arg4[%arg0, %c0_i32_253, %c0_i32_254] : memref<2x128x512xbf16, #tpu.memory_space<any>> -> memref<1x128x512xbf16, #tpu.memory_space<any>>
      %495 = tpu.memref_squeeze %494 : memref<1x128x512xbf16, #tpu.memory_space<any>> -> memref<128x512xbf16, #tpu.memory_space<any>>
      tpu.wait_dma2 semaphore(%arg9 : memref<!tpu.dma_semaphore, #tpu.memory_space<semaphore_mem>>) src(%495 : memref<128x512xbf16, #tpu.memory_space<any>>) dst(%arg6 : memref<128x512xbf16, #tpu.memory_space<vmem>>)
    } else {
    }
    %c0 = arith.constant 0 : index
    %c0_1 = arith.constant 0 : index
    %3 = vector.load %arg2[%c0, %c0_1] : memref<8x128xi32, #tpu.memory_space<vmem>>, vector<8x128xi32>
    %c0_2 = arith.constant 0 : index
    %c0_3 = arith.constant 0 : index
    %4 = vector.load %arg6[%c0_2, %c0_3] : memref<128x512xbf16, #tpu.memory_space<vmem>>, vector<128x512xbf16>
    %c0_i32_4 = arith.constant 0 : i32
    %c8_i32 = arith.constant 8 : i32
    %5 = arith.muli %arg1, %c8_i32 : i32
    %6 = arith.addi %5, %c0_i32_4 : i32
    %c1_i32 = arith.constant 1 : i32
    %7 = arith.subi %c1_i32, %arg0 : i32
    %8 = arith.muli %7, %c0_i32_4 : i32
    %c7_i32 = arith.constant 7 : i32
    %9 = arith.subi %c7_i32, %c0_i32_4 : i32
    %10 = arith.muli %arg0, %9 : i32
    %11 = arith.addi %8, %10 : i32
    %c1_i32_5 = arith.constant 1 : i32
    %12 = arith.subi %c1_i32_5, %arg0 : i32
    %13 = arith.muli %12, %6 : i32
    %c15_i32 = arith.constant 15 : i32
    %14 = arith.subi %c15_i32, %6 : i32
    %15 = arith.muli %arg0, %14 : i32
    %16 = arith.addi %13, %15 : i32
    %c0_6 = arith.constant 0 : index
    %17 = arith.index_cast %11 : i32 to index
    %c0_7 = arith.constant 0 : index
    %c0_8 = arith.constant 0 : index
    %18 = vector.load %arg3[%c0_6, %17, %c0_7, %c0_8] : memref<1x8x8x512xbf16, #tpu.memory_space<vmem>>, vector<1x1x8x512xbf16>
    %19 = vector.shape_cast %18 : vector<1x1x8x512xbf16> to vector<8x512xbf16>
    %20 = arith.extf %19 : vector<8x512xbf16> to vector<8x512xf32>
    %c0_9 = arith.constant 0 : index
    %c0_10 = arith.constant 0 : index
    %21 = vector.load %arg7[%c0_9, %c0_10] : memref<8x128xf32, #tpu.memory_space<vmem>>, vector<8x128xf32>
    %22 = arith.truncf %21 : vector<8x128xf32> to vector<8x128xbf16>
    %cst = arith.constant dense<0.000000e+00> : vector<8x512xf32>
    %23 = tpu.matmul %22, %4, %cst {dimension_numbers = #tpu.dot_dimension_numbers<[1], [0], [0], [1], [0, 0, 1, 1], [], []>} : vector<8x128xbf16>, vector<128x512xbf16>, vector<8x512xf32> -> vector<8x512xf32>
    %24 = arith.addf %20, %23 : vector<8x512xf32>
    %25 = vector.extract_strided_slice %24 {offsets = [0, 0], sizes = [8, 128], strides = [1, 1]} : vector<8x512xf32> to vector<8x128xf32>
    %cst_11 = arith.constant 5.000000e-01 : f32
    %26 = vector.broadcast %cst_11 : f32 to vector<8x128xf32>
    %27 = arith.mulf %26, %25 : vector<8x128xf32>
    %28 = math.tanh %27 : vector<8x128xf32>
    %cst_12 = arith.constant 5.000000e-01 : f32
    %29 = vector.broadcast %cst_12 : f32 to vector<8x128xf32>
    %30 = arith.mulf %29, %28 : vector<8x128xf32>
    %cst_13 = arith.constant 5.000000e-01 : f32
    %31 = vector.broadcast %cst_13 : f32 to vector<8x128xf32>
    %32 = arith.addf %30, %31 : vector<8x128xf32>
    %33 = vector.extract_strided_slice %24 {offsets = [0, 128], sizes = [8, 128], strides = [1, 1]} : vector<8x512xf32> to vector<8x128xf32>
    %cst_14 = arith.constant 5.000000e-01 : f32
    %34 = vector.broadcast %cst_14 : f32 to vector<8x128xf32>
    %35 = arith.mulf %34, %33 : vector<8x128xf32>
    %36 = math.tanh %35 : vector<8x128xf32>
    %cst_15 = arith.constant 5.000000e-01 : f32
    %37 = vector.broadcast %cst_15 : f32 to vector<8x128xf32>
    %38 = arith.mulf %37, %36 : vector<8x128xf32>
    %cst_16 = arith.constant 5.000000e-01 : f32
    %39 = vector.broadcast %cst_16 : f32 to vector<8x128xf32>
    %40 = arith.addf %38, %39 : vector<8x128xf32>
    %41 = vector.extract_strided_slice %24 {offsets = [0, 256], sizes = [8, 128], strides = [1, 1]} : vector<8x512xf32> to vector<8x128xf32>
    %42 = math.tanh %41 : vector<8x128xf32>
    %43 = vector.extract_strided_slice %24 {offsets = [0, 384], sizes = [8, 128], strides = [1, 1]} : vector<8x512xf32> to vector<8x128xf32>
    %cst_17 = arith.constant 5.000000e-01 : f32
    %44 = vector.broadcast %cst_17 : f32 to vector<8x128xf32>
    %45 = arith.mulf %44, %43 : vector<8x128xf32>
    %46 = math.tanh %45 : vector<8x128xf32>
    %cst_18 = arith.constant 5.000000e-01 : f32
    %47 = vector.broadcast %cst_18 : f32 to vector<8x128xf32>
    %48 = arith.mulf %47, %46 : vector<8x128xf32>
    %cst_19 = arith.constant 5.000000e-01 : f32
    %49 = vector.broadcast %cst_19 : f32 to vector<8x128xf32>
    %50 = arith.addf %48, %49 : vector<8x128xf32>
    %c0_20 = arith.constant 0 : index
    %c0_21 = arith.constant 0 : index
    %51 = vector.load %arg8[%c0_20, %c0_21] : memref<8x128xf32, #tpu.memory_space<vmem>>, vector<8x128xf32>
    %52 = arith.mulf %40, %51 : vector<8x128xf32>
    %53 = arith.mulf %32, %42 : vector<8x128xf32>
    %54 = arith.addf %52, %53 : vector<8x128xf32>
    %55 = math.tanh %54 : vector<8x128xf32>
    %56 = arith.mulf %50, %55 : vector<8x128xf32>
    %57 = vector.broadcast %16 : i32 to vector<8x128xi32>
    %58 = arith.cmpi sgt, %3, %57 : vector<8x128xi32>
    %c0_22 = arith.constant 0 : index
    %c0_23 = arith.constant 0 : index
    %59 = vector.load %arg7[%c0_22, %c0_23] : memref<8x128xf32, #tpu.memory_space<vmem>>, vector<8x128xf32>
    %60 = arith.select %58, %56, %59 : vector<8x128xi1>, vector<8x128xf32>
    %c0_24 = arith.constant 0 : index
    %c0_25 = arith.constant 0 : index
    %61 = vector.load %arg7[%c0_24, %c0_25] : memref<8x128xf32, #tpu.memory_space<vmem>>, vector<8x128xf32>
    tpu.vector_store %arg7[%c0_24, %c0_25], %60 {strides = array<i32>} : memref<8x128xf32, #tpu.memory_space<vmem>>, vector<8x128xf32>,
    %c0_26 = arith.constant 0 : index
    %c0_27 = arith.constant 0 : index
    %62 = vector.load %arg8[%c0_26, %c0_27] : memref<8x128xf32, #tpu.memory_space<vmem>>, vector<8x128xf32>
    %63 = arith.select %58, %54, %62 : vector<8x128xi1>, vector<8x128xf32>
    %c0_28 = arith.constant 0 : index
    %c0_29 = arith.constant 0 : index
    %64 = vector.load %arg8[%c0_28, %c0_29] : memref<8x128xf32, #tpu.memory_space<vmem>>, vector<8x128xf32>
    tpu.vector_store %arg8[%c0_28, %c0_29], %63 {strides = array<i32>} : memref<8x128xf32, #tpu.memory_space<vmem>>, vector<8x128xf32>,
    %c1_i32_30 = arith.constant 1 : i32
    %c8_i32_31 = arith.constant 8 : i32
    %65 = arith.muli %arg1, %c8_i32_31 : i32
    %66 = arith.addi %65, %c1_i32_30 : i32
    %c1_i32_32 = arith.constant 1 : i32
    %67 = arith.subi %c1_i32_32, %arg0 : i32
    %68 = arith.muli %67, %c1_i32_30 : i32
    %c7_i32_33 = arith.constant 7 : i32
    %69 = arith.subi %c7_i32_33, %c1_i32_30 : i32
    %70 = arith.muli %arg0, %69 : i32
    %71 = arith.addi %68, %70 : i32
    %c1_i32_34 = arith.constant 1 : i32
    %72 = arith.subi %c1_i32_34, %arg0 : i32
    %73 = arith.muli %72, %66 : i32
    %c15_i32_35 = arith.constant 15 : i32
    %74 = arith.subi %c15_i32_35, %66 : i32
    %75 = arith.muli %arg0, %74 : i32
    %76 = arith.addi %73, %75 : i32
    %c0_36 = arith.constant 0 : index
    %77 = arith.index_cast %71 : i32 to index
    %c0_37 = arith.constant 0 : index
    %c0_38 = arith.constant 0 : index
    %78 = vector.load %arg3[%c0_36, %77, %c0_37, %c0_38] : memref<1x8x8x512xbf16, #tpu.memory_space<vmem>>, vector<1x1x8x512xbf16>
    %79 = vector.shape_cast %78 : vector<1x1x8x512xbf16> to vector<8x512xbf16>
    %80 = arith.extf %79 : vector<8x512xbf16> to vector<8x512xf32>
    %c0_39 = arith.constant 0 : index
    %c0_40 = arith.constant 0 : index
    %81 = vector.load %arg7[%c0_39, %c0_40] : memref<8x128xf32, #tpu.memory_space<vmem>>, vector<8x128xf32>
    %82 = arith.truncf %81 : vector<8x128xf32> to vector<8x128xbf16>
    %cst_41 = arith.constant dense<0.000000e+00> : vector<8x512xf32>
    %83 = tpu.matmul %82, %4, %cst_41 {dimension_numbers = #tpu.dot_dimension_numbers<[1], [0], [0], [1], [0, 0, 1, 1], [], []>} : vector<8x128xbf16>, vector<128x512xbf16>, vector<8x512xf32> -> vector<8x512xf32>
    %84 = arith.addf %80, %83 : vector<8x512xf32>
    %85 = vector.extract_strided_slice %84 {offsets = [0, 0], sizes = [8, 128], strides = [1, 1]} : vector<8x512xf32> to vector<8x128xf32>
    %cst_42 = arith.constant 5.000000e-01 : f32
    %86 = vector.broadcast %cst_42 : f32 to vector<8x128xf32>
    %87 = arith.mulf %86, %85 : vector<8x128xf32>
    %88 = math.tanh %87 : vector<8x128xf32>
    %cst_43 = arith.constant 5.000000e-01 : f32
    %89 = vector.broadcast %cst_43 : f32 to vector<8x128xf32>
    %90 = arith.mulf %89, %88 : vector<8x128xf32>
    %cst_44 = arith.constant 5.000000e-01 : f32
    %91 = vector.broadcast %cst_44 : f32 to vector<8x128xf32>
    %92 = arith.addf %90, %91 : vector<8x128xf32>
    %93 = vector.extract_strided_slice %84 {offsets = [0, 128], sizes = [8, 128], strides = [1, 1]} : vector<8x512xf32> to vector<8x128xf32>
    %cst_45 = arith.constant 5.000000e-01 : f32
    %94 = vector.broadcast %cst_45 : f32 to vector<8x128xf32>
    %95 = arith.mulf %94, %93 : vector<8x128xf32>
    %96 = math.tanh %95 : vector<8x128xf32>
    %cst_46 = arith.constant 5.000000e-01 : f32
    %97 = vector.broadcast %cst_46 : f32 to vector<8x128xf32>
    %98 = arith.mulf %97, %96 : vector<8x128xf32>
    %cst_47 = arith.constant 5.000000e-01 : f32
    %99 = vector.broadcast %cst_47 : f32 to vector<8x128xf32>
    %100 = arith.addf %98, %99 : vector<8x128xf32>
    %101 = vector.extract_strided_slice %84 {offsets = [0, 256], sizes = [8, 128], strides = [1, 1]} : vector<8x512xf32> to vector<8x128xf32>
    %102 = math.tanh %101 : vector<8x128xf32>
    %103 = vector.extract_strided_slice %84 {offsets = [0, 384], sizes = [8, 128], strides = [1, 1]} : vector<8x512xf32> to vector<8x128xf32>
    %cst_48 = arith.constant 5.000000e-01 : f32
    %104 = vector.broadcast %cst_48 : f32 to vector<8x128xf32>
    %105 = arith.mulf %104, %103 : vector<8x128xf32>
    %106 = math.tanh %105 : vector<8x128xf32>
    %cst_49 = arith.constant 5.000000e-01 : f32
    %107 = vector.broadcast %cst_49 : f32 to vector<8x128xf32>
    %108 = arith.mulf %107, %106 : vector<8x128xf32>
    %cst_50 = arith.constant 5.000000e-01 : f32
    %109 = vector.broadcast %cst_50 : f32 to vector<8x128xf32>
    %110 = arith.addf %108, %109 : vector<8x128xf32>
    %c0_51 = arith.constant 0 : index
    %c0_52 = arith.constant 0 : index
    %111 = vector.load %arg8[%c0_51, %c0_52] : memref<8x128xf32, #tpu.memory_space<vmem>>, vector<8x128xf32>
    %112 = arith.mulf %100, %111 : vector<8x128xf32>
    %113 = arith.mulf %92, %102 : vector<8x128xf32>
    %114 = arith.addf %112, %113 : vector<8x128xf32>
    %115 = math.tanh %114 : vector<8x128xf32>
    %116 = arith.mulf %110, %115 : vector<8x128xf32>
    %117 = vector.broadcast %76 : i32 to vector<8x128xi32>
    %118 = arith.cmpi sgt, %3, %117 : vector<8x128xi32>
    %c0_53 = arith.constant 0 : index
    %c0_54 = arith.constant 0 : index
    %119 = vector.load %arg7[%c0_53, %c0_54] : memref<8x128xf32, #tpu.memory_space<vmem>>, vector<8x128xf32>
    %120 = arith.select %118, %116, %119 : vector<8x128xi1>, vector<8x128xf32>
    %c0_55 = arith.constant 0 : index
    %c0_56 = arith.constant 0 : index
    %121 = vector.load %arg7[%c0_55, %c0_56] : memref<8x128xf32, #tpu.memory_space<vmem>>, vector<8x128xf32>
    tpu.vector_store %arg7[%c0_55, %c0_56], %120 {strides = array<i32>} : memref<8x128xf32, #tpu.memory_space<vmem>>, vector<8x128xf32>,
    %c0_57 = arith.constant 0 : index
    %c0_58 = arith.constant 0 : index
    %122 = vector.load %arg8[%c0_57, %c0_58] : memref<8x128xf32, #tpu.memory_space<vmem>>, vector<8x128xf32>
    %123 = arith.select %118, %114, %122 : vector<8x128xi1>, vector<8x128xf32>
    %c0_59 = arith.constant 0 : index
    %c0_60 = arith.constant 0 : index
    %124 = vector.load %arg8[%c0_59, %c0_60] : memref<8x128xf32, #tpu.memory_space<vmem>>, vector<8x128xf32>
    tpu.vector_store %arg8[%c0_59, %c0_60], %123 {strides = array<i32>} : memref<8x128xf32, #tpu.memory_space<vmem>>, vector<8x128xf32>,
    %c2_i32 = arith.constant 2 : i32
    %c8_i32_61 = arith.constant 8 : i32
    %125 = arith.muli %arg1, %c8_i32_61 : i32
    %126 = arith.addi %125, %c2_i32 : i32
    %c1_i32_62 = arith.constant 1 : i32
    %127 = arith.subi %c1_i32_62, %arg0 : i32
    %128 = arith.muli %127, %c2_i32 : i32
    %c7_i32_63 = arith.constant 7 : i32
    %129 = arith.subi %c7_i32_63, %c2_i32 : i32
    %130 = arith.muli %arg0, %129 : i32
    %131 = arith.addi %128, %130 : i32
    %c1_i32_64 = arith.constant 1 : i32
    %132 = arith.subi %c1_i32_64, %arg0 : i32
    %133 = arith.muli %132, %126 : i32
    %c15_i32_65 = arith.constant 15 : i32
    %134 = arith.subi %c15_i32_65, %126 : i32
    %135 = arith.muli %arg0, %134 : i32
    %136 = arith.addi %133, %135 : i32
    %c0_66 = arith.constant 0 : index
    %137 = arith.index_cast %131 : i32 to index
    %c0_67 = arith.constant 0 : index
    %c0_68 = arith.constant 0 : index
    %138 = vector.load %arg3[%c0_66, %137, %c0_67, %c0_68] : memref<1x8x8x512xbf16, #tpu.memory_space<vmem>>, vector<1x1x8x512xbf16>
    %139 = vector.shape_cast %138 : vector<1x1x8x512xbf16> to vector<8x512xbf16>
    %140 = arith.extf %139 : vector<8x512xbf16> to vector<8x512xf32>
    %c0_69 = arith.constant 0 : index
    %c0_70 = arith.constant 0 : index
    %141 = vector.load %arg7[%c0_69, %c0_70] : memref<8x128xf32, #tpu.memory_space<vmem>>, vector<8x128xf32>
    %142 = arith.truncf %141 : vector<8x128xf32> to vector<8x128xbf16>
    %cst_71 = arith.constant dense<0.000000e+00> : vector<8x512xf32>
    %143 = tpu.matmul %142, %4, %cst_71 {dimension_numbers = #tpu.dot_dimension_numbers<[1], [0], [0], [1], [0, 0, 1, 1], [], []>} : vector<8x128xbf16>, vector<128x512xbf16>, vector<8x512xf32> -> vector<8x512xf32>
    %144 = arith.addf %140, %143 : vector<8x512xf32>
    %145 = vector.extract_strided_slice %144 {offsets = [0, 0], sizes = [8, 128], strides = [1, 1]} : vector<8x512xf32> to vector<8x128xf32>
    %cst_72 = arith.constant 5.000000e-01 : f32
    %146 = vector.broadcast %cst_72 : f32 to vector<8x128xf32>
    %147 = arith.mulf %146, %145 : vector<8x128xf32>
    %148 = math.tanh %147 : vector<8x128xf32>
    %cst_73 = arith.constant 5.000000e-01 : f32
    %149 = vector.broadcast %cst_73 : f32 to vector<8x128xf32>
    %150 = arith.mulf %149, %148 : vector<8x128xf32>
    %cst_74 = arith.constant 5.000000e-01 : f32
    %151 = vector.broadcast %cst_74 : f32 to vector<8x128xf32>
    %152 = arith.addf %150, %151 : vector<8x128xf32>
    %153 = vector.extract_strided_slice %144 {offsets = [0, 128], sizes = [8, 128], strides = [1, 1]} : vector<8x512xf32> to vector<8x128xf32>
    %cst_75 = arith.constant 5.000000e-01 : f32
    %154 = vector.broadcast %cst_75 : f32 to vector<8x128xf32>
    %155 = arith.mulf %154, %153 : vector<8x128xf32>
    %156 = math.tanh %155 : vector<8x128xf32>
    %cst_76 = arith.constant 5.000000e-01 : f32
    %157 = vector.broadcast %cst_76 : f32 to vector<8x128xf32>
    %158 = arith.mulf %157, %156 : vector<8x128xf32>
    %cst_77 = arith.constant 5.000000e-01 : f32
    %159 = vector.broadcast %cst_77 : f32 to vector<8x128xf32>
    %160 = arith.addf %158, %159 : vector<8x128xf32>
    %161 = vector.extract_strided_slice %144 {offsets = [0, 256], sizes = [8, 128], strides = [1, 1]} : vector<8x512xf32> to vector<8x128xf32>
    %162 = math.tanh %161 : vector<8x128xf32>
    %163 = vector.extract_strided_slice %144 {offsets = [0, 384], sizes = [8, 128], strides = [1, 1]} : vector<8x512xf32> to vector<8x128xf32>
    %cst_78 = arith.constant 5.000000e-01 : f32
    %164 = vector.broadcast %cst_78 : f32 to vector<8x128xf32>
    %165 = arith.mulf %164, %163 : vector<8x128xf32>
    %166 = math.tanh %165 : vector<8x128xf32>
    %cst_79 = arith.constant 5.000000e-01 : f32
    %167 = vector.broadcast %cst_79 : f32 to vector<8x128xf32>
    %168 = arith.mulf %167, %166 : vector<8x128xf32>
    %cst_80 = arith.constant 5.000000e-01 : f32
    %169 = vector.broadcast %cst_80 : f32 to vector<8x128xf32>
    %170 = arith.addf %168, %169 : vector<8x128xf32>
    %c0_81 = arith.constant 0 : index
    %c0_82 = arith.constant 0 : index
    %171 = vector.load %arg8[%c0_81, %c0_82] : memref<8x128xf32, #tpu.memory_space<vmem>>, vector<8x128xf32>
    %172 = arith.mulf %160, %171 : vector<8x128xf32>
    %173 = arith.mulf %152, %162 : vector<8x128xf32>
    %174 = arith.addf %172, %173 : vector<8x128xf32>
    %175 = math.tanh %174 : vector<8x128xf32>
    %176 = arith.mulf %170, %175 : vector<8x128xf32>
    %177 = vector.broadcast %136 : i32 to vector<8x128xi32>
    %178 = arith.cmpi sgt, %3, %177 : vector<8x128xi32>
    %c0_83 = arith.constant 0 : index
    %c0_84 = arith.constant 0 : index
    %179 = vector.load %arg7[%c0_83, %c0_84] : memref<8x128xf32, #tpu.memory_space<vmem>>, vector<8x128xf32>
    %180 = arith.select %178, %176, %179 : vector<8x128xi1>, vector<8x128xf32>
    %c0_85 = arith.constant 0 : index
    %c0_86 = arith.constant 0 : index
    %181 = vector.load %arg7[%c0_85, %c0_86] : memref<8x128xf32, #tpu.memory_space<vmem>>, vector<8x128xf32>
    tpu.vector_store %arg7[%c0_85, %c0_86], %180 {strides = array<i32>} : memref<8x128xf32, #tpu.memory_space<vmem>>, vector<8x128xf32>,
    %c0_87 = arith.constant 0 : index
    %c0_88 = arith.constant 0 : index
    %182 = vector.load %arg8[%c0_87, %c0_88] : memref<8x128xf32, #tpu.memory_space<vmem>>, vector<8x128xf32>
    %183 = arith.select %178, %174, %182 : vector<8x128xi1>, vector<8x128xf32>
    %c0_89 = arith.constant 0 : index
    %c0_90 = arith.constant 0 : index
    %184 = vector.load %arg8[%c0_89, %c0_90] : memref<8x128xf32, #tpu.memory_space<vmem>>, vector<8x128xf32>
    tpu.vector_store %arg8[%c0_89, %c0_90], %183 {strides = array<i32>} : memref<8x128xf32, #tpu.memory_space<vmem>>, vector<8x128xf32>,
    %c3_i32 = arith.constant 3 : i32
    %c8_i32_91 = arith.constant 8 : i32
    %185 = arith.muli %arg1, %c8_i32_91 : i32
    %186 = arith.addi %185, %c3_i32 : i32
    %c1_i32_92 = arith.constant 1 : i32
    %187 = arith.subi %c1_i32_92, %arg0 : i32
    %188 = arith.muli %187, %c3_i32 : i32
    %c7_i32_93 = arith.constant 7 : i32
    %189 = arith.subi %c7_i32_93, %c3_i32 : i32
    %190 = arith.muli %arg0, %189 : i32
    %191 = arith.addi %188, %190 : i32
    %c1_i32_94 = arith.constant 1 : i32
    %192 = arith.subi %c1_i32_94, %arg0 : i32
    %193 = arith.muli %192, %186 : i32
    %c15_i32_95 = arith.constant 15 : i32
    %194 = arith.subi %c15_i32_95, %186 : i32
    %195 = arith.muli %arg0, %194 : i32
    %196 = arith.addi %193, %195 : i32
    %c0_96 = arith.constant 0 : index
    %197 = arith.index_cast %191 : i32 to index
    %c0_97 = arith.constant 0 : index
    %c0_98 = arith.constant 0 : index
    %198 = vector.load %arg3[%c0_96, %197, %c0_97, %c0_98] : memref<1x8x8x512xbf16, #tpu.memory_space<vmem>>, vector<1x1x8x512xbf16>
    %199 = vector.shape_cast %198 : vector<1x1x8x512xbf16> to vector<8x512xbf16>
    %200 = arith.extf %199 : vector<8x512xbf16> to vector<8x512xf32>
    %c0_99 = arith.constant 0 : index
    %c0_100 = arith.constant 0 : index
    %201 = vector.load %arg7[%c0_99, %c0_100] : memref<8x128xf32, #tpu.memory_space<vmem>>, vector<8x128xf32>
    %202 = arith.truncf %201 : vector<8x128xf32> to vector<8x128xbf16>
    %cst_101 = arith.constant dense<0.000000e+00> : vector<8x512xf32>
    %203 = tpu.matmul %202, %4, %cst_101 {dimension_numbers = #tpu.dot_dimension_numbers<[1], [0], [0], [1], [0, 0, 1, 1], [], []>} : vector<8x128xbf16>, vector<128x512xbf16>, vector<8x512xf32> -> vector<8x512xf32>
    %204 = arith.addf %200, %203 : vector<8x512xf32>
    %205 = vector.extract_strided_slice %204 {offsets = [0, 0], sizes = [8, 128], strides = [1, 1]} : vector<8x512xf32> to vector<8x128xf32>
    %cst_102 = arith.constant 5.000000e-01 : f32
    %206 = vector.broadcast %cst_102 : f32 to vector<8x128xf32>
    %207 = arith.mulf %206, %205 : vector<8x128xf32>
    %208 = math.tanh %207 : vector<8x128xf32>
    %cst_103 = arith.constant 5.000000e-01 : f32
    %209 = vector.broadcast %cst_103 : f32 to vector<8x128xf32>
    %210 = arith.mulf %209, %208 : vector<8x128xf32>
    %cst_104 = arith.constant 5.000000e-01 : f32
    %211 = vector.broadcast %cst_104 : f32 to vector<8x128xf32>
    %212 = arith.addf %210, %211 : vector<8x128xf32>
    %213 = vector.extract_strided_slice %204 {offsets = [0, 128], sizes = [8, 128], strides = [1, 1]} : vector<8x512xf32> to vector<8x128xf32>
    %cst_105 = arith.constant 5.000000e-01 : f32
    %214 = vector.broadcast %cst_105 : f32 to vector<8x128xf32>
    %215 = arith.mulf %214, %213 : vector<8x128xf32>
    %216 = math.tanh %215 : vector<8x128xf32>
    %cst_106 = arith.constant 5.000000e-01 : f32
    %217 = vector.broadcast %cst_106 : f32 to vector<8x128xf32>
    %218 = arith.mulf %217, %216 : vector<8x128xf32>
    %cst_107 = arith.constant 5.000000e-01 : f32
    %219 = vector.broadcast %cst_107 : f32 to vector<8x128xf32>
    %220 = arith.addf %218, %219 : vector<8x128xf32>
    %221 = vector.extract_strided_slice %204 {offsets = [0, 256], sizes = [8, 128], strides = [1, 1]} : vector<8x512xf32> to vector<8x128xf32>
    %222 = math.tanh %221 : vector<8x128xf32>
    %223 = vector.extract_strided_slice %204 {offsets = [0, 384], sizes = [8, 128], strides = [1, 1]} : vector<8x512xf32> to vector<8x128xf32>
    %cst_108 = arith.constant 5.000000e-01 : f32
    %224 = vector.broadcast %cst_108 : f32 to vector<8x128xf32>
    %225 = arith.mulf %224, %223 : vector<8x128xf32>
    %226 = math.tanh %225 : vector<8x128xf32>
    %cst_109 = arith.constant 5.000000e-01 : f32
    %227 = vector.broadcast %cst_109 : f32 to vector<8x128xf32>
    %228 = arith.mulf %227, %226 : vector<8x128xf32>
    %cst_110 = arith.constant 5.000000e-01 : f32
    %229 = vector.broadcast %cst_110 : f32 to vector<8x128xf32>
    %230 = arith.addf %228, %229 : vector<8x128xf32>
    %c0_111 = arith.constant 0 : index
    %c0_112 = arith.constant 0 : index
    %231 = vector.load %arg8[%c0_111, %c0_112] : memref<8x128xf32, #tpu.memory_space<vmem>>, vector<8x128xf32>
    %232 = arith.mulf %220, %231 : vector<8x128xf32>
    %233 = arith.mulf %212, %222 : vector<8x128xf32>
    %234 = arith.addf %232, %233 : vector<8x128xf32>
    %235 = math.tanh %234 : vector<8x128xf32>
    %236 = arith.mulf %230, %235 : vector<8x128xf32>
    %237 = vector.broadcast %196 : i32 to vector<8x128xi32>
    %238 = arith.cmpi sgt, %3, %237 : vector<8x128xi32>
    %c0_113 = arith.constant 0 : index
    %c0_114 = arith.constant 0 : index
    %239 = vector.load %arg7[%c0_113, %c0_114] : memref<8x128xf32, #tpu.memory_space<vmem>>, vector<8x128xf32>
    %240 = arith.select %238, %236, %239 : vector<8x128xi1>, vector<8x128xf32>
    %c0_115 = arith.constant 0 : index
    %c0_116 = arith.constant 0 : index
    %241 = vector.load %arg7[%c0_115, %c0_116] : memref<8x128xf32, #tpu.memory_space<vmem>>, vector<8x128xf32>
    tpu.vector_store %arg7[%c0_115, %c0_116], %240 {strides = array<i32>} : memref<8x128xf32, #tpu.memory_space<vmem>>, vector<8x128xf32>,
    %c0_117 = arith.constant 0 : index
    %c0_118 = arith.constant 0 : index
    %242 = vector.load %arg8[%c0_117, %c0_118] : memref<8x128xf32, #tpu.memory_space<vmem>>, vector<8x128xf32>
    %243 = arith.select %238, %234, %242 : vector<8x128xi1>, vector<8x128xf32>
    %c0_119 = arith.constant 0 : index
    %c0_120 = arith.constant 0 : index
    %244 = vector.load %arg8[%c0_119, %c0_120] : memref<8x128xf32, #tpu.memory_space<vmem>>, vector<8x128xf32>
    tpu.vector_store %arg8[%c0_119, %c0_120], %243 {strides = array<i32>} : memref<8x128xf32, #tpu.memory_space<vmem>>, vector<8x128xf32>,
    %c4_i32 = arith.constant 4 : i32
    %c8_i32_121 = arith.constant 8 : i32
    %245 = arith.muli %arg1, %c8_i32_121 : i32
    %246 = arith.addi %245, %c4_i32 : i32
    %c1_i32_122 = arith.constant 1 : i32
    %247 = arith.subi %c1_i32_122, %arg0 : i32
    %248 = arith.muli %247, %c4_i32 : i32
    %c7_i32_123 = arith.constant 7 : i32
    %249 = arith.subi %c7_i32_123, %c4_i32 : i32
    %250 = arith.muli %arg0, %249 : i32
    %251 = arith.addi %248, %250 : i32
    %c1_i32_124 = arith.constant 1 : i32
    %252 = arith.subi %c1_i32_124, %arg0 : i32
    %253 = arith.muli %252, %246 : i32
    %c15_i32_125 = arith.constant 15 : i32
    %254 = arith.subi %c15_i32_125, %246 : i32
    %255 = arith.muli %arg0, %254 : i32
    %256 = arith.addi %253, %255 : i32
    %c0_126 = arith.constant 0 : index
    %257 = arith.index_cast %251 : i32 to index
    %c0_127 = arith.constant 0 : index
    %c0_128 = arith.constant 0 : index
    %258 = vector.load %arg3[%c0_126, %257, %c0_127, %c0_128] : memref<1x8x8x512xbf16, #tpu.memory_space<vmem>>, vector<1x1x8x512xbf16>
    %259 = vector.shape_cast %258 : vector<1x1x8x512xbf16> to vector<8x512xbf16>
    %260 = arith.extf %259 : vector<8x512xbf16> to vector<8x512xf32>
    %c0_129 = arith.constant 0 : index
    %c0_130 = arith.constant 0 : index
    %261 = vector.load %arg7[%c0_129, %c0_130] : memref<8x128xf32, #tpu.memory_space<vmem>>, vector<8x128xf32>
    %262 = arith.truncf %261 : vector<8x128xf32> to vector<8x128xbf16>
    %cst_131 = arith.constant dense<0.000000e+00> : vector<8x512xf32>
    %263 = tpu.matmul %262, %4, %cst_131 {dimension_numbers = #tpu.dot_dimension_numbers<[1], [0], [0], [1], [0, 0, 1, 1], [], []>} : vector<8x128xbf16>, vector<128x512xbf16>, vector<8x512xf32> -> vector<8x512xf32>
    %264 = arith.addf %260, %263 : vector<8x512xf32>
    %265 = vector.extract_strided_slice %264 {offsets = [0, 0], sizes = [8, 128], strides = [1, 1]} : vector<8x512xf32> to vector<8x128xf32>
    %cst_132 = arith.constant 5.000000e-01 : f32
    %266 = vector.broadcast %cst_132 : f32 to vector<8x128xf32>
    %267 = arith.mulf %266, %265 : vector<8x128xf32>
    %268 = math.tanh %267 : vector<8x128xf32>
    %cst_133 = arith.constant 5.000000e-01 : f32
    %269 = vector.broadcast %cst_133 : f32 to vector<8x128xf32>
    %270 = arith.mulf %269, %268 : vector<8x128xf32>
    %cst_134 = arith.constant 5.000000e-01 : f32
    %271 = vector.broadcast %cst_134 : f32 to vector<8x128xf32>
    %272 = arith.addf %270, %271 : vector<8x128xf32>
    %273 = vector.extract_strided_slice %264 {offsets = [0, 128], sizes = [8, 128], strides = [1, 1]} : vector<8x512xf32> to vector<8x128xf32>
    %cst_135 = arith.constant 5.000000e-01 : f32
    %274 = vector.broadcast %cst_135 : f32 to vector<8x128xf32>
    %275 = arith.mulf %274, %273 : vector<8x128xf32>
    %276 = math.tanh %275 : vector<8x128xf32>
    %cst_136 = arith.constant 5.000000e-01 : f32
    %277 = vector.broadcast %cst_136 : f32 to vector<8x128xf32>
    %278 = arith.mulf %277, %276 : vector<8x128xf32>
    %cst_137 = arith.constant 5.000000e-01 : f32
    %279 = vector.broadcast %cst_137 : f32 to vector<8x128xf32>
    %280 = arith.addf %278, %279 : vector<8x128xf32>
    %281 = vector.extract_strided_slice %264 {offsets = [0, 256], sizes = [8, 128], strides = [1, 1]} : vector<8x512xf32> to vector<8x128xf32>
    %282 = math.tanh %281 : vector<8x128xf32>
    %283 = vector.extract_strided_slice %264 {offsets = [0, 384], sizes = [8, 128], strides = [1, 1]} : vector<8x512xf32> to vector<8x128xf32>
    %cst_138 = arith.constant 5.000000e-01 : f32
    %284 = vector.broadcast %cst_138 : f32 to vector<8x128xf32>
    %285 = arith.mulf %284, %283 : vector<8x128xf32>
    %286 = math.tanh %285 : vector<8x128xf32>
    %cst_139 = arith.constant 5.000000e-01 : f32
    %287 = vector.broadcast %cst_139 : f32 to vector<8x128xf32>
    %288 = arith.mulf %287, %286 : vector<8x128xf32>
    %cst_140 = arith.constant 5.000000e-01 : f32
    %289 = vector.broadcast %cst_140 : f32 to vector<8x128xf32>
    %290 = arith.addf %288, %289 : vector<8x128xf32>
    %c0_141 = arith.constant 0 : index
    %c0_142 = arith.constant 0 : index
    %291 = vector.load %arg8[%c0_141, %c0_142] : memref<8x128xf32, #tpu.memory_space<vmem>>, vector<8x128xf32>
    %292 = arith.mulf %280, %291 : vector<8x128xf32>
    %293 = arith.mulf %272, %282 : vector<8x128xf32>
    %294 = arith.addf %292, %293 : vector<8x128xf32>
    %295 = math.tanh %294 : vector<8x128xf32>
    %296 = arith.mulf %290, %295 : vector<8x128xf32>
    %297 = vector.broadcast %256 : i32 to vector<8x128xi32>
    %298 = arith.cmpi sgt, %3, %297 : vector<8x128xi32>
    %c0_143 = arith.constant 0 : index
    %c0_144 = arith.constant 0 : index
    %299 = vector.load %arg7[%c0_143, %c0_144] : memref<8x128xf32, #tpu.memory_space<vmem>>, vector<8x128xf32>
    %300 = arith.select %298, %296, %299 : vector<8x128xi1>, vector<8x128xf32>
    %c0_145 = arith.constant 0 : index
    %c0_146 = arith.constant 0 : index
    %301 = vector.load %arg7[%c0_145, %c0_146] : memref<8x128xf32, #tpu.memory_space<vmem>>, vector<8x128xf32>
    tpu.vector_store %arg7[%c0_145, %c0_146], %300 {strides = array<i32>} : memref<8x128xf32, #tpu.memory_space<vmem>>, vector<8x128xf32>,
    %c0_147 = arith.constant 0 : index
    %c0_148 = arith.constant 0 : index
    %302 = vector.load %arg8[%c0_147, %c0_148] : memref<8x128xf32, #tpu.memory_space<vmem>>, vector<8x128xf32>
    %303 = arith.select %298, %294, %302 : vector<8x128xi1>, vector<8x128xf32>
    %c0_149 = arith.constant 0 : index
    %c0_150 = arith.constant 0 : index
    %304 = vector.load %arg8[%c0_149, %c0_150] : memref<8x128xf32, #tpu.memory_space<vmem>>, vector<8x128xf32>
    tpu.vector_store %arg8[%c0_149, %c0_150], %303 {strides = array<i32>} : memref<8x128xf32, #tpu.memory_space<vmem>>, vector<8x128xf32>,
    %c5_i32 = arith.constant 5 : i32
    %c8_i32_151 = arith.constant 8 : i32
    %305 = arith.muli %arg1, %c8_i32_151 : i32
    %306 = arith.addi %305, %c5_i32 : i32
    %c1_i32_152 = arith.constant 1 : i32
    %307 = arith.subi %c1_i32_152, %arg0 : i32
    %308 = arith.muli %307, %c5_i32 : i32
    %c7_i32_153 = arith.constant 7 : i32
    %309 = arith.subi %c7_i32_153, %c5_i32 : i32
    %310 = arith.muli %arg0, %309 : i32
    %311 = arith.addi %308, %310 : i32
    %c1_i32_154 = arith.constant 1 : i32
    %312 = arith.subi %c1_i32_154, %arg0 : i32
    %313 = arith.muli %312, %306 : i32
    %c15_i32_155 = arith.constant 15 : i32
    %314 = arith.subi %c15_i32_155, %306 : i32
    %315 = arith.muli %arg0, %314 : i32
    %316 = arith.addi %313, %315 : i32
    %c0_156 = arith.constant 0 : index
    %317 = arith.index_cast %311 : i32 to index
    %c0_157 = arith.constant 0 : index
    %c0_158 = arith.constant 0 : index
    %318 = vector.load %arg3[%c0_156, %317, %c0_157, %c0_158] : memref<1x8x8x512xbf16, #tpu.memory_space<vmem>>, vector<1x1x8x512xbf16>
    %319 = vector.shape_cast %318 : vector<1x1x8x512xbf16> to vector<8x512xbf16>
    %320 = arith.extf %319 : vector<8x512xbf16> to vector<8x512xf32>
    %c0_159 = arith.constant 0 : index
    %c0_160 = arith.constant 0 : index
    %321 = vector.load %arg7[%c0_159, %c0_160] : memref<8x128xf32, #tpu.memory_space<vmem>>, vector<8x128xf32>
    %322 = arith.truncf %321 : vector<8x128xf32> to vector<8x128xbf16>
    %cst_161 = arith.constant dense<0.000000e+00> : vector<8x512xf32>
    %323 = tpu.matmul %322, %4, %cst_161 {dimension_numbers = #tpu.dot_dimension_numbers<[1], [0], [0], [1], [0, 0, 1, 1], [], []>} : vector<8x128xbf16>, vector<128x512xbf16>, vector<8x512xf32> -> vector<8x512xf32>
    %324 = arith.addf %320, %323 : vector<8x512xf32>
    %325 = vector.extract_strided_slice %324 {offsets = [0, 0], sizes = [8, 128], strides = [1, 1]} : vector<8x512xf32> to vector<8x128xf32>
    %cst_162 = arith.constant 5.000000e-01 : f32
    %326 = vector.broadcast %cst_162 : f32 to vector<8x128xf32>
    %327 = arith.mulf %326, %325 : vector<8x128xf32>
    %328 = math.tanh %327 : vector<8x128xf32>
    %cst_163 = arith.constant 5.000000e-01 : f32
    %329 = vector.broadcast %cst_163 : f32 to vector<8x128xf32>
    %330 = arith.mulf %329, %328 : vector<8x128xf32>
    %cst_164 = arith.constant 5.000000e-01 : f32
    %331 = vector.broadcast %cst_164 : f32 to vector<8x128xf32>
    %332 = arith.addf %330, %331 : vector<8x128xf32>
    %333 = vector.extract_strided_slice %324 {offsets = [0, 128], sizes = [8, 128], strides = [1, 1]} : vector<8x512xf32> to vector<8x128xf32>
    %cst_165 = arith.constant 5.000000e-01 : f32
    %334 = vector.broadcast %cst_165 : f32 to vector<8x128xf32>
    %335 = arith.mulf %334, %333 : vector<8x128xf32>
    %336 = math.tanh %335 : vector<8x128xf32>
    %cst_166 = arith.constant 5.000000e-01 : f32
    %337 = vector.broadcast %cst_166 : f32 to vector<8x128xf32>
    %338 = arith.mulf %337, %336 : vector<8x128xf32>
    %cst_167 = arith.constant 5.000000e-01 : f32
    %339 = vector.broadcast %cst_167 : f32 to vector<8x128xf32>
    %340 = arith.addf %338, %339 : vector<8x128xf32>
    %341 = vector.extract_strided_slice %324 {offsets = [0, 256], sizes = [8, 128], strides = [1, 1]} : vector<8x512xf32> to vector<8x128xf32>
    %342 = math.tanh %341 : vector<8x128xf32>
    %343 = vector.extract_strided_slice %324 {offsets = [0, 384], sizes = [8, 128], strides = [1, 1]} : vector<8x512xf32> to vector<8x128xf32>
    %cst_168 = arith.constant 5.000000e-01 : f32
    %344 = vector.broadcast %cst_168 : f32 to vector<8x128xf32>
    %345 = arith.mulf %344, %343 : vector<8x128xf32>
    %346 = math.tanh %345 : vector<8x128xf32>
    %cst_169 = arith.constant 5.000000e-01 : f32
    %347 = vector.broadcast %cst_169 : f32 to vector<8x128xf32>
    %348 = arith.mulf %347, %346 : vector<8x128xf32>
    %cst_170 = arith.constant 5.000000e-01 : f32
    %349 = vector.broadcast %cst_170 : f32 to vector<8x128xf32>
    %350 = arith.addf %348, %349 : vector<8x128xf32>
    %c0_171 = arith.constant 0 : index
    %c0_172 = arith.constant 0 : index
    %351 = vector.load %arg8[%c0_171, %c0_172] : memref<8x128xf32, #tpu.memory_space<vmem>>, vector<8x128xf32>
    %352 = arith.mulf %340, %351 : vector<8x128xf32>
    %353 = arith.mulf %332, %342 : vector<8x128xf32>
    %354 = arith.addf %352, %353 : vector<8x128xf32>
    %355 = math.tanh %354 : vector<8x128xf32>
    %356 = arith.mulf %350, %355 : vector<8x128xf32>
    %357 = vector.broadcast %316 : i32 to vector<8x128xi32>
    %358 = arith.cmpi sgt, %3, %357 : vector<8x128xi32>
    %c0_173 = arith.constant 0 : index
    %c0_174 = arith.constant 0 : index
    %359 = vector.load %arg7[%c0_173, %c0_174] : memref<8x128xf32, #tpu.memory_space<vmem>>, vector<8x128xf32>
    %360 = arith.select %358, %356, %359 : vector<8x128xi1>, vector<8x128xf32>
    %c0_175 = arith.constant 0 : index
    %c0_176 = arith.constant 0 : index
    %361 = vector.load %arg7[%c0_175, %c0_176] : memref<8x128xf32, #tpu.memory_space<vmem>>, vector<8x128xf32>
    tpu.vector_store %arg7[%c0_175, %c0_176], %360 {strides = array<i32>} : memref<8x128xf32, #tpu.memory_space<vmem>>, vector<8x128xf32>,
    %c0_177 = arith.constant 0 : index
    %c0_178 = arith.constant 0 : index
    %362 = vector.load %arg8[%c0_177, %c0_178] : memref<8x128xf32, #tpu.memory_space<vmem>>, vector<8x128xf32>
    %363 = arith.select %358, %354, %362 : vector<8x128xi1>, vector<8x128xf32>
    %c0_179 = arith.constant 0 : index
    %c0_180 = arith.constant 0 : index
    %364 = vector.load %arg8[%c0_179, %c0_180] : memref<8x128xf32, #tpu.memory_space<vmem>>, vector<8x128xf32>
    tpu.vector_store %arg8[%c0_179, %c0_180], %363 {strides = array<i32>} : memref<8x128xf32, #tpu.memory_space<vmem>>, vector<8x128xf32>,
    %c6_i32 = arith.constant 6 : i32
    %c8_i32_181 = arith.constant 8 : i32
    %365 = arith.muli %arg1, %c8_i32_181 : i32
    %366 = arith.addi %365, %c6_i32 : i32
    %c1_i32_182 = arith.constant 1 : i32
    %367 = arith.subi %c1_i32_182, %arg0 : i32
    %368 = arith.muli %367, %c6_i32 : i32
    %c7_i32_183 = arith.constant 7 : i32
    %369 = arith.subi %c7_i32_183, %c6_i32 : i32
    %370 = arith.muli %arg0, %369 : i32
    %371 = arith.addi %368, %370 : i32
    %c1_i32_184 = arith.constant 1 : i32
    %372 = arith.subi %c1_i32_184, %arg0 : i32
    %373 = arith.muli %372, %366 : i32
    %c15_i32_185 = arith.constant 15 : i32
    %374 = arith.subi %c15_i32_185, %366 : i32
    %375 = arith.muli %arg0, %374 : i32
    %376 = arith.addi %373, %375 : i32
    %c0_186 = arith.constant 0 : index
    %377 = arith.index_cast %371 : i32 to index
    %c0_187 = arith.constant 0 : index
    %c0_188 = arith.constant 0 : index
    %378 = vector.load %arg3[%c0_186, %377, %c0_187, %c0_188] : memref<1x8x8x512xbf16, #tpu.memory_space<vmem>>, vector<1x1x8x512xbf16>
    %379 = vector.shape_cast %378 : vector<1x1x8x512xbf16> to vector<8x512xbf16>
    %380 = arith.extf %379 : vector<8x512xbf16> to vector<8x512xf32>
    %c0_189 = arith.constant 0 : index
    %c0_190 = arith.constant 0 : index
    %381 = vector.load %arg7[%c0_189, %c0_190] : memref<8x128xf32, #tpu.memory_space<vmem>>, vector<8x128xf32>
    %382 = arith.truncf %381 : vector<8x128xf32> to vector<8x128xbf16>
    %cst_191 = arith.constant dense<0.000000e+00> : vector<8x512xf32>
    %383 = tpu.matmul %382, %4, %cst_191 {dimension_numbers = #tpu.dot_dimension_numbers<[1], [0], [0], [1], [0, 0, 1, 1], [], []>} : vector<8x128xbf16>, vector<128x512xbf16>, vector<8x512xf32> -> vector<8x512xf32>
    %384 = arith.addf %380, %383 : vector<8x512xf32>
    %385 = vector.extract_strided_slice %384 {offsets = [0, 0], sizes = [8, 128], strides = [1, 1]} : vector<8x512xf32> to vector<8x128xf32>
    %cst_192 = arith.constant 5.000000e-01 : f32
    %386 = vector.broadcast %cst_192 : f32 to vector<8x128xf32>
    %387 = arith.mulf %386, %385 : vector<8x128xf32>
    %388 = math.tanh %387 : vector<8x128xf32>
    %cst_193 = arith.constant 5.000000e-01 : f32
    %389 = vector.broadcast %cst_193 : f32 to vector<8x128xf32>
    %390 = arith.mulf %389, %388 : vector<8x128xf32>
    %cst_194 = arith.constant 5.000000e-01 : f32
    %391 = vector.broadcast %cst_194 : f32 to vector<8x128xf32>
    %392 = arith.addf %390, %391 : vector<8x128xf32>
    %393 = vector.extract_strided_slice %384 {offsets = [0, 128], sizes = [8, 128], strides = [1, 1]} : vector<8x512xf32> to vector<8x128xf32>
    %cst_195 = arith.constant 5.000000e-01 : f32
    %394 = vector.broadcast %cst_195 : f32 to vector<8x128xf32>
    %395 = arith.mulf %394, %393 : vector<8x128xf32>
    %396 = math.tanh %395 : vector<8x128xf32>
    %cst_196 = arith.constant 5.000000e-01 : f32
    %397 = vector.broadcast %cst_196 : f32 to vector<8x128xf32>
    %398 = arith.mulf %397, %396 : vector<8x128xf32>
    %cst_197 = arith.constant 5.000000e-01 : f32
    %399 = vector.broadcast %cst_197 : f32 to vector<8x128xf32>
    %400 = arith.addf %398, %399 : vector<8x128xf32>
    %401 = vector.extract_strided_slice %384 {offsets = [0, 256], sizes = [8, 128], strides = [1, 1]} : vector<8x512xf32> to vector<8x128xf32>
    %402 = math.tanh %401 : vector<8x128xf32>
    %403 = vector.extract_strided_slice %384 {offsets = [0, 384], sizes = [8, 128], strides = [1, 1]} : vector<8x512xf32> to vector<8x128xf32>
    %cst_198 = arith.constant 5.000000e-01 : f32
    %404 = vector.broadcast %cst_198 : f32 to vector<8x128xf32>
    %405 = arith.mulf %404, %403 : vector<8x128xf32>
    %406 = math.tanh %405 : vector<8x128xf32>
    %cst_199 = arith.constant 5.000000e-01 : f32
    %407 = vector.broadcast %cst_199 : f32 to vector<8x128xf32>
    %408 = arith.mulf %407, %406 : vector<8x128xf32>
    %cst_200 = arith.constant 5.000000e-01 : f32
    %409 = vector.broadcast %cst_200 : f32 to vector<8x128xf32>
    %410 = arith.addf %408, %409 : vector<8x128xf32>
    %c0_201 = arith.constant 0 : index
    %c0_202 = arith.constant 0 : index
    %411 = vector.load %arg8[%c0_201, %c0_202] : memref<8x128xf32, #tpu.memory_space<vmem>>, vector<8x128xf32>
    %412 = arith.mulf %400, %411 : vector<8x128xf32>
    %413 = arith.mulf %392, %402 : vector<8x128xf32>
    %414 = arith.addf %412, %413 : vector<8x128xf32>
    %415 = math.tanh %414 : vector<8x128xf32>
    %416 = arith.mulf %410, %415 : vector<8x128xf32>
    %417 = vector.broadcast %376 : i32 to vector<8x128xi32>
    %418 = arith.cmpi sgt, %3, %417 : vector<8x128xi32>
    %c0_203 = arith.constant 0 : index
    %c0_204 = arith.constant 0 : index
    %419 = vector.load %arg7[%c0_203, %c0_204] : memref<8x128xf32, #tpu.memory_space<vmem>>, vector<8x128xf32>
    %420 = arith.select %418, %416, %419 : vector<8x128xi1>, vector<8x128xf32>
    %c0_205 = arith.constant 0 : index
    %c0_206 = arith.constant 0 : index
    %421 = vector.load %arg7[%c0_205, %c0_206] : memref<8x128xf32, #tpu.memory_space<vmem>>, vector<8x128xf32>
    tpu.vector_store %arg7[%c0_205, %c0_206], %420 {strides = array<i32>} : memref<8x128xf32, #tpu.memory_space<vmem>>, vector<8x128xf32>,
    %c0_207 = arith.constant 0 : index
    %c0_208 = arith.constant 0 : index
    %422 = vector.load %arg8[%c0_207, %c0_208] : memref<8x128xf32, #tpu.memory_space<vmem>>, vector<8x128xf32>
    %423 = arith.select %418, %414, %422 : vector<8x128xi1>, vector<8x128xf32>
    %c0_209 = arith.constant 0 : index
    %c0_210 = arith.constant 0 : index
    %424 = vector.load %arg8[%c0_209, %c0_210] : memref<8x128xf32, #tpu.memory_space<vmem>>, vector<8x128xf32>
    tpu.vector_store %arg8[%c0_209, %c0_210], %423 {strides = array<i32>} : memref<8x128xf32, #tpu.memory_space<vmem>>, vector<8x128xf32>,
    %c7_i32_211 = arith.constant 7 : i32
    %c8_i32_212 = arith.constant 8 : i32
    %425 = arith.muli %arg1, %c8_i32_212 : i32
    %426 = arith.addi %425, %c7_i32_211 : i32
    %c1_i32_213 = arith.constant 1 : i32
    %427 = arith.subi %c1_i32_213, %arg0 : i32
    %428 = arith.muli %427, %c7_i32_211 : i32
    %c7_i32_214 = arith.constant 7 : i32
    %429 = arith.subi %c7_i32_214, %c7_i32_211 : i32
    %430 = arith.muli %arg0, %429 : i32
    %431 = arith.addi %428, %430 : i32
    %c1_i32_215 = arith.constant 1 : i32
    %432 = arith.subi %c1_i32_215, %arg0 : i32
    %433 = arith.muli %432, %426 : i32
    %c15_i32_216 = arith.constant 15 : i32
    %434 = arith.subi %c15_i32_216, %426 : i32
    %435 = arith.muli %arg0, %434 : i32
    %436 = arith.addi %433, %435 : i32
    %c0_217 = arith.constant 0 : index
    %437 = arith.index_cast %431 : i32 to index
    %c0_218 = arith.constant 0 : index
    %c0_219 = arith.constant 0 : index
    %438 = vector.load %arg3[%c0_217, %437, %c0_218, %c0_219] : memref<1x8x8x512xbf16, #tpu.memory_space<vmem>>, vector<1x1x8x512xbf16>
    %439 = vector.shape_cast %438 : vector<1x1x8x512xbf16> to vector<8x512xbf16>
    %440 = arith.extf %439 : vector<8x512xbf16> to vector<8x512xf32>
    %c0_220 = arith.constant 0 : index
    %c0_221 = arith.constant 0 : index
    %441 = vector.load %arg7[%c0_220, %c0_221] : memref<8x128xf32, #tpu.memory_space<vmem>>, vector<8x128xf32>
    %442 = arith.truncf %441 : vector<8x128xf32> to vector<8x128xbf16>
    %cst_222 = arith.constant dense<0.000000e+00> : vector<8x512xf32>
    %443 = tpu.matmul %442, %4, %cst_222 {dimension_numbers = #tpu.dot_dimension_numbers<[1], [0], [0], [1], [0, 0, 1, 1], [], []>} : vector<8x128xbf16>, vector<128x512xbf16>, vector<8x512xf32> -> vector<8x512xf32>
    %444 = arith.addf %440, %443 : vector<8x512xf32>
    %445 = vector.extract_strided_slice %444 {offsets = [0, 0], sizes = [8, 128], strides = [1, 1]} : vector<8x512xf32> to vector<8x128xf32>
    %cst_223 = arith.constant 5.000000e-01 : f32
    %446 = vector.broadcast %cst_223 : f32 to vector<8x128xf32>
    %447 = arith.mulf %446, %445 : vector<8x128xf32>
    %448 = math.tanh %447 : vector<8x128xf32>
    %cst_224 = arith.constant 5.000000e-01 : f32
    %449 = vector.broadcast %cst_224 : f32 to vector<8x128xf32>
    %450 = arith.mulf %449, %448 : vector<8x128xf32>
    %cst_225 = arith.constant 5.000000e-01 : f32
    %451 = vector.broadcast %cst_225 : f32 to vector<8x128xf32>
    %452 = arith.addf %450, %451 : vector<8x128xf32>
    %453 = vector.extract_strided_slice %444 {offsets = [0, 128], sizes = [8, 128], strides = [1, 1]} : vector<8x512xf32> to vector<8x128xf32>
    %cst_226 = arith.constant 5.000000e-01 : f32
    %454 = vector.broadcast %cst_226 : f32 to vector<8x128xf32>
    %455 = arith.mulf %454, %453 : vector<8x128xf32>
    %456 = math.tanh %455 : vector<8x128xf32>
    %cst_227 = arith.constant 5.000000e-01 : f32
    %457 = vector.broadcast %cst_227 : f32 to vector<8x128xf32>
    %458 = arith.mulf %457, %456 : vector<8x128xf32>
    %cst_228 = arith.constant 5.000000e-01 : f32
    %459 = vector.broadcast %cst_228 : f32 to vector<8x128xf32>
    %460 = arith.addf %458, %459 : vector<8x128xf32>
    %461 = vector.extract_strided_slice %444 {offsets = [0, 256], sizes = [8, 128], strides = [1, 1]} : vector<8x512xf32> to vector<8x128xf32>
    %462 = math.tanh %461 : vector<8x128xf32>
    %463 = vector.extract_strided_slice %444 {offsets = [0, 384], sizes = [8, 128], strides = [1, 1]} : vector<8x512xf32> to vector<8x128xf32>
    %cst_229 = arith.constant 5.000000e-01 : f32
    %464 = vector.broadcast %cst_229 : f32 to vector<8x128xf32>
    %465 = arith.mulf %464, %463 : vector<8x128xf32>
    %466 = math.tanh %465 : vector<8x128xf32>
    %cst_230 = arith.constant 5.000000e-01 : f32
    %467 = vector.broadcast %cst_230 : f32 to vector<8x128xf32>
    %468 = arith.mulf %467, %466 : vector<8x128xf32>
    %cst_231 = arith.constant 5.000000e-01 : f32
    %469 = vector.broadcast %cst_231 : f32 to vector<8x128xf32>
    %470 = arith.addf %468, %469 : vector<8x128xf32>
    %c0_232 = arith.constant 0 : index
    %c0_233 = arith.constant 0 : index
    %471 = vector.load %arg8[%c0_232, %c0_233] : memref<8x128xf32, #tpu.memory_space<vmem>>, vector<8x128xf32>
    %472 = arith.mulf %460, %471 : vector<8x128xf32>
    %473 = arith.mulf %452, %462 : vector<8x128xf32>
    %474 = arith.addf %472, %473 : vector<8x128xf32>
    %475 = math.tanh %474 : vector<8x128xf32>
    %476 = arith.mulf %470, %475 : vector<8x128xf32>
    %477 = vector.broadcast %436 : i32 to vector<8x128xi32>
    %478 = arith.cmpi sgt, %3, %477 : vector<8x128xi32>
    %c0_234 = arith.constant 0 : index
    %c0_235 = arith.constant 0 : index
    %479 = vector.load %arg7[%c0_234, %c0_235] : memref<8x128xf32, #tpu.memory_space<vmem>>, vector<8x128xf32>
    %480 = arith.select %478, %476, %479 : vector<8x128xi1>, vector<8x128xf32>
    %c0_236 = arith.constant 0 : index
    %c0_237 = arith.constant 0 : index
    %481 = vector.load %arg7[%c0_236, %c0_237] : memref<8x128xf32, #tpu.memory_space<vmem>>, vector<8x128xf32>
    tpu.vector_store %arg7[%c0_236, %c0_237], %480 {strides = array<i32>} : memref<8x128xf32, #tpu.memory_space<vmem>>, vector<8x128xf32>,
    %c0_238 = arith.constant 0 : index
    %c0_239 = arith.constant 0 : index
    %482 = vector.load %arg8[%c0_238, %c0_239] : memref<8x128xf32, #tpu.memory_space<vmem>>, vector<8x128xf32>
    %483 = arith.select %478, %474, %482 : vector<8x128xi1>, vector<8x128xf32>
    %c0_240 = arith.constant 0 : index
    %c0_241 = arith.constant 0 : index
    %484 = vector.load %arg8[%c0_240, %c0_241] : memref<8x128xf32, #tpu.memory_space<vmem>>, vector<8x128xf32>
    tpu.vector_store %arg8[%c0_240, %c0_241], %483 {strides = array<i32>} : memref<8x128xf32, #tpu.memory_space<vmem>>, vector<8x128xf32>,
    %c8_i32_242 = arith.constant 8 : i32
    %c1_i32_243 = arith.constant 1 : i32
    %485 = arith.cmpi eq, %arg1, %c1_i32_243 : i32
    %486 = arith.extui %485 : i1 to i32
    %c0_i32_244 = arith.constant 0 : i32
    %487 = arith.cmpi ne, %486, %c0_i32_244 : i32
    scf.if %487 {
      %c0_245 = arith.constant 0 : index
      %c0_246 = arith.constant 0 : index
      %488 = vector.load %arg7[%c0_245, %c0_246] : memref<8x128xf32, #tpu.memory_space<vmem>>, vector<8x128xf32>
      %c0_247 = arith.constant 0 : index
      %c0_248 = arith.constant 0 : index
      %489 = vector.load %arg5[%c0_247, %c0_248] : memref<8x128xf32, #tpu.memory_space<vmem>>, vector<8x128xf32>
      tpu.vector_store %arg5[%c0_247, %c0_248], %488 {strides = array<i32>} : memref<8x128xf32, #tpu.memory_space<vmem>>, vector<8x128xf32>,
    } else {
    }
    return
  }
  func.func @transform_0(%arg0: i32, %arg1: i32) -> (i32, i32) {
    %c0_i32 = arith.constant 0 : i32
    %c0_i32_0 = arith.constant 0 : i32
    %c0_i32_1 = arith.constant 0 : i32
    return %c0_i32, %c0_i32_0 : i32, i32
  }
  func.func @transform_1(%arg0: i32, %arg1: i32) -> (i32, i32, i32, i32) {
    %c1_i32 = arith.constant 1 : i32
    %0 = arith.subi %c1_i32, %arg0 : i32
    %1 = arith.muli %0, %arg1 : i32
    %c1_i32_0 = arith.constant 1 : i32
    %2 = arith.subi %c1_i32_0, %arg1 : i32
    %3 = arith.muli %arg0, %2 : i32
    %4 = arith.addi %1, %3 : i32
    %c0_i32 = arith.constant 0 : i32
    %c0_i32_1 = arith.constant 0 : i32
    %c0_i32_2 = arith.constant 0 : i32
    return %arg0, %4, %c0_i32, %c0_i32_1 : i32, i32, i32, i32
  }
  func.func @transform_3(%arg0: i32, %arg1: i32) -> (i32, i32) {
    %c0_i32 = arith.constant 0 : i32
    %c0_i32_0 = arith.constant 0 : i32
    return %c0_i32, %arg0 : i32, i32
  }
}

</mosaic_0001>

<bundles_post_ra>
// kernel: bilstm_forward.2
= control target key start
LH: loop header
LB: loop body
LE: loop exit
PB: predicated region body
PF: predicated region fallthrough
CT: control target
= control target key end

     0   :  { %v1651_v3 = vmov 0   ;;  %s2297_s1 = inlined_call_operand.vmem [shape: bf16[128,1024], index: 1, kind: input, shape index: {}]   ;;  %s2298_s0 = inlined_call_operand.vmem [shape: bf16[128,128], index: 0, kind: input, shape index: {}]   ;;  %s2299_s2 = inlined_call_operand.vmem [shape: f32[1,1024], index: 2, kind: input, shape index: {}]   ;;  %s2300_s3 = inlined_call_operand.vmem [shape: bf16[2,128,512], index: 3, kind: output, shape index: {}]  }
   0x1   :  { %v31_v0 = vld [vmem:[%s2297_s1] sm:$0xff]  ;;  %v32_v2 = vld [vmem:[%s2297_s1 + $0x8] sm:$0xff]  ;;  %537 = vmatprep.mubr.bf16.mxu0 %v1651_v3  ;;  %650 = vmatprep.mubr.bf16.mxu1 %v1651_v3  ;;  %v33_v63 = vld [vmem:[%s2297_s1 + $0x10] sm:$0xff] }
   0x2   :  { %v35_v1 = vld [vmem:[%s2297_s1 + $0x20] sm:$0xff]  ;;  %v36_v5 = vld [vmem:[%s2297_s1 + $0x28] sm:$0xff] }
   0x3   :  { %v1419_v4 = vcombine.high %v31_v0, %v35_v1  ;;  %v1418_v6 = vcombine.low %v31_v0, %v35_v1  ;;  %v39_v7 = vld [vmem:[%s2297_s1 + $0x40] sm:$0xff]  ;;  %v1421_v9 = vcombine.high %v32_v2, %v36_v5  ;;  %v1420_v10 = vcombine.low %v32_v2, %v36_v5  ;;  %v40_v12 = vld [vmem:[%s2297_s1 + $0x48] sm:$0xff]  ;;  %v37_v0 = vld [vmem:[%s2297_s1 + $0x30] sm:$0xff] }
   0x4   :  { %v43_v8 = vld [vmem:[%s2297_s1 + $0x60] sm:$0xff]  ;;  %v44_v13 = vld [vmem:[%s2297_s1 + $0x68] sm:$0xff]  ;;  %v34_v1 = vld [vmem:[%s2297_s1 + $0x18] sm:$0xff] }
   0x5   :  { %v1427_v11 = vcombine.high %v39_v7, %v43_v8  ;;  %v47_v14 = vld [vmem:[%s2297_s1 + $0x80] sm:$0xff]  ;;  %505 = vmatprep.subr.bf16.mxu0 %v1419_v4  ;;  %v1429_v15 = vcombine.high %v40_v12, %v44_v13  ;;  %v48_v17 = vld [vmem:[%s2297_s1 + $0x88] sm:$0xff]  ;;  %618 = vmatprep.subr.bf16.mxu1 %v1421_v9  ;;  %v1426_v19 = vcombine.low %v39_v7, %v43_v8  ;;  %v38_v2 = vld [vmem:[%s2297_s1 + $0x38] sm:$0xff] }
   0x6   :  { %v51_v16 = vld [vmem:[%s2297_s1 + $0xa0] sm:$0xff]  ;;  %v52_v18 = vld [vmem:[%s2297_s1 + $0xa8] sm:$0xff]  ;;  %506 = vmatpush1.bf16.msra.mxu0 %v1418_v6  ;;  %619 = vmatpush1.bf16.msra.mxu1 %v1420_v10  ;;  %v1428_v20 = vcombine.low %v40_v12, %v44_v13  ;;  %v1423_v6 = vcombine.high %v33_v63, %v37_v0  ;;  %v1425_v7 = vcombine.high %v34_v1, %v38_v2  ;;  %v41_v9 = vld [vmem:[%s2297_s1 + $0x50] sm:$0xff] }
   0x7   :  { %507 = vmatprep.subr.bf16.mxu0 %v1427_v11  ;;  %v1435_v21 = vcombine.high %v47_v14, %v51_v16  ;;  %620 = vmatprep.subr.bf16.mxu1 %v1429_v15  ;;  %v1437_v22 = vcombine.high %v48_v17, %v52_v18  ;;  %v55_v23 = vld [vmem:[%s2297_s1 + $0xc0] sm:$0xff]  ;;  %v56_v25 = vld [vmem:[%s2297_s1 + $0xc8] sm:$0xff]  ;;  %v1434_v27 = vcombine.low %v47_v14, %v51_v16  ;;  %v45_v10 = vld [vmem:[%s2297_s1 + $0x70] sm:$0xff] }
   0x8   :  { %v59_v24 = vld [vmem:[%s2297_s1 + $0xe0] sm:$0xff]  ;;  %v60_v26 = vld [vmem:[%s2297_s1 + $0xe8] sm:$0xff]  ;;  %v1436_v28 = vcombine.low %v48_v17, %v52_v18  ;;  %v1422_v11 = vcombine.low %v33_v63, %v37_v0  ;;  %v42_v12 = vld [vmem:[%s2297_s1 + $0x58] sm:$0xff]  ;;  %v1424_v14 = vcombine.low %v34_v1, %v38_v2  ;;  %v1431_v15 = vcombine.high %v41_v9, %v45_v10 }
   0x9   :  { %v1443_v29 = vcombine.high %v55_v23, %v59_v24  ;;  %v1445_v30 = vcombine.high %v56_v25, %v60_v26  ;;  %v63_v31 = vld [vmem:[%s2297_s1 + $0x100] sm:$0xff]  ;;  %v64_v33 = vld [vmem:[%s2297_s1 + $0x108] sm:$0xff]  ;;  %v1442_v35 = vcombine.low %v55_v23, %v59_v24  ;;  %v1444_v36 = vcombine.low %v56_v25, %v60_v26  ;;  %v46_v13 = vld [vmem:[%s2297_s1 + $0x78] sm:$0xff] }
   0xa   :  { %508 = vmatpush1.bf16.msra.mxu0 %v1426_v19  ;;  %621 = vmatpush1.bf16.msra.mxu1 %v1428_v20  ;;  %v67_v32 = vld [vmem:[%s2297_s1 + $0x120] sm:$0xff]  ;;  %v68_v34 = vld [vmem:[%s2297_s1 + $0x128] sm:$0xff]  ;;  %v49_v16 = vld [vmem:[%s2297_s1 + $0x90] sm:$0xff]  ;;  %v1433_v18 = vcombine.high %v42_v12, %v46_v13 }
   0xb   :  { %509 = vmatprep.subr.bf16.mxu0 %v1435_v21  ;;  %622 = vmatprep.subr.bf16.mxu1 %v1437_v22  ;;  %v1451_v37 = vcombine.high %v63_v31, %v67_v32  ;;  %v1453_v38 = vcombine.high %v64_v33, %v68_v34  ;;  %v71_v39 = vld [vmem:[%s2297_s1 + $0x140] sm:$0xff]  ;;  %v72_v41 = vld [vmem:[%s2297_s1 + $0x148] sm:$0xff]  ;;  %v1450_v43 = vcombine.low %v63_v31, %v67_v32  ;;  %v53_v17 = vld [vmem:[%s2297_s1 + $0xb0] sm:$0xff] }
   0xc   :  { %v75_v40 = vld [vmem:[%s2297_s1 + $0x160] sm:$0xff]  ;;  %v76_v42 = vld [vmem:[%s2297_s1 + $0x168] sm:$0xff]  ;;  %v1452_v44 = vcombine.low %v64_v33, %v68_v34  ;;  %v50_v19 = vld [vmem:[%s2297_s1 + $0x98] sm:$0xff]  ;;  %v1430_v21 = vcombine.low %v41_v9, %v45_v10  ;;  %v1432_v22 = vcombine.low %v42_v12, %v46_v13  ;;  %v1439_v23 = vcombine.high %v49_v16, %v53_v17 }
   0xd   :  { %v1459_v45 = vcombine.high %v71_v39, %v75_v40  ;;  %v1461_v46 = vcombine.high %v72_v41, %v76_v42  ;;  %v79_v47 = vld [vmem:[%s2297_s1 + $0x180] sm:$0xff]  ;;  %v80_v49 = vld [vmem:[%s2297_s1 + $0x188] sm:$0xff]  ;;  %v1458_v51 = vcombine.low %v71_v39, %v75_v40  ;;  %v1460_v52 = vcombine.low %v72_v41, %v76_v42  ;;  %v54_v20 = vld [vmem:[%s2297_s1 + $0xb8] sm:$0xff] }
   0xe   :  { %510 = vmatpush1.bf16.msra.mxu0 %v1434_v27  ;;  %623 = vmatpush1.bf16.msra.mxu1 %v1436_v28  ;;  %v83_v48 = vld [vmem:[%s2297_s1 + $0x1a0] sm:$0xff]  ;;  %v84_v50 = vld [vmem:[%s2297_s1 + $0x1a8] sm:$0xff]  ;;  %v1441_v24 = vcombine.high %v50_v19, %v54_v20  ;;  %v57_v26 = vld [vmem:[%s2297_s1 + $0xd0] sm:$0xff]  ;;  %v1440_v31 = vcombine.low %v50_v19, %v54_v20 }
   0xf   :  { %511 = vmatprep.subr.bf16.mxu0 %v1443_v29  ;;  %624 = vmatprep.subr.bf16.mxu1 %v1445_v30  ;;  %v1467_v53 = vcombine.high %v79_v47, %v83_v48  ;;  %v87_v54 = vld [vmem:[%s2297_s1 + $0x1c0] sm:$0xff]  ;;  %v1469_v55 = vcombine.high %v80_v49, %v84_v50  ;;  %v88_v57 = vld [vmem:[%s2297_s1 + $0x1c8] sm:$0xff]  ;;  %v1466_v59 = vcombine.low %v79_v47, %v83_v48  ;;  %v61_v27 = vld [vmem:[%s2297_s1 + $0xf0] sm:$0xff] }
  0x10   :  { %v91_v56 = vld [vmem:[%s2297_s1 + $0x1e0] sm:$0xff]  ;;  %v92_v58 = vld [vmem:[%s2297_s1 + $0x1e8] sm:$0xff]  ;;  %v1468_v60 = vcombine.low %v80_v49, %v84_v50  ;;  %v58_v28 = vld [vmem:[%s2297_s1 + $0xd8] sm:$0xff]  ;;  %v1438_v30 = vcombine.low %v49_v16, %v53_v17  ;;  %v1447_v32 = vcombine.high %v57_v26, %v61_v27 }
  0x11   :  { %v1475_v61 = vcombine.high %v87_v54, %v91_v56  ;;  %v1477_v62 = vcombine.high %v88_v57, %v92_v58  ;;  %v1474_v4 = vcombine.low %v87_v54, %v91_v56  ;;  %v1476_v5 = vcombine.low %v88_v57, %v92_v58  ;;  %v1785_v8 = vld [vmem:[%s2298_s0] sm:$0xff]   ;;  %v1818_v25 = vld [vmem:[%s2298_s0 + $0x8] sm:$0xff]   ;;  %v62_v29 = vld [vmem:[%s2297_s1 + $0xf8] sm:$0xff] }
  0x12   :  { %512 = vmatpush1.bf16.msra.mxu0 %v1442_v35  ;;  %625 = vmatpush1.bf16.msra.mxu1 %v1444_v36  ;;  %v1449_v33 = vcombine.high %v58_v28, %v62_v29  ;;  %v65_v34 = vld [vmem:[%s2297_s1 + $0x110] sm:$0xff]  ;;  %v66_v36 = vld [vmem:[%s2297_s1 + $0x118] sm:$0xff]  ;;  %v1448_v39 = vcombine.low %v58_v28, %v62_v29  ;;  %v1648_v9 = vld [vmem:[%s2298_s0 + $0x28] sm:$0xff]  }
  0x13   :  { %513 = vmatprep.subr.bf16.mxu0 %v1451_v37  ;;  %626 = vmatprep.subr.bf16.mxu1 %v1453_v38  ;;  %v69_v35 = vld [vmem:[%s2297_s1 + $0x130] sm:$0xff]  ;;  %v70_v37 = vld [vmem:[%s2297_s1 + $0x138] sm:$0xff]  ;;  %v1446_v38 = vcombine.low %v57_v26, %v61_v27 }
  0x14   :  { %v1455_v40 = vcombine.high %v65_v34, %v69_v35  ;;  %v1851_v41 = vld [vmem:[%s2298_s0 + $0x10] sm:$0xff]   ;;  %v1457_v42 = vcombine.high %v66_v36, %v70_v37  ;;  %v1454_v47 = vcombine.low %v65_v34, %v69_v35  ;;  %v1456_v48 = vcombine.low %v66_v36, %v70_v37  ;;  %v86_v54 = vld [vmem:[%s2297_s1 + $0x1b8] sm:$0xff] }
  0x15   :  { %v1646_v58 = vld [vmem:[%s2298_s0 + $0x18] sm:$0xff]   ;;  %v1649_v10 = vld [vmem:[%s2298_s0 + $0x30] sm:$0xff]  }
  0x16   :  { %514 = vmatpush1.bf16.msra.mxu0 %v1450_v43  ;;  %627 = vmatpush1.bf16.msra.mxu1 %v1452_v44  ;;  %v73_v43 = vld [vmem:[%s2297_s1 + $0x150] sm:$0xff]  ;;  %v94_v63 = vld [vmem:[%s2297_s1 + $0x1f8] sm:$0xff] }
  0x17   :  { %515 = vmatprep.subr.bf16.mxu0 %v1459_v45  ;;  %628 = vmatprep.subr.bf16.mxu1 %v1461_v46  ;;  %v77_v44 = vld [vmem:[%s2297_s1 + $0x170] sm:$0xff]  ;;  %v74_v45 = vld [vmem:[%s2297_s1 + $0x158] sm:$0xff] }
  0x18   :  { %v78_v46 = vld [vmem:[%s2297_s1 + $0x178] sm:$0xff]  ;;  %v1463_v49 = vcombine.high %v73_v43, %v77_v44 }
  0x19   :  { %v1465_v50 = vcombine.high %v74_v45, %v78_v46  ;;  %v1464_v56 = vcombine.low %v74_v45, %v78_v46 }
  0x1a   :  { %516 = vmatpush1.bf16.msra.mxu0 %v1458_v51  ;;  %629 = vmatpush1.bf16.msra.mxu1 %v1460_v52  ;;  %v81_v51 = vld [vmem:[%s2297_s1 + $0x190] sm:$0xff] }
  0x1b   :  { %517 = vmatprep.subr.bf16.mxu0 %v1467_v53  ;;  %630 = vmatprep.subr.bf16.mxu1 %v1469_v55  ;;  %v85_v52 = vld [vmem:[%s2297_s1 + $0x1b0] sm:$0xff]  ;;  %v82_v53 = vld [vmem:[%s2297_s1 + $0x198] sm:$0xff]  ;;  %v1462_v55 = vcombine.low %v73_v43, %v77_v44 }
  0x1c   :  { %v1471_v57 = vcombine.high %v81_v51, %v85_v52  ;;  %v1470_v0 = vcombine.low %v81_v51, %v85_v52  ;;  %v1472_v1 = vcombine.low %v82_v53, %v86_v54 }
  0x1e   :  { %518 = vmatpush1.bf16.msra.mxu0 %v1466_v59  ;;  %631 = vmatpush1.bf16.msra.mxu1 %v1468_v60  ;;  %v1473_v59 = vcombine.high %v82_v53, %v86_v54  ;;  %v89_v60 = vld [vmem:[%s2297_s1 + $0x1d0] sm:$0xff] }
  0x1f   :  { %519 = vmatprep.subr.bf16.mxu0 %v1475_v61  ;;  %632 = vmatprep.subr.bf16.mxu1 %v1477_v62  ;;  %v93_v61 = vld [vmem:[%s2297_s1 + $0x1f0] sm:$0xff]  ;;  %v90_v62 = vld [vmem:[%s2297_s1 + $0x1d8] sm:$0xff] }
  0x20   :  { %v1479_v2 = vcombine.high %v89_v60, %v93_v61 }
  0x22   :  { %520 = vmatpush1.bf16.msra.mxu0 %v1474_v4  ;;  %633 = vmatpush1.bf16.msra.mxu1 %v1476_v5  ;;  %v1481_v4 = vcombine.high %v90_v62, %v94_v63  ;;  %v1478_v5 = vcombine.low %v89_v60, %v93_v61 }
  0x23   :  { %731 = vmatprep.subr.bf16.mxu0 %v1423_v6  ;;  %844 = vmatprep.subr.bf16.mxu1 %v1425_v7  ;;  %v1480_v6 = vcombine.low %v90_v62, %v94_v63  ;;  %v1647_v7 = vld [vmem:[%s2298_s0 + $0x20] sm:$0xff]  }
  0x25   :  { %538 = vmatmul.mubr.bf16.vlgmr.msra.gmra.mrb[0].mxu0 %v1785_v8  ;;  %651 = vmatmul.mubr.bf16.vlgmr.msra.gmra.mrb[0].mxu1 %v1785_v8 }
  0x26   :  { %732 = vmatpush1.bf16.msra.mxu0 %v1422_v11  ;;  %845 = vmatpush1.bf16.msra.mxu1 %v1424_v14  ;;  %v1650_v11 = vld [vmem:[%s2298_s0 + $0x38] sm:$0xff]   ;;  %v1944_v14 = vld [vmem:[%s2299_s2] sm:$0xff] }
  0x27   :  { %547 = vmatprep.mubr.bf16.mxu0 %v1651_v3  ;;  %660 = vmatprep.mubr.bf16.mxu1 %v1651_v3 }
  0x28   :  { %733 = vmatprep.subr.bf16.mxu0 %v1431_v15  ;;  %846 = vmatprep.subr.bf16.mxu1 %v1433_v18 }
  0x2a   :  { %734 = vmatpush1.bf16.msra.mxu0 %v1430_v21  ;;  %847 = vmatpush1.bf16.msra.mxu1 %v1432_v22 }
  0x2b   :  { %735 = vmatprep.subr.bf16.mxu0 %v1439_v23  ;;  %848 = vmatprep.subr.bf16.mxu1 %v1441_v24 }
  0x2d   :  { %548 = vmatmul.mubr.bf16.gmra.mrb[4].mxu0 %v1818_v25  ;;  %661 = vmatmul.mubr.bf16.gmra.mrb[4].mxu1 %v1818_v25 }
  0x2e   :  { %557 = vmatprep.mubr.bf16.mxu0 %v1651_v3  ;;  %670 = vmatprep.mubr.bf16.mxu1 %v1651_v3 }
  0x2f   :  { %736 = vmatpush1.bf16.msra.mxu0 %v1438_v30  ;;  %849 = vmatpush1.bf16.msra.mxu1 %v1440_v31 }
  0x30   :  { %737 = vmatprep.subr.bf16.mxu0 %v1447_v32  ;;  %850 = vmatprep.subr.bf16.mxu1 %v1449_v33 }
  0x33   :  { %738 = vmatpush1.bf16.msra.mxu0 %v1446_v38  ;;  %851 = vmatpush1.bf16.msra.mxu1 %v1448_v39 }
  0x34   :  { %739 = vmatprep.subr.bf16.mxu0 %v1455_v40  ;;  %852 = vmatprep.subr.bf16.mxu1 %v1457_v42 }
  0x35   :  { %558 = vmatmul.mubr.bf16.gmra.mrb[8].mxu0 %v1851_v41  ;;  %671 = vmatmul.mubr.bf16.gmra.mrb[8].mxu1 %v1851_v41 }
  0x36   :  { %567 = vmatprep.mubr.bf16.mxu0 %v1651_v3  ;;  %680 = vmatprep.mubr.bf16.mxu1 %v1651_v3 }
  0x37   :  { %740 = vmatpush1.bf16.msra.mxu0 %v1454_v47  ;;  %853 = vmatpush1.bf16.msra.mxu1 %v1456_v48 }
  0x38   :  { %741 = vmatprep.subr.bf16.mxu0 %v1463_v49  ;;  %854 = vmatprep.subr.bf16.mxu1 %v1465_v50 }
  0x3b   :  { %742 = vmatpush1.bf16.msra.mxu0 %v1462_v55  ;;  %855 = vmatpush1.bf16.msra.mxu1 %v1464_v56 }
  0x3c   :  { %743 = vmatprep.subr.bf16.mxu0 %v1471_v57  ;;  %856 = vmatprep.subr.bf16.mxu1 %v1473_v59 }
  0x3d   :  { %568 = vmatmul.mubr.bf16.gmra.mrb[12].mxu0 %v1646_v58  ;;  %681 = vmatmul.mubr.bf16.gmra.mrb[12].mxu1 %v1646_v58 }
  0x3e   :  { %577 = vmatprep.mubr.bf16.mxu0 %v1651_v3  ;;  %690 = vmatprep.mubr.bf16.mxu1 %v1651_v3 }
  0x3f   :  { %744 = vmatpush1.bf16.msra.mxu0 %v1470_v0  ;;  %857 = vmatpush1.bf16.msra.mxu1 %v1472_v1 }
  0x40   :  { %745 = vmatprep.subr.bf16.mxu0 %v1479_v2  ;;  %858 = vmatprep.subr.bf16.mxu1 %v1481_v4 }
  0x43   :  { %746 = vmatpush1.bf16.msra.mxu0 %v1478_v5  ;;  %859 = vmatpush1.bf16.msra.mxu1 %v1480_v6 }
  0x45   :  { %578 = vmatmul.mubr.bf16.gmra.mrb[16].mxu0 %v1647_v7  ;;  %691 = vmatmul.mubr.bf16.gmra.mrb[16].mxu1 %v1647_v7 }
  0x46   :  { %587 = vmatprep.mubr.bf16.mxu0 %v1651_v3  ;;  %700 = vmatprep.mubr.bf16.mxu1 %v1651_v3 }
  0x4d   :  { %588 = vmatmul.mubr.bf16.gmra.mrb[20].mxu0 %v1648_v9  ;;  %701 = vmatmul.mubr.bf16.gmra.mrb[20].mxu1 %v1648_v9 }
  0x4e   :  { %597 = vmatprep.mubr.bf16.mxu0 %v1651_v3  ;;  %710 = vmatprep.mubr.bf16.mxu1 %v1651_v3 }
  0x55   :  { %598 = vmatmul.mubr.bf16.gmra.mrb[24].mxu0 %v1649_v10  ;;  %711 = vmatmul.mubr.bf16.gmra.mrb[24].mxu1 %v1649_v10 }
  0x56   :  { %607 = vmatprep.mubr.bf16.mxu0 %v1651_v3  ;;  %720 = vmatprep.mubr.bf16.mxu1 %v1651_v3 }
  0x5d   :  { %608 = vmatmul.mubr.bf16.gmra.mrb[28].mxu0 %v1650_v11  ;;  %721 = vmatmul.mubr.bf16.gmra.mrb[28].mxu1 %v1650_v11 }
  0x5e   :  { %763 = vmatprep.mubr.bf16.mxu0 %v1651_v3  ;;  %876 = vmatprep.mubr.bf16.mxu1 %v1651_v3 }
  0x65   :  { %764 = vmatmul.mubr.bf16.vlgmr.msra.gmra.mrb[32].mxu0 %v1785_v8  ;;  %877 = vmatmul.mubr.bf16.vlgmr.msra.gmra.mrb[32].mxu1 %v1785_v8  ;;  %v97_v8 = vlaneseq }
  0x66   :  { %773 = vmatprep.mubr.bf16.mxu0 %v1651_v3  ;;  %886 = vmatprep.mubr.bf16.mxu1 %v1651_v3 }
  0x67   :  { %v1938_v12 = vshrl.u32 %v97_v8, 7 }
  0x69   :  { %v99_v13 = vsub.s32 0, %v1938_v12  ;;  %v107_v15 = vsub.s32 2, %v1938_v12  ;;  %v103_v16 = vsub.s32 1, %v1938_v12  ;;  %v111_v17 = vsub.s32 3, %v1938_v12 }
  0x6b   :  { %v1953_v18 = vrot.slane %v1944_v14, %v107_v15  ;;  %v1956_v19 = vrot.slane %v1944_v14, %v103_v16  ;;  %v1959_v20 = vrot.slane %v1944_v14, %v111_v17 }
  0x6d   :  { %774 = vmatmul.mubr.bf16.gmra.mrb[36].mxu0 %v1818_v25  ;;  %887 = vmatmul.mubr.bf16.gmra.mrb[36].mxu1 %v1818_v25 }
  0x6e   :  { %783 = vmatprep.mubr.bf16.mxu0 %v1651_v3  ;;  %896 = vmatprep.mubr.bf16.mxu1 %v1651_v3 }
  0x75   :  { %784 = vmatmul.mubr.bf16.gmra.mrb[40].mxu0 %v1851_v41  ;;  %897 = vmatmul.mubr.bf16.gmra.mrb[40].mxu1 %v1851_v41 }
  0x76   :  { %793 = vmatprep.mubr.bf16.mxu0 %v1651_v3  ;;  %906 = vmatprep.mubr.bf16.mxu1 %v1651_v3 }
  0x7d   :  { %794 = vmatmul.mubr.bf16.gmra.mrb[44].mxu0 %v1646_v58  ;;  %907 = vmatmul.mubr.bf16.gmra.mrb[44].mxu1 %v1646_v58 }
  0x7e   :  { %803 = vmatprep.mubr.bf16.mxu0 %v1651_v3  ;;  %916 = vmatprep.mubr.bf16.mxu1 %v1651_v3 }
  0x85   :  { %804 = vmatmul.mubr.bf16.gmra.mrb[48].mxu0 %v1647_v7  ;;  %917 = vmatmul.mubr.bf16.gmra.mrb[48].mxu1 %v1647_v7 }
  0x86   :  { %813 = vmatprep.mubr.bf16.mxu0 %v1651_v3  ;;  %926 = vmatprep.mubr.bf16.mxu1 %v1651_v3 }
  0x8d   :  { %814 = vmatmul.mubr.bf16.gmra.mrb[52].mxu0 %v1648_v9  ;;  %927 = vmatmul.mubr.bf16.gmra.mrb[52].mxu1 %v1648_v9 }
  0x8e   :  { %823 = vmatprep.mubr.bf16.mxu0 %v1651_v3  ;;  %936 = vmatprep.mubr.bf16.mxu1 %v1651_v3 }
  0x95   :  { %824 = vmatmul.mubr.bf16.gmra.mrb[56].mxu0 %v1649_v10  ;;  %937 = vmatmul.mubr.bf16.gmra.mrb[56].mxu1 %v1649_v10 }
  0x96   :  { %833 = vmatprep.mubr.bf16.mxu0 %v1651_v3  ;;  %946 = vmatprep.mubr.bf16.mxu1 %v1651_v3  ;;  %v1950_v3 = vrot.slane %v1944_v14, %v99_v13 }
  0x9d   :  { %834 = vmatmul.mubr.bf16.gmra.mrb[60].mxu0 %v1650_v11  ;;  %947 = vmatmul.mubr.bf16.gmra.mrb[60].mxu1 %v1650_v11 }
  0xf8   :  { %v539_v21 = vpop.f32.mrb[0].mxu0  ;;  %v652_v23 = vpop.f32.mrb[0].mxu1 }
  0xf9   :  { %v540_v22 = vadd.f32 %v539_v21, %v1950_v3  ;;  %v541_v24 = vpop.f32.mrb[1].mxu0  ;;  %v653_v25 = vadd.f32 %v652_v23, %v1953_v18  ;;  %v654_v27 = vpop.f32.mrb[1].mxu1 }
  0xfa   :  { %v542_v26 = vadd.f32 %v541_v24, %v1956_v19  ;;  %v543_v28 = vpop.f32.mrb[2].mxu0  ;;  %v655_v29 = vadd.f32 %v654_v27, %v1959_v20  ;;  %v656_v31 = vpop.f32.mrb[2].mxu1 }
  0xfb   :  { %v544_v30 = vadd.f32 %v543_v28, %v1950_v3  ;;  %v545_v32 = vpop.f32.mrb[3].mxu0  ;;  %v657_v34 = vadd.f32 %v656_v31, %v1953_v18  ;;  %v658_v36 = vpop.f32.mrb[3].mxu1 }
  0xfc   :  { %v1578_v33 = vpack.c.bf16 %v542_v26, %v540_v22  ;;  %v546_v35 = vadd.f32 %v545_v32, %v1956_v19  ;;  %v1579_v37 = vpack.c.bf16 %v655_v29, %v653_v25  ;;  %v659_v38 = vadd.f32 %v658_v36, %v1959_v20 }
  0xfe   :  { %1149 = vst [vmem:[%s2300_s3] sm:$0xff] %v1578_v33  ;;  %v1580_v39 = vpack.c.bf16 %v546_v35, %v544_v30  ;;  %1150 = vst [vmem:[%s2300_s3 + $0x8] sm:$0xff] %v1579_v37  ;;  %v1581_v40 = vpack.c.bf16 %v659_v38, %v657_v34 }
 0x100   :  { %1151 = vst [vmem:[%s2300_s3 + $0x10] sm:$0xff] %v1580_v39  ;;  %v549_v41 = vpop.f32.mrb[4].mxu0  ;;  %1152 = vst [vmem:[%s2300_s3 + $0x18] sm:$0xff] %v1581_v40  ;;  %v662_v43 = vpop.f32.mrb[4].mxu1 }
 0x101   :  { %v550_v42 = vadd.f32 %v549_v41, %v1950_v3  ;;  %v551_v44 = vpop.f32.mrb[5].mxu0  ;;  %v663_v45 = vadd.f32 %v662_v43, %v1953_v18  ;;  %v664_v47 = vpop.f32.mrb[5].mxu1 }
 0x102   :  { %v552_v46 = vadd.f32 %v551_v44, %v1956_v19  ;;  %v553_v48 = vpop.f32.mrb[6].mxu0  ;;  %v665_v49 = vadd.f32 %v664_v47, %v1959_v20  ;;  %v666_v51 = vpop.f32.mrb[6].mxu1 }
 0x103   :  { %v554_v50 = vadd.f32 %v553_v48, %v1950_v3  ;;  %v555_v52 = vpop.f32.mrb[7].mxu0  ;;  %v667_v54 = vadd.f32 %v666_v51, %v1953_v18  ;;  %v668_v56 = vpop.f32.mrb[7].mxu1 }
 0x104   :  { %v1582_v53 = vpack.c.bf16 %v552_v46, %v550_v42  ;;  %v556_v55 = vadd.f32 %v555_v52, %v1956_v19  ;;  %v1583_v57 = vpack.c.bf16 %v665_v49, %v663_v45  ;;  %v669_v58 = vadd.f32 %v668_v56, %v1959_v20 }
 0x106   :  { %1153 = vst [vmem:[%s2300_s3 + $0x20] sm:$0xff] %v1582_v53  ;;  %v1584_v59 = vpack.c.bf16 %v556_v55, %v554_v50  ;;  %1154 = vst [vmem:[%s2300_s3 + $0x28] sm:$0xff] %v1583_v57  ;;  %v1585_v60 = vpack.c.bf16 %v669_v58, %v667_v54 }
 0x108   :  { %1155 = vst [vmem:[%s2300_s3 + $0x30] sm:$0xff] %v1584_v59  ;;  %v559_v61 = vpop.f32.mrb[8].mxu0  ;;  %1156 = vst [vmem:[%s2300_s3 + $0x38] sm:$0xff] %v1585_v60  ;;  %v672_v63 = vpop.f32.mrb[8].mxu1 }
 0x109   :  { %v560_v62 = vadd.f32 %v559_v61, %v1950_v3  ;;  %v561_v0 = vpop.f32.mrb[9].mxu0  ;;  %v673_v1 = vadd.f32 %v672_v63, %v1953_v18  ;;  %v674_v4 = vpop.f32.mrb[9].mxu1 }
 0x10a   :  { %v562_v2 = vadd.f32 %v561_v0, %v1956_v19  ;;  %v563_v5 = vpop.f32.mrb[10].mxu0  ;;  %v675_v6 = vadd.f32 %v674_v4, %v1959_v20  ;;  %v676_v9 = vpop.f32.mrb[10].mxu1 }
 0x10b   :  { %v564_v7 = vadd.f32 %v563_v5, %v1950_v3  ;;  %v565_v10 = vpop.f32.mrb[11].mxu0  ;;  %v677_v8 = vadd.f32 %v676_v9, %v1953_v18  ;;  %v678_v15 = vpop.f32.mrb[11].mxu1 }
 0x10c   :  { %v1586_v11 = vpack.c.bf16 %v562_v2, %v560_v62  ;;  %v566_v13 = vadd.f32 %v565_v10, %v1956_v19  ;;  %v1587_v16 = vpack.c.bf16 %v675_v6, %v673_v1  ;;  %v679_v17 = vadd.f32 %v678_v15, %v1959_v20 }
 0x10e   :  { %1157 = vst [vmem:[%s2300_s3 + $0x40] sm:$0xff] %v1586_v11  ;;  %v1588_v21 = vpack.c.bf16 %v566_v13, %v564_v7  ;;  %1158 = vst [vmem:[%s2300_s3 + $0x48] sm:$0xff] %v1587_v16  ;;  %v1589_v22 = vpack.c.bf16 %v679_v17, %v677_v8 }
 0x110   :  { %1159 = vst [vmem:[%s2300_s3 + $0x50] sm:$0xff] %v1588_v21  ;;  %v569_v23 = vpop.f32.mrb[12].mxu0  ;;  %1160 = vst [vmem:[%s2300_s3 + $0x58] sm:$0xff] %v1589_v22  ;;  %v682_v25 = vpop.f32.mrb[12].mxu1 }
 0x111   :  { %v570_v24 = vadd.f32 %v569_v23, %v1950_v3  ;;  %v571_v26 = vpop.f32.mrb[13].mxu0  ;;  %v683_v27 = vadd.f32 %v682_v25, %v1953_v18  ;;  %v684_v29 = vpop.f32.mrb[13].mxu1 }
 0x112   :  { %v572_v28 = vadd.f32 %v571_v26, %v1956_v19  ;;  %v573_v30 = vpop.f32.mrb[14].mxu0  ;;  %v685_v31 = vadd.f32 %v684_v29, %v1959_v20  ;;  %v686_v33 = vpop.f32.mrb[14].mxu1 }
 0x113   :  { %v574_v32 = vadd.f32 %v573_v30, %v1950_v3  ;;  %v575_v34 = vpop.f32.mrb[15].mxu0  ;;  %v687_v36 = vadd.f32 %v686_v33, %v1953_v18  ;;  %v688_v38 = vpop.f32.mrb[15].mxu1 }
 0x114   :  { %v1590_v35 = vpack.c.bf16 %v572_v28, %v570_v24  ;;  %v576_v37 = vadd.f32 %v575_v34, %v1956_v19  ;;  %v1591_v39 = vpack.c.bf16 %v685_v31, %v683_v27  ;;  %v689_v40 = vadd.f32 %v688_v38, %v1959_v20 }
 0x116   :  { %1161 = vst [vmem:[%s2300_s3 + $0x60] sm:$0xff] %v1590_v35  ;;  %v1592_v41 = vpack.c.bf16 %v576_v37, %v574_v32  ;;  %1162 = vst [vmem:[%s2300_s3 + $0x68] sm:$0xff] %v1591_v39  ;;  %v1593_v42 = vpack.c.bf16 %v689_v40, %v687_v36 }
 0x118   :  { %1163 = vst [vmem:[%s2300_s3 + $0x70] sm:$0xff] %v1592_v41  ;;  %v579_v43 = vpop.f32.mrb[16].mxu0  ;;  %1164 = vst [vmem:[%s2300_s3 + $0x78] sm:$0xff] %v1593_v42  ;;  %v692_v45 = vpop.f32.mrb[16].mxu1 }
 0x119   :  { %v580_v44 = vadd.f32 %v579_v43, %v1950_v3  ;;  %v581_v46 = vpop.f32.mrb[17].mxu0  ;;  %v693_v47 = vadd.f32 %v692_v45, %v1953_v18  ;;  %v694_v49 = vpop.f32.mrb[17].mxu1 }
 0x11a   :  { %v582_v48 = vadd.f32 %v581_v46, %v1956_v19  ;;  %v583_v50 = vpop.f32.mrb[18].mxu0  ;;  %v695_v51 = vadd.f32 %v694_v49, %v1959_v20  ;;  %v696_v53 = vpop.f32.mrb[18].mxu1  ;;  %v115_v49 = vsub.s32 4, %v1938_v12 }
 0x11b   :  { %v584_v52 = vadd.f32 %v583_v50, %v1950_v3  ;;  %v585_v54 = vpop.f32.mrb[19].mxu0  ;;  %v697_v56 = vadd.f32 %v696_v53, %v1953_v18  ;;  %v698_v58 = vpop.f32.mrb[19].mxu1 }
 0x11c   :  { %v1594_v55 = vpack.c.bf16 %v582_v48, %v580_v44  ;;  %v586_v57 = vadd.f32 %v585_v54, %v1956_v19  ;;  %v1595_v59 = vpack.c.bf16 %v695_v51, %v693_v47  ;;  %v699_v60 = vadd.f32 %v698_v58, %v1959_v20 }
 0x11d   :  { %v123_v54 = vsub.s32 6, %v1938_v12 }
 0x11e   :  { %1165 = vst [vmem:[%s2300_s3 + $0x80] sm:$0xff] %v1594_v55  ;;  %v1596_v61 = vpack.c.bf16 %v586_v57, %v584_v52  ;;  %1166 = vst [vmem:[%s2300_s3 + $0x88] sm:$0xff] %v1595_v59  ;;  %v1597_v62 = vpack.c.bf16 %v699_v60, %v697_v56  ;;  %v119_v55 = vsub.s32 5, %v1938_v12  ;;  %v127_v60 = vsub.s32 7, %v1938_v12 }
 0x120   :  { %1167 = vst [vmem:[%s2300_s3 + $0x90] sm:$0xff] %v1596_v61  ;;  %v589_v63 = vpop.f32.mrb[20].mxu0  ;;  %1168 = vst [vmem:[%s2300_s3 + $0x98] sm:$0xff] %v1597_v62  ;;  %v702_v1 = vpop.f32.mrb[20].mxu1  ;;  %v2123_v12 = vrot.slane %v1944_v14, %v119_v55 }
 0x121   :  { %v590_v0 = vadd.f32 %v589_v63, %v1950_v3  ;;  %v591_v2 = vpop.f32.mrb[21].mxu0  ;;  %v703_v4 = vadd.f32 %v702_v1, %v1953_v18  ;;  %v704_v6 = vpop.f32.mrb[21].mxu1 }
 0x122   :  { %v592_v5 = vadd.f32 %v591_v2, %v1956_v19  ;;  %v593_v7 = vpop.f32.mrb[22].mxu0  ;;  %v705_v9 = vadd.f32 %v704_v6, %v1959_v20  ;;  %v706_v11 = vpop.f32.mrb[22].mxu1 }
 0x123   :  { %v594_v10 = vadd.f32 %v593_v7, %v1950_v3  ;;  %v595_v8 = vpop.f32.mrb[23].mxu0  ;;  %v707_v15 = vadd.f32 %v706_v11, %v1953_v18  ;;  %v708_v17 = vpop.f32.mrb[23].mxu1 }
 0x124   :  { %v1598_v13 = vpack.c.bf16 %v592_v5, %v590_v0  ;;  %v596_v16 = vadd.f32 %v595_v8, %v1956_v19  ;;  %v1599_v21 = vpack.c.bf16 %v705_v9, %v703_v4  ;;  %v709_v22 = vadd.f32 %v708_v17, %v1959_v20 }
 0x125   :  { %v2114_v4 = vrot.slane %v1944_v14, %v115_v49  ;;  %v2120_v5 = vrot.slane %v1944_v14, %v123_v54 }
 0x126   :  { %1169 = vst [vmem:[%s2300_s3 + $0xa0] sm:$0xff] %v1598_v13  ;;  %v1600_v23 = vpack.c.bf16 %v596_v16, %v594_v10  ;;  %1170 = vst [vmem:[%s2300_s3 + $0xa8] sm:$0xff] %v1599_v21  ;;  %v1601_v24 = vpack.c.bf16 %v709_v22, %v707_v15 }
 0x128   :  { %1171 = vst [vmem:[%s2300_s3 + $0xb0] sm:$0xff] %v1600_v23  ;;  %v599_v25 = vpop.f32.mrb[24].mxu0  ;;  %1172 = vst [vmem:[%s2300_s3 + $0xb8] sm:$0xff] %v1601_v24  ;;  %v712_v27 = vpop.f32.mrb[24].mxu1 }
 0x129   :  { %v600_v26 = vadd.f32 %v599_v25, %v1950_v3  ;;  %v601_v28 = vpop.f32.mrb[25].mxu0  ;;  %v713_v29 = vadd.f32 %v712_v27, %v1953_v18  ;;  %v714_v31 = vpop.f32.mrb[25].mxu1 }
 0x12a   :  { %v602_v30 = vadd.f32 %v601_v28, %v1956_v19  ;;  %v603_v32 = vpop.f32.mrb[26].mxu0  ;;  %v715_v33 = vadd.f32 %v714_v31, %v1959_v20  ;;  %v716_v35 = vpop.f32.mrb[26].mxu1 }
 0x12b   :  { %v604_v34 = vadd.f32 %v603_v32, %v1950_v3  ;;  %v605_v36 = vpop.f32.mrb[27].mxu0  ;;  %v717_v38 = vadd.f32 %v716_v35, %v1953_v18  ;;  %v718_v40 = vpop.f32.mrb[27].mxu1 }
 0x12c   :  { %v1602_v37 = vpack.c.bf16 %v602_v30, %v600_v26  ;;  %v606_v39 = vadd.f32 %v605_v36, %v1956_v19  ;;  %v1603_v41 = vpack.c.bf16 %v715_v33, %v713_v29  ;;  %v719_v42 = vadd.f32 %v718_v40, %v1959_v20 }
 0x12e   :  { %1173 = vst [vmem:[%s2300_s3 + $0xc0] sm:$0xff] %v1602_v37  ;;  %v1604_v43 = vpack.c.bf16 %v606_v39, %v604_v34  ;;  %1174 = vst [vmem:[%s2300_s3 + $0xc8] sm:$0xff] %v1603_v41  ;;  %v1605_v44 = vpack.c.bf16 %v719_v42, %v717_v38 }
 0x130   :  { %1175 = vst [vmem:[%s2300_s3 + $0xd0] sm:$0xff] %v1604_v43  ;;  %v609_v45 = vpop.f32.mrb[28].mxu0  ;;  %1176 = vst [vmem:[%s2300_s3 + $0xd8] sm:$0xff] %v1605_v44  ;;  %v722_v47 = vpop.f32.mrb[28].mxu1 }
 0x131   :  { %v610_v46 = vadd.f32 %v609_v45, %v1950_v3  ;;  %v611_v48 = vpop.f32.mrb[29].mxu0  ;;  %v723_v50 = vadd.f32 %v722_v47, %v1953_v18  ;;  %v724_v52 = vpop.f32.mrb[29].mxu1 }
 0x132   :  { %v612_v51 = vadd.f32 %v611_v48, %v1956_v19  ;;  %v613_v53 = vpop.f32.mrb[30].mxu0  ;;  %v725_v56 = vadd.f32 %v724_v52, %v1959_v20  ;;  %v726_v58 = vpop.f32.mrb[30].mxu1 }
 0x133   :  { %v614_v57 = vadd.f32 %v613_v53, %v1950_v3  ;;  %v615_v59 = vpop.f32.mrb[31].mxu0  ;;  %v727_v62 = vadd.f32 %v726_v58, %v1953_v18  ;;  %v728_v0 = vpop.f32.mrb[31].mxu1 }
 0x134   :  { %v1606_v61 = vpack.c.bf16 %v612_v51, %v610_v46  ;;  %v616_v63 = vadd.f32 %v615_v59, %v1956_v19  ;;  %v1607_v1 = vpack.c.bf16 %v725_v56, %v723_v50  ;;  %v729_v2 = vadd.f32 %v728_v0, %v1959_v20 }
 0x135   :  { %v2129_v19 = vrot.slane %v1944_v14, %v127_v60 }
 0x136   :  { %1177 = vst [vmem:[%s2300_s3 + $0xe0] sm:$0xff] %v1606_v61  ;;  %v1608_v3 = vpack.c.bf16 %v616_v63, %v614_v57  ;;  %1178 = vst [vmem:[%s2300_s3 + $0xe8] sm:$0xff] %v1607_v1  ;;  %v1609_v18 = vpack.c.bf16 %v729_v2, %v727_v62 }
 0x138   :  { %1179 = vst [vmem:[%s2300_s3 + $0xf0] sm:$0xff] %v1608_v3  ;;  %v765_v20 = vpop.f32.mrb[32].mxu0  ;;  %1180 = vst [vmem:[%s2300_s3 + $0xf8] sm:$0xff] %v1609_v18  ;;  %v878_v7 = vpop.f32.mrb[32].mxu1 }
 0x139   :  { %v766_v6 = vadd.f32 %v765_v20, %v2114_v4  ;;  %v767_v9 = vpop.f32.mrb[33].mxu0  ;;  %v879_v10 = vadd.f32 %v878_v7, %v2120_v5  ;;  %v880_v8 = vpop.f32.mrb[33].mxu1 }
 0x13a   :  { %v768_v11 = vadd.f32 %v767_v9, %v2123_v12  ;;  %v769_v14 = vpop.f32.mrb[34].mxu0  ;;  %v881_v13 = vadd.f32 %v880_v8, %v2129_v19  ;;  %v882_v16 = vpop.f32.mrb[34].mxu1 }
 0x13b   :  { %v770_v15 = vadd.f32 %v769_v14, %v2114_v4  ;;  %v771_v17 = vpop.f32.mrb[35].mxu0  ;;  %v883_v22 = vadd.f32 %v882_v16, %v2120_v5  ;;  %v884_v24 = vpop.f32.mrb[35].mxu1 }
 0x13c   :  { %v1610_v21 = vpack.c.bf16 %v768_v11, %v766_v6  ;;  %v772_v23 = vadd.f32 %v771_v17, %v2123_v12  ;;  %v1611_v25 = vpack.c.bf16 %v881_v13, %v879_v10  ;;  %v885_v26 = vadd.f32 %v884_v24, %v2129_v19 }
 0x13e   :  { %1546 = vst [vmem:[%s2300_s3 + $0x100] sm:$0xff] %v1610_v21  ;;  %v1612_v27 = vpack.c.bf16 %v772_v23, %v770_v15  ;;  %1547 = vst [vmem:[%s2300_s3 + $0x108] sm:$0xff] %v1611_v25  ;;  %v1613_v28 = vpack.c.bf16 %v885_v26, %v883_v22 }
 0x140   :  { %1548 = vst [vmem:[%s2300_s3 + $0x110] sm:$0xff] %v1612_v27  ;;  %v775_v29 = vpop.f32.mrb[36].mxu0  ;;  %1549 = vst [vmem:[%s2300_s3 + $0x118] sm:$0xff] %v1613_v28  ;;  %v888_v31 = vpop.f32.mrb[36].mxu1 }
 0x141   :  { %v776_v30 = vadd.f32 %v775_v29, %v2114_v4  ;;  %v777_v32 = vpop.f32.mrb[37].mxu0  ;;  %v889_v33 = vadd.f32 %v888_v31, %v2120_v5  ;;  %v890_v35 = vpop.f32.mrb[37].mxu1 }
 0x142   :  { %v778_v34 = vadd.f32 %v777_v32, %v2123_v12  ;;  %v779_v36 = vpop.f32.mrb[38].mxu0  ;;  %v891_v37 = vadd.f32 %v890_v35, %v2129_v19  ;;  %v892_v39 = vpop.f32.mrb[38].mxu1 }
 0x143   :  { %v780_v38 = vadd.f32 %v779_v36, %v2114_v4  ;;  %v781_v40 = vpop.f32.mrb[39].mxu0  ;;  %v893_v42 = vadd.f32 %v892_v39, %v2120_v5  ;;  %v894_v44 = vpop.f32.mrb[39].mxu1 }
 0x144   :  { %v1614_v41 = vpack.c.bf16 %v778_v34, %v776_v30  ;;  %v782_v43 = vadd.f32 %v781_v40, %v2123_v12  ;;  %v1615_v45 = vpack.c.bf16 %v891_v37, %v889_v33  ;;  %v895_v46 = vadd.f32 %v894_v44, %v2129_v19 }
 0x146   :  { %1550 = vst [vmem:[%s2300_s3 + $0x120] sm:$0xff] %v1614_v41  ;;  %v1616_v47 = vpack.c.bf16 %v782_v43, %v780_v38  ;;  %1551 = vst [vmem:[%s2300_s3 + $0x128] sm:$0xff] %v1615_v45  ;;  %v1617_v48 = vpack.c.bf16 %v895_v46, %v893_v42 }
 0x148   :  { %1552 = vst [vmem:[%s2300_s3 + $0x130] sm:$0xff] %v1616_v47  ;;  %v785_v49 = vpop.f32.mrb[40].mxu0  ;;  %1553 = vst [vmem:[%s2300_s3 + $0x138] sm:$0xff] %v1617_v48  ;;  %v898_v51 = vpop.f32.mrb[40].mxu1 }
 0x149   :  { %v786_v50 = vadd.f32 %v785_v49, %v2114_v4  ;;  %v787_v52 = vpop.f32.mrb[41].mxu0  ;;  %v899_v53 = vadd.f32 %v898_v51, %v2120_v5  ;;  %v900_v55 = vpop.f32.mrb[41].mxu1 }
 0x14a   :  { %v788_v54 = vadd.f32 %v787_v52, %v2123_v12  ;;  %v789_v56 = vpop.f32.mrb[42].mxu0  ;;  %v901_v57 = vadd.f32 %v900_v55, %v2129_v19  ;;  %v902_v59 = vpop.f32.mrb[42].mxu1 }
 0x14b   :  { %v790_v58 = vadd.f32 %v789_v56, %v2114_v4  ;;  %v791_v60 = vpop.f32.mrb[43].mxu0  ;;  %v903_v62 = vadd.f32 %v902_v59, %v2120_v5  ;;  %v904_v0 = vpop.f32.mrb[43].mxu1 }
 0x14c   :  { %v1618_v61 = vpack.c.bf16 %v788_v54, %v786_v50  ;;  %v792_v63 = vadd.f32 %v791_v60, %v2123_v12  ;;  %v1619_v1 = vpack.c.bf16 %v901_v57, %v899_v53  ;;  %v905_v2 = vadd.f32 %v904_v0, %v2129_v19 }
 0x14e   :  { %1554 = vst [vmem:[%s2300_s3 + $0x140] sm:$0xff] %v1618_v61  ;;  %v1620_v3 = vpack.c.bf16 %v792_v63, %v790_v58  ;;  %1555 = vst [vmem:[%s2300_s3 + $0x148] sm:$0xff] %v1619_v1  ;;  %v1621_v18 = vpack.c.bf16 %v905_v2, %v903_v62 }
 0x150   :  { %1556 = vst [vmem:[%s2300_s3 + $0x150] sm:$0xff] %v1620_v3  ;;  %v795_v20 = vpop.f32.mrb[44].mxu0  ;;  %1557 = vst [vmem:[%s2300_s3 + $0x158] sm:$0xff] %v1621_v18  ;;  %v908_v7 = vpop.f32.mrb[44].mxu1 }
 0x151   :  { %v796_v6 = vadd.f32 %v795_v20, %v2114_v4  ;;  %v797_v9 = vpop.f32.mrb[45].mxu0  ;;  %v909_v10 = vadd.f32 %v908_v7, %v2120_v5  ;;  %v910_v8 = vpop.f32.mrb[45].mxu1 }
 0x152   :  { %v798_v11 = vadd.f32 %v797_v9, %v2123_v12  ;;  %v799_v14 = vpop.f32.mrb[46].mxu0  ;;  %v911_v13 = vadd.f32 %v910_v8, %v2129_v19  ;;  %v912_v16 = vpop.f32.mrb[46].mxu1 }
 0x153   :  { %v800_v15 = vadd.f32 %v799_v14, %v2114_v4  ;;  %v801_v17 = vpop.f32.mrb[47].mxu0  ;;  %v913_v22 = vadd.f32 %v912_v16, %v2120_v5  ;;  %v914_v24 = vpop.f32.mrb[47].mxu1 }
 0x154   :  { %v1622_v21 = vpack.c.bf16 %v798_v11, %v796_v6  ;;  %v802_v23 = vadd.f32 %v801_v17, %v2123_v12  ;;  %v1623_v25 = vpack.c.bf16 %v911_v13, %v909_v10  ;;  %v915_v26 = vadd.f32 %v914_v24, %v2129_v19 }
 0x156   :  { %1558 = vst [vmem:[%s2300_s3 + $0x160] sm:$0xff] %v1622_v21  ;;  %v1624_v27 = vpack.c.bf16 %v802_v23, %v800_v15  ;;  %1559 = vst [vmem:[%s2300_s3 + $0x168] sm:$0xff] %v1623_v25  ;;  %v1625_v28 = vpack.c.bf16 %v915_v26, %v913_v22 }
 0x158   :  { %1560 = vst [vmem:[%s2300_s3 + $0x170] sm:$0xff] %v1624_v27  ;;  %v805_v29 = vpop.f32.mrb[48].mxu0  ;;  %1561 = vst [vmem:[%s2300_s3 + $0x178] sm:$0xff] %v1625_v28  ;;  %v918_v31 = vpop.f32.mrb[48].mxu1 }
 0x159   :  { %v806_v30 = vadd.f32 %v805_v29, %v2114_v4  ;;  %v807_v32 = vpop.f32.mrb[49].mxu0  ;;  %v919_v33 = vadd.f32 %v918_v31, %v2120_v5  ;;  %v920_v35 = vpop.f32.mrb[49].mxu1 }
 0x15a   :  { %v808_v34 = vadd.f32 %v807_v32, %v2123_v12  ;;  %v809_v36 = vpop.f32.mrb[50].mxu0  ;;  %v921_v37 = vadd.f32 %v920_v35, %v2129_v19  ;;  %v922_v39 = vpop.f32.mrb[50].mxu1 }
 0x15b   :  { %v810_v38 = vadd.f32 %v809_v36, %v2114_v4  ;;  %v811_v40 = vpop.f32.mrb[51].mxu0  ;;  %v923_v42 = vadd.f32 %v922_v39, %v2120_v5  ;;  %v924_v44 = vpop.f32.mrb[51].mxu1 }
 0x15c   :  { %v1626_v41 = vpack.c.bf16 %v808_v34, %v806_v30  ;;  %v812_v43 = vadd.f32 %v811_v40, %v2123_v12  ;;  %v1627_v45 = vpack.c.bf16 %v921_v37, %v919_v33  ;;  %v925_v46 = vadd.f32 %v924_v44, %v2129_v19 }
 0x15e   :  { %1562 = vst [vmem:[%s2300_s3 + $0x180] sm:$0xff] %v1626_v41  ;;  %v1628_v47 = vpack.c.bf16 %v812_v43, %v810_v38  ;;  %1563 = vst [vmem:[%s2300_s3 + $0x188] sm:$0xff] %v1627_v45  ;;  %v1629_v48 = vpack.c.bf16 %v925_v46, %v923_v42 }
 0x160   :  { %1564 = vst [vmem:[%s2300_s3 + $0x190] sm:$0xff] %v1628_v47  ;;  %v815_v49 = vpop.f32.mrb[52].mxu0  ;;  %1565 = vst [vmem:[%s2300_s3 + $0x198] sm:$0xff] %v1629_v48  ;;  %v928_v51 = vpop.f32.mrb[52].mxu1 }
 0x161   :  { %v816_v50 = vadd.f32 %v815_v49, %v2114_v4  ;;  %v817_v52 = vpop.f32.mrb[53].mxu0  ;;  %v929_v53 = vadd.f32 %v928_v51, %v2120_v5  ;;  %v930_v55 = vpop.f32.mrb[53].mxu1 }
 0x162   :  { %v818_v54 = vadd.f32 %v817_v52, %v2123_v12  ;;  %v819_v56 = vpop.f32.mrb[54].mxu0  ;;  %v931_v57 = vadd.f32 %v930_v55, %v2129_v19  ;;  %v932_v59 = vpop.f32.mrb[54].mxu1 }
 0x163   :  { %v820_v58 = vadd.f32 %v819_v56, %v2114_v4  ;;  %v821_v60 = vpop.f32.mrb[55].mxu0  ;;  %v933_v62 = vadd.f32 %v932_v59, %v2120_v5  ;;  %v934_v0 = vpop.f32.mrb[55].mxu1 }
 0x164   :  { %v1630_v61 = vpack.c.bf16 %v818_v54, %v816_v50  ;;  %v822_v63 = vadd.f32 %v821_v60, %v2123_v12  ;;  %v1631_v1 = vpack.c.bf16 %v931_v57, %v929_v53  ;;  %v935_v2 = vadd.f32 %v934_v0, %v2129_v19 }
 0x166   :  { %1566 = vst [vmem:[%s2300_s3 + $0x1a0] sm:$0xff] %v1630_v61  ;;  %v1632_v3 = vpack.c.bf16 %v822_v63, %v820_v58  ;;  %1567 = vst [vmem:[%s2300_s3 + $0x1a8] sm:$0xff] %v1631_v1  ;;  %v1633_v18 = vpack.c.bf16 %v935_v2, %v933_v62 }
 0x168   :  { %1568 = vst [vmem:[%s2300_s3 + $0x1b0] sm:$0xff] %v1632_v3  ;;  %v825_v20 = vpop.f32.mrb[56].mxu0  ;;  %1569 = vst [vmem:[%s2300_s3 + $0x1b8] sm:$0xff] %v1633_v18  ;;  %v938_v7 = vpop.f32.mrb[56].mxu1 }
 0x169   :  { %v826_v6 = vadd.f32 %v825_v20, %v2114_v4  ;;  %v827_v9 = vpop.f32.mrb[57].mxu0  ;;  %v939_v10 = vadd.f32 %v938_v7, %v2120_v5  ;;  %v940_v8 = vpop.f32.mrb[57].mxu1 }
 0x16a   :  { %v828_v11 = vadd.f32 %v827_v9, %v2123_v12  ;;  %v829_v14 = vpop.f32.mrb[58].mxu0  ;;  %v941_v13 = vadd.f32 %v940_v8, %v2129_v19  ;;  %v942_v16 = vpop.f32.mrb[58].mxu1 }
 0x16b   :  { %v830_v15 = vadd.f32 %v829_v14, %v2114_v4  ;;  %v831_v17 = vpop.f32.mrb[59].mxu0  ;;  %v943_v22 = vadd.f32 %v942_v16, %v2120_v5  ;;  %v944_v24 = vpop.f32.mrb[59].mxu1 }
 0x16c   :  { %v1634_v21 = vpack.c.bf16 %v828_v11, %v826_v6  ;;  %v832_v23 = vadd.f32 %v831_v17, %v2123_v12  ;;  %v1635_v25 = vpack.c.bf16 %v941_v13, %v939_v10  ;;  %v945_v26 = vadd.f32 %v944_v24, %v2129_v19 }
 0x16e   :  { %1570 = vst [vmem:[%s2300_s3 + $0x1c0] sm:$0xff] %v1634_v21  ;;  %v1636_v27 = vpack.c.bf16 %v832_v23, %v830_v15  ;;  %1571 = vst [vmem:[%s2300_s3 + $0x1c8] sm:$0xff] %v1635_v25  ;;  %v1637_v28 = vpack.c.bf16 %v945_v26, %v943_v22 }
 0x170   :  { %1572 = vst [vmem:[%s2300_s3 + $0x1d0] sm:$0xff] %v1636_v27  ;;  %v835_v29 = vpop.f32.mrb[60].mxu0  ;;  %1573 = vst [vmem:[%s2300_s3 + $0x1d8] sm:$0xff] %v1637_v28  ;;  %v948_v31 = vpop.f32.mrb[60].mxu1 }
 0x171   :  { %v836_v30 = vadd.f32 %v835_v29, %v2114_v4  ;;  %v837_v32 = vpop.f32.mrb[61].mxu0  ;;  %v949_v33 = vadd.f32 %v948_v31, %v2120_v5  ;;  %v950_v35 = vpop.f32.mrb[61].mxu1 }
 0x172   :  { %v838_v34 = vadd.f32 %v837_v32, %v2123_v12  ;;  %v839_v36 = vpop.f32.mrb[62].mxu0  ;;  %v951_v37 = vadd.f32 %v950_v35, %v2129_v19  ;;  %v952_v39 = vpop.f32.mrb[62].mxu1 }
 0x173   :  { %v840_v38 = vadd.f32 %v839_v36, %v2114_v4  ;;  %v841_v40 = vpop.f32.mrb[63].mxu0  ;;  %v953_v42 = vadd.f32 %v952_v39, %v2120_v5  ;;  %v954_v44 = vpop.f32.mrb[63].mxu1 }
 0x174   :  { %v1638_v41 = vpack.c.bf16 %v838_v34, %v836_v30  ;;  %v842_v43 = vadd.f32 %v841_v40, %v2123_v12  ;;  %v1639_v45 = vpack.c.bf16 %v951_v37, %v949_v33  ;;  %v955_v46 = vadd.f32 %v954_v44, %v2129_v19 }
 0x176   :  { %1574 = vst [vmem:[%s2300_s3 + $0x1e0] sm:$0xff] %v1638_v41  ;;  %v1640_v47 = vpack.c.bf16 %v842_v43, %v840_v38  ;;  %1575 = vst [vmem:[%s2300_s3 + $0x1e8] sm:$0xff] %v1639_v45  ;;  %v1641_v4 = vpack.c.bf16 %v955_v46, %v953_v42 }
 0x178   :  { %1576 = vst [vmem:[%s2300_s3 + $0x1f0] sm:$0xff] %v1640_v47  ;;  %1577 = vst [vmem:[%s2300_s3 + $0x1f8] sm:$0xff] %v1641_v4 }

// kernel: bilstm_forward.3
= control target key start
LH: loop header
LB: loop body
LE: loop exit
PB: predicated region body
PF: predicated region fallthrough
CT: control target
= control target key end

     0   :  { %8 = vsyncpa [#allocation7], 0  ;;  %s2815_s0 = inlined_call_operand.vmem [shape: s32[8,128], index: 0, kind: input, shape index: {}]   ;;  %s2816_s1 = inlined_call_operand.vmem [shape: bf16[2,16,8,512], index: 1, kind: input, shape index: {}]   ;;  %s2817_s2 = inlined_call_operand.vmem [shape: bf16[2,128,512], index: 2, kind: input, shape index: {}]   ;;  %s2818_s3 = inlined_call_operand.hbm [shape: f32[8,256], index: 3, kind: output, shape index: {}]  }
   0x1   :  { %10 = vsyncpa [#allocation7 + $0x1], 0  ;;  %s2112_s12 = smov 0   ;;  %s2114_s13 = smov 0  }
   0x2   :  { %s2116_s14 = smov 0   ;;  %s2118_s15 = smov 0  }
   0x3   :  { %s2120_s16 = smov 0   ;;  %s2122_s17 = smov 0  }
   0x4   :  { %s2124_s18 = smov 0   ;;  %s2126_s19 = smov 0  }
   0x5 LB: > { %s1756_s20 = sadd.s32 4294967295, %s2087_s19   ;;  %s1757_s21 = sadd.s32 4294967294, %s2087_s19   ;;  %s2087_s19 = sphi %s2126_s19, %s16_s19   ;;  %s2083_s18 = sphi %s2124_s18, %s2834_s18   ;;  %s2079_s17 = sphi %s2122_s17, %s2833_s17   ;;  %s2075_s16 = sphi %s2120_s16, %s2832_s16   ;;  %s2071_s15 = sphi %s2118_s15, %s2831_s15   ;;  %s2067_s14 = sphi %s2116_s14, %s2830_s14   ;;  %s2063_s13 = sphi %s2114_s13, %s2829_s13   ;;  %s2059_s12 = sphi %s2112_s12, %s2828_s12  }
   0x6   : > { %s25_s22 = sadd.s32 1, %s2079_s17  ;;  %s28_s23 = sadd.s32 1, %s2083_s18 }
   0x7   : > { %p26_p0 = scmp.ge.s32.totalorder %s25_s22, 2  ;;  %p104_p1 = scmp.ne.s32.totalorder %s2067_s14, %s2063_s13 }
   0x8   : > { %p105_p2 = scmp.eq.s32.totalorder %s1756_s20, 3  ;;  %p110_p4 = scmp.ne.s32.totalorder %s2063_s13, %s2059_s12 }
   0x9   : > { %s2836_s22 = smov (%p26_p0, %s25_s22), 0  ;;  %s2838_s23 = smov (!%p26_p0, %s28_s23), %s2083_s18 }
   0xa   : > { %2821 = sst [smem:[#allocation11_spill]] %s2836_s22  ;;  %p2161_p3 = por %p105_p2, %p104_p1 }
   0xb   : > { %p30_p5 = scmp.ge.s32.totalorder %s2838_s23, 2  ;;  %p111_p6 = scmp.eq.s32.totalorder %s1757_s21, 3 }
   0xc   : > { %p1760_p7 = scmp.ge.s32.totalorder %s2087_s19, 1  ;;  %p156_p8 = scmp.lt.s32.totalorder %s2087_s19, 5 }
   0xd   : > { %s2840_s23 = smov (%p30_p5, %s2838_s23), 0  ;;  %p2171_p9 = por %p111_p6, %p110_p4 }
   0xe   : > { %2823 = sst [smem:[#allocation12_spill]] %s2840_s23  ;;  %p157_p10 = pnand %p1760_p7, %p156_p8 }
   0xf   : > { %s91_s26 = ssub.s32 %s2083_s18, %s2840_s23  ;;  %s94_s27 = sadd.s32 1, %s2067_s14 }
  0x10   : > { %p92_p11 = scmp.eq.s32.totalorder %s91_s26, 0  ;;  %160 = sbr.rel (%p157_p10) target bundleno = 2153 (0x869), region = 28 }
  0x11   : > { %s2820_s29 = sand.u32 (!%p157_p10), 1, %s2063_s13   ;;  %s2183_s30 = ssub.s32 (!%p157_p10), 1, %s2075_s16 }
  0x12   : > { %s2179_s28 = scalar_select %p92_p11, %s2067_s14, %s94_s27  }
  0x13   : > { %s2187_s4 = sshll.u32 (!%p157_p10), %s2820_s29, 3  ;;  %s189_s5 = smul.u32 (!%p157_p10), %s2071_s15, %s2183_s30 }
  0x14   : > { %s190_s6 = ssub.s32 (!%p157_p10), 1, %s2071_s15  ;;  %p194_p12 = scmp.lt.s32.totalorder (!%p157_p10), %s2075_s16, 1 }
  0x15   : > { %s191_s7 = smul.u32 (!%p157_p10), %s2075_s16, %s190_s6  ;;  %s187_s29 = scalar_lea.vmem (!%p157_p10), [#allocation6], %s2187_s4 }
  0x16   : > { %p1766_p0 = scmp.ne.s32.totalorder (!%p157_p10), %s2071_s15, 0 }
  0x17   : > { %s192_s8 = sadd.s32 %s191_s7, %s189_s5  ;;  %s1796_s6 = sshll.u32 (!%p1766_p0), %s2075_s16, 8 }
  0x18   : > { %s1762_s9 = sshll.u32 %s192_s8, 3  ;;  %s2206_s8 = scalar_lea.vmem (!%p1766_p0), %s2817_s2, %s1796_s6 }
  0x19   : > { %s195_s10 = scalar_select %p194_p12, %s2075_s16, 1 }
  0x1a   : > { %p196_p13 = scmp.lt.s32.totalorder %s1762_s9, 15  ;;  %213 = sbr.rel (%p1766_p0) target bundleno = 68 (0x44), region = 32  ;;  %v234_v0 = vld [vmem:[%s2206_s8] sm:$0xf] (!%p1766_p0)  ;;  %v236_v1 = vld [vmem:[%s2206_s8 + $0x10] sm:$0xf] (!%p1766_p0) }
  0x1b   : > { %s1764_s11 = sshll.u32 %s195_s10, 6  ;;  %v238_v2 = vld [vmem:[%s2206_s8 + $0x4] sm:$0xf] (!%p1766_p0)  ;;  %235 = vst [vmem:[#allocation2] sm:$0xf] (!%p1766_p0), %v234_v0  ;;  %v248_v7 = vld [vmem:[%s2206_s8 + $0x1c] sm:$0xff] (!%p1766_p0)  }
  0x1c   : > { %s2842_s9 = smov (!%p196_p13, %s1762_s9), 15  ;;  %237 = vst [vmem:[#allocation2 + $0x4] sm:$0xf] (!%p1766_p0), %v236_v1  ;;  %239 = vst [vmem:[#allocation2 + $0x8] sm:$0xf] (!%p1766_p0), %v238_v2  ;;  %v264_v14 = vld [vmem:[%s2206_s8 + $0x3c] sm:$0xff] (!%p1766_p0)  }
  0x1d   : > { %s1763_s20 = sshll.u32 %s2842_s9, 2  ;;  %v240_v3 = vld [vmem:[%s2206_s8 + $0x14] sm:$0xf] (!%p1766_p0)  ;;  %v242_v4 = vld [vmem:[%s2206_s8 + $0x8] sm:$0xf] (!%p1766_p0)  ;;  %249 = vst [vmem:[#allocation2 + $0x1c] sm:$0xff] (!%p1766_p0), %v248_v7  }
  0x1e   : > { %s200_s21 = sadd.s32 %s1764_s11, %s1763_s20  ;;  %v244_v5 = vld [vmem:[%s2206_s8 + $0x18] sm:$0xf] (!%p1766_p0)  ;;  %241 = vst [vmem:[#allocation2 + $0xc] sm:$0xf] (!%p1766_p0), %v240_v3  ;;  %243 = vst [vmem:[#allocation2 + $0x10] sm:$0xf] (!%p1766_p0), %v242_v4 }
  0x1f   : > { %s1765_s26 = sshll.u32 %s200_s21, 2  ;;  %245 = vst [vmem:[#allocation2 + $0x14] sm:$0xf] (!%p1766_p0), %v244_v5  ;;  %v246_v6 = vld [vmem:[%s2206_s8 + $0xc] sm:$0xf] (!%p1766_p0)  ;;  %265 = vst [vmem:[#allocation2 + $0x3c] sm:$0xff] (!%p1766_p0), %v264_v14  }
  0x20   : > { %s2198_s22 = scalar_lea.vmem %s2816_s1, %s1765_s26  ;;  %v252_v8 = vld [vmem:[%s2206_s8 + $0x30] sm:$0xf] (!%p1766_p0)  ;;  %247 = vst [vmem:[#allocation2 + $0x18] sm:$0xf] (!%p1766_p0), %v246_v6  ;;  %v254_v9 = vld [vmem:[%s2206_s8 + $0x24] sm:$0xf] (!%p1766_p0) }
  0x21   : > { %253 = vst [vmem:[#allocation2 + $0x24] sm:$0xf] %v252_v8  ;;  %v256_v10 = vld [vmem:[%s2206_s8 + $0x34] sm:$0xf]  ;;  %v258_v11 = vld [vmem:[%s2206_s8 + $0x28] sm:$0xf] }
  0x22   : > { %255 = vst [vmem:[#allocation2 + $0x28] sm:$0xf] %v254_v9  ;;  %257 = vst [vmem:[#allocation2 + $0x2c] sm:$0xf] %v256_v10  ;;  %v260_v12 = vld [vmem:[%s2206_s8 + $0x38] sm:$0xf] }
  0x23   : > { %259 = vst [vmem:[#allocation2 + $0x30] sm:$0xf] %v258_v11  ;;  %v262_v13 = vld [vmem:[%s2206_s8 + $0x2c] sm:$0xf]  ;;  %261 = vst [vmem:[#allocation2 + $0x34] sm:$0xf] %v260_v12 }
  0x24   : > { %263 = vst [vmem:[#allocation2 + $0x38] sm:$0xf] %v262_v13  ;;  %v268_v15 = vld [vmem:[%s2206_s8 + $0x50] sm:$0xf]  ;;  %v270_v16 = vld [vmem:[%s2206_s8 + $0x44] sm:$0xf] }
  0x25   : > { %v272_v17 = vld [vmem:[%s2206_s8 + $0x54] sm:$0xf]  ;;  %269 = vst [vmem:[#allocation2 + $0x44] sm:$0xf] %v268_v15  ;;  %271 = vst [vmem:[#allocation2 + $0x48] sm:$0xf] %v270_v16 }
  0x26   : > { %273 = vst [vmem:[#allocation2 + $0x4c] sm:$0xf] %v272_v17  ;;  %v274_v18 = vld [vmem:[%s2206_s8 + $0x48] sm:$0xf]  ;;  %v276_v19 = vld [vmem:[%s2206_s8 + $0x58] sm:$0xf] }
  0x27   : > { %v278_v20 = vld [vmem:[%s2206_s8 + $0x4c] sm:$0xf]  ;;  %275 = vst [vmem:[#allocation2 + $0x50] sm:$0xf] %v274_v18  ;;  %277 = vst [vmem:[#allocation2 + $0x54] sm:$0xf] %v276_v19 }
  0x28   : > { %279 = vst [vmem:[#allocation2 + $0x58] sm:$0xf] %v278_v20  ;;  %v280_v21 = vld [vmem:[%s2206_s8 + $0x5c] sm:$0xff]   ;;  %v284_v22 = vld [vmem:[%s2206_s8 + $0x70] sm:$0xf] }
  0x29   : > { %v286_v23 = vld [vmem:[%s2206_s8 + $0x64] sm:$0xf]  ;;  %281 = vst [vmem:[#allocation2 + $0x5c] sm:$0xff] %v280_v21   ;;  %285 = vst [vmem:[#allocation2 + $0x64] sm:$0xf] %v284_v22  ;;  %v296_v28 = vld [vmem:[%s2206_s8 + $0x7c] sm:$0xff]  }
  0x2a   : > { %287 = vst [vmem:[#allocation2 + $0x68] sm:$0xf] %v286_v23  ;;  %v288_v24 = vld [vmem:[%s2206_s8 + $0x74] sm:$0xf]  ;;  %v290_v25 = vld [vmem:[%s2206_s8 + $0x68] sm:$0xf] }
  0x2b   : > { %v292_v26 = vld [vmem:[%s2206_s8 + $0x78] sm:$0xf]  ;;  %289 = vst [vmem:[#allocation2 + $0x6c] sm:$0xf] %v288_v24  ;;  %291 = vst [vmem:[#allocation2 + $0x70] sm:$0xf] %v290_v25 }
  0x2c   : > { %293 = vst [vmem:[#allocation2 + $0x74] sm:$0xf] %v292_v26  ;;  %v294_v27 = vld [vmem:[%s2206_s8 + $0x6c] sm:$0xf]  ;;  %v300_v29 = vld [vmem:[%s2206_s8 + $0x90] sm:$0xf] }
  0x2d   : > { %295 = vst [vmem:[#allocation2 + $0x78] sm:$0xf] %v294_v27  ;;  %297 = vst [vmem:[#allocation2 + $0x7c] sm:$0xff] %v296_v28   ;;  %v302_v30 = vld [vmem:[%s2206_s8 + $0x84] sm:$0xf]  ;;  %v312_v35 = vld [vmem:[%s2206_s8 + $0x9c] sm:$0xff]  }
  0x2e   : > { %301 = vst [vmem:[#allocation2 + $0x84] sm:$0xf] %v300_v29  ;;  %v304_v31 = vld [vmem:[%s2206_s8 + $0x94] sm:$0xf]  ;;  %v306_v32 = vld [vmem:[%s2206_s8 + $0x88] sm:$0xf] }
  0x2f   : > { %303 = vst [vmem:[#allocation2 + $0x88] sm:$0xf] %v302_v30  ;;  %305 = vst [vmem:[#allocation2 + $0x8c] sm:$0xf] %v304_v31  ;;  %v308_v33 = vld [vmem:[%s2206_s8 + $0x98] sm:$0xf] }
  0x30   : > { %307 = vst [vmem:[#allocation2 + $0x90] sm:$0xf] %v306_v32  ;;  %v310_v34 = vld [vmem:[%s2206_s8 + $0x8c] sm:$0xf]  ;;  %309 = vst [vmem:[#allocation2 + $0x94] sm:$0xf] %v308_v33 }
  0x31   : > { %311 = vst [vmem:[#allocation2 + $0x98] sm:$0xf] %v310_v34  ;;  %313 = vst [vmem:[#allocation2 + $0x9c] sm:$0xff] %v312_v35   ;;  %v316_v36 = vld [vmem:[%s2206_s8 + $0xb0] sm:$0xf]  ;;  %v328_v42 = vld [vmem:[%s2206_s8 + $0xbc] sm:$0xff]  }
  0x32   : > { %v318_v37 = vld [vmem:[%s2206_s8 + $0xa4] sm:$0xf]  ;;  %v320_v38 = vld [vmem:[%s2206_s8 + $0xb4] sm:$0xf]  ;;  %317 = vst [vmem:[#allocation2 + $0xa4] sm:$0xf] %v316_v36 }
  0x33   : > { %319 = vst [vmem:[#allocation2 + $0xa8] sm:$0xf] %v318_v37  ;;  %321 = vst [vmem:[#allocation2 + $0xac] sm:$0xf] %v320_v38  ;;  %v322_v39 = vld [vmem:[%s2206_s8 + $0xa8] sm:$0xf] }
  0x34   : > { %v324_v40 = vld [vmem:[%s2206_s8 + $0xb8] sm:$0xf]  ;;  %v326_v41 = vld [vmem:[%s2206_s8 + $0xac] sm:$0xf]  ;;  %323 = vst [vmem:[#allocation2 + $0xb0] sm:$0xf] %v322_v39 }
  0x35   : > { %325 = vst [vmem:[#allocation2 + $0xb4] sm:$0xf] %v324_v40  ;;  %327 = vst [vmem:[#allocation2 + $0xb8] sm:$0xf] %v326_v41  ;;  %v332_v43 = vld [vmem:[%s2206_s8 + $0xd0] sm:$0xf] }
  0x36   : > { %v334_v44 = vld [vmem:[%s2206_s8 + $0xc4] sm:$0xf]  ;;  %329 = vst [vmem:[#allocation2 + $0xbc] sm:$0xff] %v328_v42   ;;  %333 = vst [vmem:[#allocation2 + $0xc4] sm:$0xf] %v332_v43  ;;  %v344_v49 = vld [vmem:[%s2206_s8 + $0xdc] sm:$0xff]  }
  0x37   : > { %335 = vst [vmem:[#allocation2 + $0xc8] sm:$0xf] %v334_v44  ;;  %v336_v45 = vld [vmem:[%s2206_s8 + $0xd4] sm:$0xf]  ;;  %v338_v46 = vld [vmem:[%s2206_s8 + $0xc8] sm:$0xf] }
  0x38   : > { %v340_v47 = vld [vmem:[%s2206_s8 + $0xd8] sm:$0xf]  ;;  %337 = vst [vmem:[#allocation2 + $0xcc] sm:$0xf] %v336_v45  ;;  %339 = vst [vmem:[#allocation2 + $0xd0] sm:$0xf] %v338_v46 }
  0x39   : > { %341 = vst [vmem:[#allocation2 + $0xd4] sm:$0xf] %v340_v47  ;;  %v342_v48 = vld [vmem:[%s2206_s8 + $0xcc] sm:$0xf]  ;;  %v348_v50 = vld [vmem:[%s2206_s8 + $0xf0] sm:$0xf] }
  0x3a   : > { %343 = vst [vmem:[#allocation2 + $0xd8] sm:$0xf] %v342_v48  ;;  %345 = vst [vmem:[#allocation2 + $0xdc] sm:$0xff] %v344_v49   ;;  %v350_v51 = vld [vmem:[%s2206_s8 + $0xe4] sm:$0xf] }
  0x3b   : > { %349 = vst [vmem:[#allocation2 + $0xe4] sm:$0xf] %v348_v50  ;;  %v352_v52 = vld [vmem:[%s2206_s8 + $0xf4] sm:$0xf]  ;;  %v354_v53 = vld [vmem:[%s2206_s8 + $0xe8] sm:$0xf] }
  0x3c   : > { %351 = vst [vmem:[#allocation2 + $0xe8] sm:$0xf] %v350_v51  ;;  %353 = vst [vmem:[#allocation2 + $0xec] sm:$0xf] %v352_v52  ;;  %v356_v54 = vld [vmem:[%s2206_s8 + $0xf8] sm:$0xf] }
  0x3d   : > { %355 = vst [vmem:[#allocation2 + $0xf0] sm:$0xf] %v354_v53  ;;  %v358_v55 = vld [vmem:[%s2206_s8 + $0xec] sm:$0xf]  ;;  %v360_v56 = vld [vmem:[%s2206_s8 + $0xfc] sm:$0xf] }
  0x3e   : > { %357 = vst [vmem:[#allocation2 + $0xf4] sm:$0xf] %v356_v54  ;;  %359 = vst [vmem:[#allocation2 + $0xf8] sm:$0xf] %v358_v55 }
  0x3f   : > { %361 = vst [vmem:[#allocation2 + $0xfc] sm:$0xf] %v360_v56 }
  0x40   : > { %520 = vsyncadd [#allocation5], 4096  ;;  %v2089_v57 = vmov 0.0  }
  0x41   : > { %521 = vst [vmem:[#allocation3] sm:$0xff] %v2089_v57  ;;  %522 = vst [vmem:[#allocation4] sm:$0xff] %v2089_v57 }
  0x42   : > { %2051 = dma.done.wait [#allocation5], 4096 }
  0x43   : > { %2052 = vsyncadd [#allocation5], 4294963200 }
  0x44 PF: > { %v2269_v60 = vld [vmem:[#allocation2 + $0x28] sm:$0xff]  ;;  %v2090_v63 = vmov 0   ;;  %v2288_v3 = vld [vmem:[#allocation2 + $0x30] sm:$0xff]  ;;  %v2291_v4 = vld [vmem:[#allocation2 + $0x58] sm:$0xff]  ;;  %s1797_s23 = smul.u32 112, %s2075_s16  ;;  %s2406_s10 = sshll.u32 %s2071_s15, 3 }
  0x45   : > { %610 = vmatprep.mubr.bf16.mxu0 %v2090_v63  ;;  %v2285_v2 = vld [vmem:[#allocation2 + $0x48] sm:$0xff]  ;;  %651 = vmatprep.mubr.bf16.mxu1 %v2090_v63  ;;  %v2301_v7 = vld [vmem:[#allocation2 + $0x50] sm:$0xff]  ;;  %v2303_v8 = vld [vmem:[#allocation2 + $0x78] sm:$0xff]  ;;  %s564_s11 = ssub.s32 15, %s2406_s10  ;;  %s563_s20 = smul.u32 %s2406_s10, %s2183_s30 }
  0x46   : > { %v2267_v59 = vld [vmem:[#allocation2] sm:$0xff]  ;;  %v2298_v6 = vld [vmem:[#allocation2 + $0x68] sm:$0xff]  ;;  %v2313_v11 = vld [vmem:[#allocation2 + $0x70] sm:$0xff]  ;;  %s569_s9 = scalar_lea.vmem %s2198_s22, %s1797_s23  ;;  %s565_s21 = smul.u32 %s2075_s16, %s564_s11 }
  0x47   : > { %v2307_v9 = vld [vmem:[#allocation2 + $0x60] sm:$0xff]  ;;  %v2310_v10 = vld [vmem:[#allocation2 + $0x88] sm:$0xff]  ;;  %v2315_v12 = vld [vmem:[#allocation2 + $0x98] sm:$0xff]  ;;  %s691_s5 = smul.u32 6, %s2075_s16  ;;  %s694_s11 = ssub.s32 14, %s2406_s10 }
  0x48   : > { %v2265_v58 = vld [vmem:[#allocation2 + $0x8] sm:$0xff]  ;;  %v2319_v13 = vld [vmem:[#allocation2 + $0x80] sm:$0xff]  ;;  %v2325_v15 = vld [vmem:[#allocation2 + $0x90] sm:$0xff]  ;;  %s566_s26 = sadd.s32 %s565_s21, %s563_s20  ;;  %s695_s21 = smul.u32 %s2075_s16, %s694_s11 }
  0x49   : > { %578 = vmatprep.subr.bf16.mxu0 %v2265_v58  ;;  %v2274_v62 = vld [vmem:[#allocation2 + $0x10] sm:$0xff]  ;;  %v2279_v0 = vld [vmem:[#allocation2 + $0x38] sm:$0xff]  ;;  %v2295_v5 = vld [vmem:[#allocation2 + $0x40] sm:$0xff]  ;;  %s692_s7 = sadd.s32 %s691_s5, %s2183_s30  ;;  %s822_s27 = smul.u32 5, %s2075_s16 }
  0x4a   : > { %v2272_v61 = vld [vmem:[#allocation2 + $0x18] sm:$0xff]  ;;  %579 = vmatpush1.bf16.msra.mxu0 %v2267_v59  ;;  %v2322_v14 = vld [vmem:[#allocation2 + $0xa8] sm:$0xff]  ;;  %v2331_v17 = vld [vmem:[#allocation2 + $0xa0] sm:$0xff]  ;;  %s1798_s8 = sshll.u32 %s692_s7, 4  ;;  %s1774_s6 = sshll.u32 %s2183_s30, 1 }
  0x4b   : > { %619 = vmatprep.subr.bf16.mxu1 %v2272_v61  ;;  %580 = vmatprep.subr.bf16.mxu0 %v2269_v60  ;;  %v2282_v1 = vld [vmem:[#allocation2 + $0x20] sm:$0xff]  ;;  %v2327_v16 = vld [vmem:[#allocation2 + $0xb8] sm:$0xff]  ;;  %v2334_v18 = vld [vmem:[#allocation2 + $0xc8] sm:$0xff]  ;;  %s699_s23 = scalar_lea.vmem %s2198_s22, %s1798_s8  ;;  %s823_s5 = sadd.s32 %s1774_s6, %s822_s27 }
  0x4c   : > { %620 = vmatpush1.bf16.msra.mxu1 %v2274_v62  ;;  %v2337_v19 = vld [vmem:[#allocation2 + $0xb0] sm:$0xff]  ;;  %v2339_v20 = vld [vmem:[#allocation2 + $0xd8] sm:$0xff]  ;;  %v2343_v21 = vld [vmem:[#allocation2 + $0xc0] sm:$0xff]  ;;  %s1799_s7 = sshll.u32 %s823_s5, 4  ;;  %s1777_s27 = sshll.u32 %s2075_s16, 2 }
  0x4d   : > { %621 = vmatprep.subr.bf16.mxu1 %v2279_v0  ;;  %v2346_v22 = vld [vmem:[#allocation2 + $0xe8] sm:$0xff]  ;;  %v2349_v23 = vld [vmem:[#allocation2 + $0xd0] sm:$0xff]  ;;  %v2351_v24 = vld [vmem:[#allocation2 + $0xf8] sm:$0xff]  ;;  %s830_s8 = scalar_lea.vmem %s2198_s22, %s1799_s7  ;;  %p1790_p1 = scmp.ne.s32.totalorder %s2071_s15, 1 }
  0x4e   : > { %581 = vmatpush1.bf16.msra.mxu0 %v2282_v1  ;;  %v2354_v25 = vld [vmem:[#allocation3] sm:$0xff]  ;;  %v2361_v27 = vld [vmem:[#allocation2 + $0xf0] sm:$0xff]  ;;  %v571_v30 = vld [vmem:[%s569_s9 + $0x8] sm:$0xff] }
  0x4f   : > { %582 = vmatprep.subr.bf16.mxu0 %v2285_v2  ;;  %v2357_v26 = vld [vmem:[#allocation2 + $0xe0] sm:$0xff]  ;;  %v577_v28 = vpack.c.bf16 %v2354_v25, %v2354_v25  ;;  %v574_v33 = vunpack.c.l.bf16 %v571_v30  ;;  %v575_v47 = vunpack.c.h.bf16 %v571_v30  ;;  %v677_v56 = vld [vmem:[#allocation4] sm:$0xff] }
  0x50   : > { %622 = vmatpush1.bf16.msra.mxu1 %v2288_v3  ;;  %v570_v29 = vld [vmem:[%s569_s9] sm:$0xff]  ;;  %s690_s9 = sadd.s32 1, %s2406_s10 }
  0x51   : > { %623 = vmatprep.subr.bf16.mxu1 %v2291_v4  ;;  %v572_v31 = vunpack.c.l.bf16 %v570_v29  ;;  %v573_v32 = vunpack.c.h.bf16 %v570_v29  ;;  %v683_v29 = vstv %s566_s26  ;;  %s693_s20 = smul.u32 %s690_s9, %s2183_s30  ;;  %s825_s9 = ssub.s32 13, %s2406_s10 }
  0x52   : > { %583 = vmatpush1.bf16.msra.mxu0 %v2295_v5 }
  0x53   : > { %584 = vmatprep.subr.bf16.mxu0 %v2298_v6  ;;  %s696_s26 = sadd.s32 %s695_s21, %s693_s20  ;;  %s826_s20 = smul.u32 %s2075_s16, %s825_s9 }
  0x54   : > { %624 = vmatpush1.bf16.msra.mxu1 %v2301_v7 }
  0x55   : > { %625 = vmatprep.subr.bf16.mxu1 %v2303_v8 }
  0x56   : > { %585 = vmatpush1.bf16.msra.mxu0 %v2307_v9 }
  0x57   : > { %586 = vmatprep.subr.bf16.mxu0 %v2310_v10 }
  0x58   : > { %626 = vmatpush1.bf16.msra.mxu1 %v2313_v11 }
  0x59   : > { %627 = vmatprep.subr.bf16.mxu1 %v2315_v12 }
  0x5a   : > { %587 = vmatpush1.bf16.msra.mxu0 %v2319_v13 }
  0x5b   : > { %588 = vmatprep.subr.bf16.mxu0 %v2322_v14 }
  0x5c   : > { %628 = vmatpush1.bf16.msra.mxu1 %v2325_v15 }
  0x5d   : > { %629 = vmatprep.subr.bf16.mxu1 %v2327_v16 }
  0x5e   : > { %589 = vmatpush1.bf16.msra.mxu0 %v2331_v17 }
  0x5f   : > { %590 = vmatprep.subr.bf16.mxu0 %v2334_v18 }
  0x60   : > { %630 = vmatpush1.bf16.msra.mxu1 %v2337_v19 }
  0x61   : > { %631 = vmatprep.subr.bf16.mxu1 %v2339_v20 }
  0x62   : > { %591 = vmatpush1.bf16.msra.mxu0 %v2343_v21 }
  0x63   : > { %592 = vmatprep.subr.bf16.mxu0 %v2346_v22 }
  0x64   : > { %632 = vmatpush1.bf16.msra.mxu1 %v2349_v23 }
  0x65   : > { %633 = vmatprep.subr.bf16.mxu1 %v2351_v24 }
  0x66   : > { %593 = vmatpush1.bf16.msra.mxu0 %v2357_v26 }
  0x67   : > { %708 = vmatprep.subr.bf16.mxu0 %v2265_v58 }
  0x68   : > { %634 = vmatpush1.bf16.msra.mxu1 %v2361_v27 }
  0x69   : > { %749 = vmatprep.subr.bf16.mxu1 %v2272_v61  ;;  %611 = vmatmul.mubr.bf16.vlgmr.msra.gmra.mrb[0].mxu0 %v577_v28 }
  0x6a   : > { %709 = vmatpush1.bf16.msra.mxu0 %v2267_v59  ;;  %740 = vmatprep.mubr.bf16.mxu0 %v2090_v63 }
  0x6b   : > { %652 = vmatmul.mubr.bf16.vlgmr.msra.gmra.mrb[0].mxu1 %v577_v28  ;;  %710 = vmatprep.subr.bf16.mxu0 %v2269_v60  ;;  %v2415_v28 = vld [vmem:[%s2815_s0] sm:$0xff] }
  0x6c   : > { %750 = vmatpush1.bf16.msra.mxu1 %v2274_v62  ;;  %781 = vmatprep.mubr.bf16.mxu1 %v2090_v63  ;;  %vm684_vm0 = vcmp.gt.s32.totalorder %v2415_v28, %v683_v29 }
  0x6d   : > { %751 = vmatprep.subr.bf16.mxu1 %v2279_v0 }
  0x6e   : > { %711 = vmatpush1.bf16.msra.mxu0 %v2282_v1 }
  0x6f   : > { %712 = vmatprep.subr.bf16.mxu0 %v2285_v2 }
  0x70   : > { %752 = vmatpush1.bf16.msra.mxu1 %v2288_v3 }
  0x71   : > { %753 = vmatprep.subr.bf16.mxu1 %v2291_v4 }
  0x72   : > { %713 = vmatpush1.bf16.msra.mxu0 %v2295_v5 }
  0x73   : > { %714 = vmatprep.subr.bf16.mxu0 %v2298_v6 }
  0x74   : > { %754 = vmatpush1.bf16.msra.mxu1 %v2301_v7 }
  0x75   : > { %755 = vmatprep.subr.bf16.mxu1 %v2303_v8 }
  0x76   : > { %715 = vmatpush1.bf16.msra.mxu0 %v2307_v9 }
  0x77   : > { %716 = vmatprep.subr.bf16.mxu0 %v2310_v10 }
  0x78   : > { %756 = vmatpush1.bf16.msra.mxu1 %v2313_v11 }
  0x79   : > { %757 = vmatprep.subr.bf16.mxu1 %v2315_v12 }
  0x7a   : > { %717 = vmatpush1.bf16.msra.mxu0 %v2319_v13 }
  0x7b   : > { %718 = vmatprep.subr.bf16.mxu0 %v2322_v14 }
  0x7c   : > { %758 = vmatpush1.bf16.msra.mxu1 %v2325_v15 }
  0x7d   : > { %759 = vmatprep.subr.bf16.mxu1 %v2327_v16 }
  0x7e   : > { %719 = vmatpush1.bf16.msra.mxu0 %v2331_v17 }
  0x7f   : > { %720 = vmatprep.subr.bf16.mxu0 %v2334_v18 }
  0x80   : > { %760 = vmatpush1.bf16.msra.mxu1 %v2337_v19 }
  0x81   : > { %761 = vmatprep.subr.bf16.mxu1 %v2339_v20 }
  0x82   : > { %721 = vmatpush1.bf16.msra.mxu0 %v2343_v21 }
  0x83   : > { %722 = vmatprep.subr.bf16.mxu0 %v2346_v22 }
  0x84   : > { %762 = vmatpush1.bf16.msra.mxu1 %v2349_v23 }
  0x85   : > { %763 = vmatprep.subr.bf16.mxu1 %v2351_v24 }
  0x86   : > { %723 = vmatpush1.bf16.msra.mxu0 %v2357_v26 }
  0x87   : > { %839 = vmatprep.subr.bf16.mxu0 %v2265_v58 }
  0x88   : > { %764 = vmatpush1.bf16.msra.mxu1 %v2361_v27 }
  0x89   : > { %880 = vmatprep.subr.bf16.mxu1 %v2272_v61 }
 0x13c   : > { %v612_v34 = vpop.f32.mrb[0].mxu0 }
 0x13d   : > { %v660_v35 = vadd.f32 %v612_v34, %v572_v31  ;;  %v614_v36 = vpop.f32.mrb[1].mxu0 }
 0x13e   : > { %v653_v37 = vpop.f32.mrb[0].mxu1  ;;  %v661_v38 = vadd.f32 %v614_v36, %v573_v32  ;;  %v616_v39 = vpop.f32.mrb[2].mxu0 }
 0x13f   : > { %v655_v40 = vpop.f32.mrb[1].mxu1  ;;  %v664_v41 = vmul.f32 0.5, %v660_v35  ;;  %v617_v42 = vpop.f32.mrb[3].mxu0  ;;  %v662_v43 = vadd.f32 %v653_v37, %v574_v33 }
 0x140   : > { %v657_v44 = vpop.f32.mrb[2].mxu1  ;;  %v668_v45 = vmul.f32 0.5, %v661_v38  ;;  %v663_v48 = vadd.f32 %v655_v40, %v575_v47  ;;  %v701_v42 = vld [vmem:[%s699_s23 + $0x8] sm:$0xff] }
 0x141   : > { %v658_v46 = vpop.f32.mrb[3].mxu1  ;;  %1878 = vtanh.f32 %v664_v41  ;;  %v704_v47 = vunpack.c.l.bf16 %v701_v42  ;;  %v705_v29 = vunpack.c.h.bf16 %v701_v42 }
 0x142   : > { %1880 = vtanh.f32 %v668_v45  ;;  %v673_v49 = vmul.f32 0.5, %v663_v48 }
 0x143   : > { %1882 = vtanh.f32 %v662_v43 }
 0x144   : > { %1884 = vtanh.f32 %v673_v49 }
 0x14b   : > { %v1879_v50 = vpop.eup %1878 }
 0x14c   : > { %v1881_v51 = vpop.eup %1880  ;;  %v666_v52 = vmul.f32 0.5, %v1879_v50 }
 0x14d   : > { %v1883_v53 = vpop.eup %1882  ;;  %v670_v54 = vmul.f32 0.5, %v1881_v51 }
 0x14e   : > { %v667_v55 = vadd.f32 0.5, %v666_v52  ;;  %v1885_v34 = vpop.eup %1884 }
 0x14f   : > { %v671_v57 = vadd.f32 0.5, %v670_v54  ;;  %v675_v35 = vmul.f32 0.5, %v1885_v34 }
 0x150   : > { %v679_v30 = vmul.f32 %v1883_v53, %v667_v55 }
 0x151   : > { %v678_v31 = vmul.f32 %v677_v56, %v671_v57  ;;  %v676_v36 = vadd.f32 0.5, %v675_v35 }
 0x153   : > { %v680_v32 = vadd.f32 %v679_v30, %v678_v31 }
 0x155   : > { %1886 = vtanh.f32 %v680_v32  ;;  %v2418_v33 = vsel %vm684_vm0, %v680_v32, %v677_v56 }
 0x15f   : > { %v1887_v37 = vpop.eup %1886 }
 0x160   : > { %v682_v38 = vmul.f32 %v1887_v37, %v676_v36 }
 0x162   : > { %v2421_v39 = vsel %vm684_vm0, %v682_v38, %v2354_v25  ;;  %v700_v25 = vld [vmem:[%s699_s23] sm:$0xff]  ;;  %s820_s23 = sadd.s32 2, %s2406_s10 }
 0x163   : > { %v707_v40 = vpack.c.bf16 %v2421_v39, %v2421_v39  ;;  %v702_v41 = vunpack.c.l.bf16 %v700_v25  ;;  %v703_v43 = vunpack.c.h.bf16 %v700_v25  ;;  %v813_v25 = vstv %s696_s26  ;;  %s824_s11 = smul.u32 %s820_s23, %s2183_s30  ;;  %s956_s23 = ssub.s32 12, %s2406_s10 }
 0x164   : > { %vm814_vm1 = vcmp.gt.s32.totalorder %v2415_v28, %v813_v25  ;;  %s952_s26 = smul.u32 3, %s2183_s30 }
 0x165   : > { %741 = vmatmul.mubr.bf16.vlgmr.msra.gmra.mrb[4].mxu0 %v707_v40  ;;  %782 = vmatmul.mubr.bf16.vlgmr.msra.gmra.mrb[4].mxu1 %v707_v40  ;;  %s827_s21 = sadd.s32 %s826_s20, %s824_s11  ;;  %s957_s11 = smul.u32 %s2075_s16, %s956_s23 }
 0x166   : > { %840 = vmatpush1.bf16.msra.mxu0 %v2267_v59  ;;  %881 = vmatpush1.bf16.msra.mxu1 %v2274_v62  ;;  %s954_s6 = sadd.s32 %s1777_s27, %s952_s26  ;;  %s1780_s26 = sshll.u32 %s2183_s30, 2 }
 0x167   : > { %841 = vmatprep.subr.bf16.mxu0 %v2269_v60  ;;  %882 = vmatprep.subr.bf16.mxu1 %v2279_v0  ;;  %s1800_s5 = sshll.u32 %s954_s6, 4 }
 0x168   : > { %871 = vmatprep.mubr.bf16.mxu0 %v2090_v63  ;;  %912 = vmatprep.mubr.bf16.mxu1 %v2090_v63  ;;  %s961_s7 = scalar_lea.vmem %s2198_s22, %s1800_s5 }
 0x16a   : > { %842 = vmatpush1.bf16.msra.mxu0 %v2282_v1  ;;  %883 = vmatpush1.bf16.msra.mxu1 %v2288_v3 }
 0x16b   : > { %843 = vmatprep.subr.bf16.mxu0 %v2285_v2  ;;  %884 = vmatprep.subr.bf16.mxu1 %v2291_v4 }
 0x16e   : > { %844 = vmatpush1.bf16.msra.mxu0 %v2295_v5  ;;  %885 = vmatpush1.bf16.msra.mxu1 %v2301_v7 }
 0x16f   : > { %845 = vmatprep.subr.bf16.mxu0 %v2298_v6  ;;  %886 = vmatprep.subr.bf16.mxu1 %v2303_v8 }
 0x172   : > { %846 = vmatpush1.bf16.msra.mxu0 %v2307_v9  ;;  %887 = vmatpush1.bf16.msra.mxu1 %v2313_v11 }
 0x173   : > { %847 = vmatprep.subr.bf16.mxu0 %v2310_v10  ;;  %888 = vmatprep.subr.bf16.mxu1 %v2315_v12 }
 0x176   : > { %848 = vmatpush1.bf16.msra.mxu0 %v2319_v13  ;;  %889 = vmatpush1.bf16.msra.mxu1 %v2325_v15 }
 0x177   : > { %849 = vmatprep.subr.bf16.mxu0 %v2322_v14  ;;  %890 = vmatprep.subr.bf16.mxu1 %v2327_v16 }
 0x17a   : > { %850 = vmatpush1.bf16.msra.mxu0 %v2331_v17  ;;  %891 = vmatpush1.bf16.msra.mxu1 %v2337_v19 }
 0x17b   : > { %851 = vmatprep.subr.bf16.mxu0 %v2334_v18  ;;  %892 = vmatprep.subr.bf16.mxu1 %v2339_v20 }
 0x17e   : > { %852 = vmatpush1.bf16.msra.mxu0 %v2343_v21  ;;  %893 = vmatpush1.bf16.msra.mxu1 %v2349_v23 }
 0x17f   : > { %853 = vmatprep.subr.bf16.mxu0 %v2346_v22  ;;  %894 = vmatprep.subr.bf16.mxu1 %v2351_v24 }
 0x182   : > { %854 = vmatpush1.bf16.msra.mxu0 %v2357_v26  ;;  %895 = vmatpush1.bf16.msra.mxu1 %v2361_v27 }
 0x183   : > { %970 = vmatprep.subr.bf16.mxu0 %v2265_v58  ;;  %1011 = vmatprep.subr.bf16.mxu1 %v2272_v61 }
 0x238   : > { %v742_v44 = vpop.f32.mrb[4].mxu0  ;;  %v783_v45 = vpop.f32.mrb[4].mxu1 }
 0x239   : > { %v790_v46 = vadd.f32 %v742_v44, %v702_v41  ;;  %v744_v48 = vpop.f32.mrb[5].mxu0  ;;  %v785_v49 = vpop.f32.mrb[5].mxu1  ;;  %v792_v57 = vadd.f32 %v783_v45, %v704_v47 }
 0x23a   : > { %v791_v50 = vadd.f32 %v744_v48, %v703_v43  ;;  %v746_v51 = vpop.f32.mrb[6].mxu0  ;;  %v787_v52 = vpop.f32.mrb[6].mxu1  ;;  %v793_v30 = vadd.f32 %v785_v49, %v705_v29 }
 0x23b   : > { %v794_v53 = vmul.f32 0.5, %v790_v46  ;;  %v747_v54 = vpop.f32.mrb[7].mxu0  ;;  %v788_v55 = vpop.f32.mrb[7].mxu1  ;;  %v832_v52 = vld [vmem:[%s830_s8 + $0x8] sm:$0xff] }
 0x23c   : > { %v798_v56 = vmul.f32 0.5, %v791_v50  ;;  %v803_v31 = vmul.f32 0.5, %v793_v30  ;;  %v836_v25 = vunpack.c.h.bf16 %v832_v52 }
 0x23d   : > { %1888 = vtanh.f32 %v794_v53 }
 0x23e   : > { %1890 = vtanh.f32 %v798_v56 }
 0x23f   : > { %1892 = vtanh.f32 %v792_v57  ;;  %v835_v57 = vunpack.c.l.bf16 %v832_v52 }
 0x240   : > { %1894 = vtanh.f32 %v803_v31 }
 0x247   : > { %v1889_v32 = vpop.eup %1888 }
 0x248   : > { %v1891_v34 = vpop.eup %1890  ;;  %v796_v35 = vmul.f32 0.5, %v1889_v32 }
 0x249   : > { %v800_v36 = vmul.f32 0.5, %v1891_v34  ;;  %v1893_v38 = vpop.eup %1892 }
 0x24a   : > { %v797_v37 = vadd.f32 0.5, %v796_v35  ;;  %v1895_v45 = vpop.eup %1894 }
 0x24b   : > { %v801_v40 = vadd.f32 0.5, %v800_v36  ;;  %v805_v46 = vmul.f32 0.5, %v1895_v45 }
 0x24c   : > { %v809_v41 = vmul.f32 %v1893_v38, %v797_v37 }
 0x24d   : > { %v808_v42 = vmul.f32 %v801_v40, %v2418_v33  ;;  %v806_v47 = vadd.f32 0.5, %v805_v46 }
 0x24f   : > { %v810_v43 = vadd.f32 %v809_v41, %v808_v42 }
 0x251   : > { %1896 = vtanh.f32 %v810_v43  ;;  %v2469_v44 = vsel %vm814_vm1, %v810_v43, %v2418_v33  ;;  %v831_v33 = vld [vmem:[%s830_s8] sm:$0xff]  ;;  %s951_s8 = sadd.s32 3, %s2406_s10 }
 0x252   : > { %v834_v53 = vunpack.c.h.bf16 %v831_v33  ;;  %s955_s9 = smul.u32 %s951_s8, %s2183_s30  ;;  %s1087_s8 = ssub.s32 11, %s2406_s10 }
 0x254   : > { %s958_s20 = sadd.s32 %s957_s11, %s955_s9  ;;  %s1088_s9 = smul.u32 %s2075_s16, %s1087_s8 }
 0x25b   : > { %v1897_v48 = vpop.eup %1896 }
 0x25c   : > { %v812_v49 = vmul.f32 %v1897_v48, %v806_v47 }
 0x25e   : > { %v2472_v50 = vsel %vm814_vm1, %v812_v49, %v2421_v39  ;;  %v833_v39 = vunpack.c.l.bf16 %v831_v33  ;;  %v944_v33 = vstv %s827_s21  ;;  %s1084_s21 = smul.u32 3, %s2075_s16 }
 0x25f   : > { %v838_v51 = vpack.c.bf16 %v2472_v50, %v2472_v50  ;;  %vm945_vm2 = vcmp.gt.s32.totalorder %v2415_v28, %v944_v33 }
 0x260   : > { %s1085_s27 = sadd.s32 %s1780_s26, %s1084_s21  ;;  %s1783_s21 = sshll.u32 %s2075_s16, 1 }
 0x261   : > { %872 = vmatmul.mubr.bf16.vlgmr.msra.gmra.mrb[8].mxu0 %v838_v51  ;;  %913 = vmatmul.mubr.bf16.vlgmr.msra.gmra.mrb[8].mxu1 %v838_v51  ;;  %s1801_s6 = sshll.u32 %s1085_s27, 4 }
 0x262   : > { %971 = vmatpush1.bf16.msra.mxu0 %v2267_v59  ;;  %1012 = vmatpush1.bf16.msra.mxu1 %v2274_v62  ;;  %s1092_s5 = scalar_lea.vmem %s2198_s22, %s1801_s6 }
 0x263   : > { %972 = vmatprep.subr.bf16.mxu0 %v2269_v60  ;;  %1013 = vmatprep.subr.bf16.mxu1 %v2279_v0 }
 0x264   : > { %1002 = vmatprep.mubr.bf16.mxu0 %v2090_v63  ;;  %1043 = vmatprep.mubr.bf16.mxu1 %v2090_v63 }
 0x266   : > { %973 = vmatpush1.bf16.msra.mxu0 %v2282_v1  ;;  %1014 = vmatpush1.bf16.msra.mxu1 %v2288_v3 }
 0x267   : > { %974 = vmatprep.subr.bf16.mxu0 %v2285_v2  ;;  %1015 = vmatprep.subr.bf16.mxu1 %v2291_v4 }
 0x26a   : > { %975 = vmatpush1.bf16.msra.mxu0 %v2295_v5  ;;  %1016 = vmatpush1.bf16.msra.mxu1 %v2301_v7 }
 0x26b   : > { %976 = vmatprep.subr.bf16.mxu0 %v2298_v6  ;;  %1017 = vmatprep.subr.bf16.mxu1 %v2303_v8 }
 0x26e   : > { %977 = vmatpush1.bf16.msra.mxu0 %v2307_v9  ;;  %1018 = vmatpush1.bf16.msra.mxu1 %v2313_v11 }
 0x26f   : > { %978 = vmatprep.subr.bf16.mxu0 %v2310_v10  ;;  %1019 = vmatprep.subr.bf16.mxu1 %v2315_v12 }
 0x272   : > { %979 = vmatpush1.bf16.msra.mxu0 %v2319_v13  ;;  %1020 = vmatpush1.bf16.msra.mxu1 %v2325_v15 }
 0x273   : > { %980 = vmatprep.subr.bf16.mxu0 %v2322_v14  ;;  %1021 = vmatprep.subr.bf16.mxu1 %v2327_v16 }
 0x276   : > { %981 = vmatpush1.bf16.msra.mxu0 %v2331_v17  ;;  %1022 = vmatpush1.bf16.msra.mxu1 %v2337_v19 }
 0x277   : > { %982 = vmatprep.subr.bf16.mxu0 %v2334_v18  ;;  %1023 = vmatprep.subr.bf16.mxu1 %v2339_v20 }
 0x27a   : > { %983 = vmatpush1.bf16.msra.mxu0 %v2343_v21  ;;  %1024 = vmatpush1.bf16.msra.mxu1 %v2349_v23 }
 0x27b   : > { %984 = vmatprep.subr.bf16.mxu0 %v2346_v22  ;;  %1025 = vmatprep.subr.bf16.mxu1 %v2351_v24 }
 0x27e   : > { %985 = vmatpush1.bf16.msra.mxu0 %v2357_v26  ;;  %1026 = vmatpush1.bf16.msra.mxu1 %v2361_v27 }
 0x27f   : > { %1101 = vmatprep.subr.bf16.mxu0 %v2265_v58  ;;  %1142 = vmatprep.subr.bf16.mxu1 %v2272_v61 }
 0x334   : > { %v873_v54 = vpop.f32.mrb[8].mxu0  ;;  %v914_v55 = vpop.f32.mrb[8].mxu1 }
 0x335   : > { %v921_v56 = vadd.f32 %v873_v54, %v833_v39  ;;  %v875_v29 = vpop.f32.mrb[9].mxu0  ;;  %v916_v30 = vpop.f32.mrb[9].mxu1  ;;  %v923_v40 = vadd.f32 %v914_v55, %v835_v57 }
 0x336   : > { %v922_v31 = vadd.f32 %v875_v29, %v834_v53  ;;  %v877_v32 = vpop.f32.mrb[10].mxu0  ;;  %v918_v34 = vpop.f32.mrb[10].mxu1  ;;  %v924_v41 = vadd.f32 %v916_v30, %v836_v25 }
 0x337   : > { %v925_v35 = vmul.f32 0.5, %v921_v56  ;;  %v878_v36 = vpop.f32.mrb[11].mxu0  ;;  %v919_v37 = vpop.f32.mrb[11].mxu1  ;;  %v963_v34 = vld [vmem:[%s961_s7 + $0x8] sm:$0xff] }
 0x338   : > { %v929_v38 = vmul.f32 0.5, %v922_v31  ;;  %v934_v42 = vmul.f32 0.5, %v924_v41  ;;  %v967_v33 = vunpack.c.h.bf16 %v963_v34 }
 0x339   : > { %1898 = vtanh.f32 %v925_v35 }
 0x33a   : > { %1900 = vtanh.f32 %v929_v38 }
 0x33b   : > { %1902 = vtanh.f32 %v923_v40  ;;  %v966_v40 = vunpack.c.l.bf16 %v963_v34 }
 0x33c   : > { %1904 = vtanh.f32 %v934_v42 }
 0x343   : > { %v1899_v43 = vpop.eup %1898 }
 0x344   : > { %v1901_v45 = vpop.eup %1900  ;;  %v927_v46 = vmul.f32 0.5, %v1899_v43 }
 0x345   : > { %v931_v47 = vmul.f32 0.5, %v1901_v45  ;;  %v1903_v49 = vpop.eup %1902 }
 0x346   : > { %v928_v48 = vadd.f32 0.5, %v927_v46  ;;  %v1905_v55 = vpop.eup %1904 }
 0x347   : > { %v932_v51 = vadd.f32 0.5, %v931_v47  ;;  %v936_v56 = vmul.f32 0.5, %v1905_v55 }
 0x348   : > { %v940_v39 = vmul.f32 %v1903_v49, %v928_v48 }
 0x349   : > { %v939_v52 = vmul.f32 %v932_v51, %v2469_v44  ;;  %v937_v57 = vadd.f32 0.5, %v936_v56 }
 0x34b   : > { %v941_v53 = vadd.f32 %v940_v39, %v939_v52 }
 0x34d   : > { %1906 = vtanh.f32 %v941_v53  ;;  %v2520_v54 = vsel %vm945_vm2, %v941_v53, %v2469_v44  ;;  %v962_v44 = vld [vmem:[%s961_s7] sm:$0xff]  ;;  %s1082_s7 = sadd.s32 4, %s2406_s10 }
 0x34e   : > { %v965_v35 = vunpack.c.h.bf16 %v962_v44  ;;  %s1086_s23 = smul.u32 %s1082_s7, %s2183_s30  ;;  %s1218_s7 = ssub.s32 10, %s2406_s10 }
 0x350   : > { %s1089_s11 = sadd.s32 %s1088_s9, %s1086_s23  ;;  %s1219_s23 = smul.u32 %s2075_s16, %s1218_s7 }
 0x357   : > { %v1907_v29 = vpop.eup %1906 }
 0x358   : > { %v943_v30 = vmul.f32 %v1907_v29, %v937_v57 }
 0x35a   : > { %v2523_v31 = vsel %vm945_vm2, %v943_v30, %v2472_v50  ;;  %v964_v50 = vunpack.c.l.bf16 %v962_v44  ;;  %v1075_v44 = vstv %s958_s20  ;;  %s1214_s20 = smul.u32 5, %s2183_s30 }
 0x35b   : > { %v969_v32 = vpack.c.bf16 %v2523_v31, %v2523_v31  ;;  %vm1076_vm3 = vcmp.gt.s32.totalorder %v2415_v28, %v1075_v44 }
 0x35c   : > { %s1216_s26 = sadd.s32 %s1783_s21, %s1214_s20 }
 0x35d   : > { %1003 = vmatmul.mubr.bf16.vlgmr.msra.gmra.mrb[12].mxu0 %v969_v32  ;;  %1044 = vmatmul.mubr.bf16.vlgmr.msra.gmra.mrb[12].mxu1 %v969_v32  ;;  %s1802_s27 = sshll.u32 %s1216_s26, 4 }
 0x35e   : > { %1102 = vmatpush1.bf16.msra.mxu0 %v2267_v59  ;;  %1143 = vmatpush1.bf16.msra.mxu1 %v2274_v62  ;;  %s1223_s6 = scalar_lea.vmem %s2198_s22, %s1802_s27  ;;  %s1344_s27 = sadd.s32 6, %s2406_s10 }
 0x35f   : > { %1103 = vmatprep.subr.bf16.mxu0 %v2269_v60  ;;  %1144 = vmatprep.subr.bf16.mxu1 %v2279_v0 }
 0x360   : > { %1133 = vmatprep.mubr.bf16.mxu0 %v2090_v63  ;;  %1174 = vmatprep.mubr.bf16.mxu1 %v2090_v63 }
 0x362   : > { %1104 = vmatpush1.bf16.msra.mxu0 %v2282_v1  ;;  %1145 = vmatpush1.bf16.msra.mxu1 %v2288_v3 }
 0x363   : > { %1105 = vmatprep.subr.bf16.mxu0 %v2285_v2  ;;  %1146 = vmatprep.subr.bf16.mxu1 %v2291_v4 }
 0x366   : > { %1106 = vmatpush1.bf16.msra.mxu0 %v2295_v5  ;;  %1147 = vmatpush1.bf16.msra.mxu1 %v2301_v7 }
 0x367   : > { %1107 = vmatprep.subr.bf16.mxu0 %v2298_v6  ;;  %1148 = vmatprep.subr.bf16.mxu1 %v2303_v8 }
 0x36a   : > { %1108 = vmatpush1.bf16.msra.mxu0 %v2307_v9  ;;  %1149 = vmatpush1.bf16.msra.mxu1 %v2313_v11 }
 0x36b   : > { %1109 = vmatprep.subr.bf16.mxu0 %v2310_v10  ;;  %1150 = vmatprep.subr.bf16.mxu1 %v2315_v12 }
 0x36e   : > { %1110 = vmatpush1.bf16.msra.mxu0 %v2319_v13  ;;  %1151 = vmatpush1.bf16.msra.mxu1 %v2325_v15 }
 0x36f   : > { %1111 = vmatprep.subr.bf16.mxu0 %v2322_v14  ;;  %1152 = vmatprep.subr.bf16.mxu1 %v2327_v16 }
 0x372   : > { %1112 = vmatpush1.bf16.msra.mxu0 %v2331_v17  ;;  %1153 = vmatpush1.bf16.msra.mxu1 %v2337_v19 }
 0x373   : > { %1113 = vmatprep.subr.bf16.mxu0 %v2334_v18  ;;  %1154 = vmatprep.subr.bf16.mxu1 %v2339_v20 }
 0x376   : > { %1114 = vmatpush1.bf16.msra.mxu0 %v2343_v21  ;;  %1155 = vmatpush1.bf16.msra.mxu1 %v2349_v23 }
 0x377   : > { %1115 = vmatprep.subr.bf16.mxu0 %v2346_v22  ;;  %1156 = vmatprep.subr.bf16.mxu1 %v2351_v24 }
 0x37a   : > { %1116 = vmatpush1.bf16.msra.mxu0 %v2357_v26  ;;  %1157 = vmatpush1.bf16.msra.mxu1 %v2361_v27 }
 0x37b   : > { %1232 = vmatprep.subr.bf16.mxu0 %v2265_v58  ;;  %1273 = vmatprep.subr.bf16.mxu1 %v2272_v61 }
 0x430   : > { %v1004_v36 = vpop.f32.mrb[12].mxu0  ;;  %v1045_v37 = vpop.f32.mrb[12].mxu1 }
 0x431   : > { %v1052_v38 = vadd.f32 %v1004_v36, %v964_v50  ;;  %v1006_v25 = vpop.f32.mrb[13].mxu0  ;;  %v1047_v41 = vpop.f32.mrb[13].mxu1  ;;  %v1054_v51 = vadd.f32 %v1045_v37, %v966_v40 }
 0x432   : > { %v1053_v42 = vadd.f32 %v1006_v25, %v965_v35  ;;  %v1008_v43 = vpop.f32.mrb[14].mxu0  ;;  %v1049_v45 = vpop.f32.mrb[14].mxu1  ;;  %v1055_v39 = vadd.f32 %v1047_v41, %v967_v33  ;;  %v1206_v33 = vstv %s1089_s11  ;;  %s1345_s11 = smul.u32 6, %s2183_s30 }
 0x433   : > { %v1056_v46 = vmul.f32 0.5, %v1052_v38  ;;  %v1009_v47 = vpop.f32.mrb[15].mxu0  ;;  %v1050_v48 = vpop.f32.mrb[15].mxu1  ;;  %vm1207_vm4 = vcmp.gt.s32.totalorder %v2415_v28, %v1206_v33 }
 0x434   : > { %v1060_v49 = vmul.f32 0.5, %v1053_v42  ;;  %v1065_v52 = vmul.f32 0.5, %v1055_v39  ;;  %s1346_s20 = sadd.s32 %s2075_s16, %s1345_s11  ;;  %s1804_s11 = smul.u32 112, %s2183_s30 }
 0x435   : > { %1908 = vtanh.f32 %v1056_v46  ;;  %s1803_s21 = sshll.u32 %s1346_s20, 4 }
 0x436   : > { %1910 = vtanh.f32 %v1060_v49  ;;  %s1353_s26 = scalar_lea.vmem %s2198_s22, %s1803_s21  ;;  %s1482_s20 = scalar_lea.vmem %s2198_s22, %s1804_s11 }
 0x437   : > { %1912 = vtanh.f32 %v1054_v51  ;;  %s1474_s22 = sadd.s32 7, %s2406_s10  ;;  %s1477_s21 = ssub.s32 8, %s2406_s10 }
 0x438   : > { %1914 = vtanh.f32 %v1065_v52 }
 0x43f   : > { %v1909_v53 = vpop.eup %1908 }
 0x440   : > { %v1911_v55 = vpop.eup %1910  ;;  %v1058_v56 = vmul.f32 0.5, %v1909_v53 }
 0x441   : > { %v1062_v57 = vmul.f32 0.5, %v1911_v55  ;;  %v1913_v30 = vpop.eup %1912 }
 0x442   : > { %v1059_v29 = vadd.f32 0.5, %v1058_v56  ;;  %v1915_v37 = vpop.eup %1914 }
 0x443   : > { %v1063_v32 = vadd.f32 0.5, %v1062_v57  ;;  %v1067_v38 = vmul.f32 0.5, %v1915_v37  ;;  %v2638_v37 = vld [vmem:[#allocation2 + $0x38] sm:$0xff] }
 0x444   : > { %v1071_v50 = vmul.f32 %v1913_v30, %v1059_v29 }
 0x445   : > { %v1070_v34 = vmul.f32 %v1063_v32, %v2520_v54  ;;  %v1068_v40 = vadd.f32 0.5, %v1067_v38  ;;  %v2643_v38 = vld [vmem:[#allocation2 + $0x20] sm:$0xff] }
 0x447   : > { %v1072_v35 = vadd.f32 %v1071_v50, %v1070_v34  ;;  %v2629_v34 = vld [vmem:[#allocation2] sm:$0xff] }
 0x449   : > { %1916 = vtanh.f32 %v1072_v35  ;;  %v2571_v36 = vsel %vm1076_vm3, %v1072_v35, %v2520_v54  ;;  %v2632_v35 = vld [vmem:[#allocation2 + $0x10] sm:$0xff] }
 0x453   : > { %v1917_v25 = vpop.eup %1916 }
 0x454   : > { %v1074_v41 = vmul.f32 %v1917_v25, %v1068_v40  ;;  %v2646_v40 = vld [vmem:[#allocation2 + $0x30] sm:$0xff]  ;;  %v2649_v25 = vld [vmem:[#allocation2 + $0x48] sm:$0xff] }
 0x456   : > { %v2574_v42 = vsel %vm1076_vm3, %v1074_v41, %v2523_v31  ;;  %v2652_v41 = vld [vmem:[#allocation2 + $0x58] sm:$0xff] }
 0x457   : > { %v1100_v43 = vpack.c.bf16 %v2574_v42, %v2574_v42 }
 0x459   : > { %1134 = vmatmul.mubr.bf16.vlgmr.msra.gmra.mrb[16].mxu0 %v1100_v43  ;;  %1175 = vmatmul.mubr.bf16.vlgmr.msra.gmra.mrb[16].mxu1 %v1100_v43  ;;  %v2658_v43 = vld [vmem:[#allocation2 + $0x50] sm:$0xff] }
 0x45a   : > { %1233 = vmatpush1.bf16.msra.mxu0 %v2267_v59  ;;  %1274 = vmatpush1.bf16.msra.mxu1 %v2274_v62  ;;  %v1093_v59 = vld [vmem:[%s1092_s5] sm:$0xff]  ;;  %v1094_v62 = vld [vmem:[%s1092_s5 + $0x8] sm:$0xff]  ;;  %s1213_s5 = sadd.s32 5, %s2406_s10 }
 0x45b   : > { %1234 = vmatprep.subr.bf16.mxu0 %v2269_v60  ;;  %1275 = vmatprep.subr.bf16.mxu1 %v2279_v0  ;;  %v1095_v60 = vunpack.c.l.bf16 %v1093_v59  ;;  %v1096_v0 = vunpack.c.h.bf16 %v1093_v59  ;;  %v2661_v59 = vld [vmem:[#allocation2 + $0x68] sm:$0xff]  ;;  %s1217_s8 = smul.u32 %s1213_s5, %s2183_s30 }
 0x45c   : > { %1264 = vmatprep.mubr.bf16.mxu0 %v2090_v63  ;;  %1305 = vmatprep.mubr.bf16.mxu1 %v2090_v63  ;;  %s1347_s5 = smul.u32 %s1344_s27, %s2183_s30 }
 0x45d   : > { %s1220_s9 = sadd.s32 %s1219_s23, %s1217_s8  ;;  %s1478_s27 = smul.u32 %s2075_s16, %s1477_s21 }
 0x45e   : > { %1235 = vmatpush1.bf16.msra.mxu0 %v2282_v1  ;;  %1276 = vmatpush1.bf16.msra.mxu1 %v2288_v3 }
 0x45f   : > { %1236 = vmatprep.subr.bf16.mxu0 %v2285_v2  ;;  %1277 = vmatprep.subr.bf16.mxu1 %v2291_v4  ;;  %v1097_v4 = vunpack.c.l.bf16 %v1094_v62 }
 0x462   : > { %1237 = vmatpush1.bf16.msra.mxu0 %v2295_v5  ;;  %1278 = vmatpush1.bf16.msra.mxu1 %v2301_v7 }
 0x463   : > { %1238 = vmatprep.subr.bf16.mxu0 %v2298_v6  ;;  %1279 = vmatprep.subr.bf16.mxu1 %v2303_v8 }
 0x466   : > { %1239 = vmatpush1.bf16.msra.mxu0 %v2307_v9  ;;  %1280 = vmatpush1.bf16.msra.mxu1 %v2313_v11 }
 0x467   : > { %1240 = vmatprep.subr.bf16.mxu0 %v2310_v10  ;;  %1281 = vmatprep.subr.bf16.mxu1 %v2315_v12 }
 0x46a   : > { %1241 = vmatpush1.bf16.msra.mxu0 %v2319_v13  ;;  %1282 = vmatpush1.bf16.msra.mxu1 %v2325_v15  ;;  %v1098_v13 = vunpack.c.h.bf16 %v1094_v62  ;;  %v2667_v62 = vld [vmem:[#allocation2 + $0x60] sm:$0xff] }
 0x46b   : > { %1242 = vmatprep.subr.bf16.mxu0 %v2322_v14  ;;  %1283 = vmatprep.subr.bf16.mxu1 %v2327_v16 }
 0x46e   : > { %1243 = vmatpush1.bf16.msra.mxu0 %v2331_v17  ;;  %1284 = vmatpush1.bf16.msra.mxu1 %v2337_v19 }
 0x46f   : > { %1244 = vmatprep.subr.bf16.mxu0 %v2334_v18  ;;  %1285 = vmatprep.subr.bf16.mxu1 %v2339_v20 }
 0x472   : > { %1245 = vmatpush1.bf16.msra.mxu0 %v2343_v21  ;;  %1286 = vmatpush1.bf16.msra.mxu1 %v2349_v23 }
 0x473   : > { %1246 = vmatprep.subr.bf16.mxu0 %v2346_v22  ;;  %1287 = vmatprep.subr.bf16.mxu1 %v2351_v24 }
 0x476   : > { %1247 = vmatpush1.bf16.msra.mxu0 %v2357_v26  ;;  %1288 = vmatpush1.bf16.msra.mxu1 %v2361_v27 }
 0x477   : > { %1362 = vmatprep.subr.bf16.mxu0 %v2265_v58  ;;  %1403 = vmatprep.subr.bf16.mxu1 %v2272_v61 }
 0x52c   : > { %v1135_v1 = vpop.f32.mrb[16].mxu0  ;;  %v1176_v2 = vpop.f32.mrb[16].mxu1 }
 0x52d   : > { %v1183_v3 = vadd.f32 %v1135_v1, %v1095_v60  ;;  %v1137_v5 = vpop.f32.mrb[17].mxu0  ;;  %v1178_v6 = vpop.f32.mrb[17].mxu1  ;;  %v1185_v12 = vadd.f32 %v1176_v2, %v1097_v4  ;;  %v2664_v60 = vld [vmem:[#allocation2 + $0x78] sm:$0xff]  ;;  %v2673_v1 = vld [vmem:[#allocation2 + $0x88] sm:$0xff] }
 0x52e   : > { %v1184_v58 = vadd.f32 %v1137_v5, %v1096_v0  ;;  %v1139_v61 = vpop.f32.mrb[18].mxu0  ;;  %v1180_v7 = vpop.f32.mrb[18].mxu1  ;;  %v1186_v14 = vadd.f32 %v1178_v6, %v1098_v13  ;;  %v2670_v0 = vld [vmem:[#allocation2 + $0x70] sm:$0xff]  ;;  %v2676_v2 = vld [vmem:[#allocation2 + $0x98] sm:$0xff]  ;;  %v2683_v4 = vld [vmem:[#allocation2 + $0xa8] sm:$0xff] }
 0x52f   : > { %v1187_v8 = vmul.f32 0.5, %v1183_v3  ;;  %v1140_v9 = vpop.f32.mrb[19].mxu0  ;;  %v1181_v10 = vpop.f32.mrb[19].mxu1  ;;  %v2679_v3 = vld [vmem:[#allocation2 + $0x80] sm:$0xff] }
 0x530   : > { %v1191_v11 = vmul.f32 0.5, %v1184_v58  ;;  %v1196_v54 = vmul.f32 0.5, %v1186_v14 }
 0x531   : > { %1918 = vtanh.f32 %v1187_v8 }
 0x532   : > { %1920 = vtanh.f32 %v1191_v11 }
 0x533   : > { %1922 = vtanh.f32 %v1185_v12 }
 0x534   : > { %1924 = vtanh.f32 %v1196_v54 }
 0x53b   : > { %v1919_v31 = vpop.eup %1918 }
 0x53c   : > { %v1921_v45 = vpop.eup %1920  ;;  %v1189_v46 = vmul.f32 0.5, %v1919_v31 }
 0x53d   : > { %v1193_v47 = vmul.f32 0.5, %v1921_v45  ;;  %v1923_v49 = vpop.eup %1922 }
 0x53e   : > { %v1190_v48 = vadd.f32 0.5, %v1189_v46  ;;  %v1925_v56 = vpop.eup %1924 }
 0x53f   : > { %v1194_v51 = vadd.f32 0.5, %v1193_v47  ;;  %v1198_v57 = vmul.f32 0.5, %v1925_v56 }
 0x540   : > { %v1202_v39 = vmul.f32 %v1923_v49, %v1190_v48  ;;  %v1337_v49 = vstv %s1220_s9 }
 0x541   : > { %v1201_v52 = vmul.f32 %v1194_v51, %v2571_v36  ;;  %v1199_v29 = vadd.f32 0.5, %v1198_v57  ;;  %vm1338_vm5 = vcmp.gt.s32.totalorder %v2415_v28, %v1337_v49  ;;  %v1979_v28 = vld [vmem:[#allocation2 + $0xb8] sm:$0xff] }
 0x543   : > { %v1203_v53 = vadd.f32 %v1202_v39, %v1201_v52 }
 0x545   : > { %1926 = vtanh.f32 %v1203_v53  ;;  %v2622_v55 = vsel %vm1207_vm4, %v1203_v53, %v2571_v36  ;;  %v2635_v36 = vld [vmem:[#allocation2 + $0x28] sm:$0xff] }
 0x54f   : > { %v1927_v30 = vpop.eup %1926 }
 0x550   : > { %v1205_v32 = vmul.f32 %v1927_v30, %v1199_v29 }
 0x552   : > { %v2625_v44 = vsel %vm1207_vm4, %v1205_v32, %v2574_v42  ;;  %v2655_v42 = vld [vmem:[#allocation2 + $0x40] sm:$0xff] }
 0x553   : > { %v1231_v50 = vpack.c.bf16 %v2625_v44, %v2625_v44 }
 0x555   : > { %1265 = vmatmul.mubr.bf16.vlgmr.msra.gmra.mrb[20].mxu0 %v1231_v50  ;;  %1306 = vmatmul.mubr.bf16.vlgmr.msra.gmra.mrb[20].mxu1 %v1231_v50 }
 0x556   : > { %1363 = vmatpush1.bf16.msra.mxu0 %v2629_v34  ;;  %1404 = vmatpush1.bf16.msra.mxu1 %v2632_v35 }
 0x557   : > { %1364 = vmatprep.subr.bf16.mxu0 %v2635_v36  ;;  %1405 = vmatprep.subr.bf16.mxu1 %v2638_v37 }
 0x558   : > { %1394 = vmatprep.mubr.bf16.mxu0 %v2090_v63  ;;  %1435 = vmatprep.mubr.bf16.mxu1 %v2090_v63 }
 0x55a   : > { %1365 = vmatpush1.bf16.msra.mxu0 %v2643_v38  ;;  %1406 = vmatpush1.bf16.msra.mxu1 %v2646_v40 }
 0x55b   : > { %1366 = vmatprep.subr.bf16.mxu0 %v2649_v25  ;;  %1407 = vmatprep.subr.bf16.mxu1 %v2652_v41 }
 0x55e   : > { %1367 = vmatpush1.bf16.msra.mxu0 %v2655_v42  ;;  %1408 = vmatpush1.bf16.msra.mxu1 %v2658_v43 }
 0x55f   : > { %1368 = vmatprep.subr.bf16.mxu0 %v2661_v59  ;;  %1409 = vmatprep.subr.bf16.mxu1 %v2664_v60 }
 0x562   : > { %1369 = vmatpush1.bf16.msra.mxu0 %v2667_v62  ;;  %1410 = vmatpush1.bf16.msra.mxu1 %v2670_v0 }
 0x563   : > { %1370 = vmatprep.subr.bf16.mxu0 %v2673_v1  ;;  %1411 = vmatprep.subr.bf16.mxu1 %v2676_v2 }
 0x566   : > { %1371 = vmatpush1.bf16.msra.mxu0 %v2679_v3  ;;  %1412 = vmatpush1.bf16.msra.mxu1 %v2325_v15  ;;  %v1976_v15 = vld [vmem:[#allocation2 + $0x8] sm:$0xff] }
 0x567   : > { %1372 = vmatprep.subr.bf16.mxu0 %v2683_v4  ;;  %1413 = vmatprep.subr.bf16.mxu1 %v2327_v16  ;;  %v1977_v16 = vld [vmem:[#allocation2 + $0x18] sm:$0xff] }
 0x56a   : > { %1373 = vmatpush1.bf16.msra.mxu0 %v2331_v17  ;;  %1414 = vmatpush1.bf16.msra.mxu1 %v2337_v19  ;;  %v1224_v17 = vld [vmem:[%s1223_s6] sm:$0xff]  ;;  %v1225_v19 = vld [vmem:[%s1223_s6 + $0x8] sm:$0xff]  ;;  %s1348_s6 = ssub.s32 9, %s2406_s10 }
 0x56b   : > { %1374 = vmatprep.subr.bf16.mxu0 %v2334_v18  ;;  %1415 = vmatprep.subr.bf16.mxu1 %v2339_v20  ;;  %v1226_v18 = vunpack.c.l.bf16 %v1224_v17  ;;  %v1227_v20 = vunpack.c.h.bf16 %v1224_v17  ;;  %v1229_v11 = vunpack.c.h.bf16 %v1225_v19  ;;  %s1349_s7 = smul.u32 %s2075_s16, %s1348_s6 }
 0x56d   : > { %s1350_s8 = sadd.s32 %s1349_s7, %s1347_s5 }
 0x56e   : > { %1375 = vmatpush1.bf16.msra.mxu0 %v2343_v21  ;;  %1416 = vmatpush1.bf16.msra.mxu1 %v2349_v23 }
 0x56f   : > { %1376 = vmatprep.subr.bf16.mxu0 %v2346_v22  ;;  %1417 = vmatprep.subr.bf16.mxu1 %v2351_v24  ;;  %v1228_v24 = vunpack.c.l.bf16 %v1225_v19 }
 0x572   : > { %1377 = vmatpush1.bf16.msra.mxu0 %v2357_v26  ;;  %1418 = vmatpush1.bf16.msra.mxu1 %v2361_v27 }
 0x573   : > { %1491 = vmatprep.subr.bf16.mxu0 %v1976_v15  ;;  %1532 = vmatprep.subr.bf16.mxu1 %v1977_v16 }
 0x628   : > { %v1266_v21 = vpop.f32.mrb[20].mxu0  ;;  %v1307_v22 = vpop.f32.mrb[20].mxu1 }
 0x629   : > { %v1314_v23 = vadd.f32 %v1266_v21, %v1226_v18  ;;  %v1268_v26 = vpop.f32.mrb[21].mxu0  ;;  %v1309_v27 = vpop.f32.mrb[21].mxu1  ;;  %v1316_v10 = vadd.f32 %v1307_v22, %v1228_v24 }
 0x62a   : > { %v1315_v5 = vadd.f32 %v1268_v26, %v1227_v20  ;;  %v1270_v6 = vpop.f32.mrb[22].mxu0  ;;  %v1311_v58 = vpop.f32.mrb[22].mxu1  ;;  %v1317_v12 = vadd.f32 %v1309_v27, %v1229_v11 }
 0x62b   : > { %v1318_v61 = vmul.f32 0.5, %v1314_v23  ;;  %v1271_v7 = vpop.f32.mrb[23].mxu0  ;;  %v1312_v8 = vpop.f32.mrb[23].mxu1 }
 0x62c   : > { %v1322_v9 = vmul.f32 0.5, %v1315_v5  ;;  %v1327_v13 = vmul.f32 0.5, %v1317_v12  ;;  %v2745_v12 = vld [vmem:[%s2815_s0] sm:$0xff] }
 0x62d   : > { %1928 = vtanh.f32 %v1318_v61 }
 0x62e   : > { %1930 = vtanh.f32 %v1322_v9  ;;  %v1467_v9 = vstv %s1350_s8 }
 0x62f   : > { %1932 = vtanh.f32 %v1316_v10  ;;  %vm1468_vm6 = vcmp.gt.s32.totalorder %v2745_v12, %v1467_v9 }
 0x630   : > { %1934 = vtanh.f32 %v1327_v13 }
 0x637   : > { %v1929_v14 = vpop.eup %1928 }
 0x638   : > { %v1931_v54 = vpop.eup %1930  ;;  %v1320_v31 = vmul.f32 0.5, %v1929_v14 }
 0x639   : > { %v1324_v45 = vmul.f32 0.5, %v1931_v54  ;;  %v1933_v47 = vpop.eup %1932 }
 0x63a   : > { %v1321_v46 = vadd.f32 0.5, %v1320_v31  ;;  %v1935_v53 = vpop.eup %1934 }
 0x63b   : > { %v1325_v48 = vadd.f32 0.5, %v1324_v45  ;;  %v1329_v56 = vmul.f32 0.5, %v1935_v53 }
 0x63c   : > { %v1333_v51 = vmul.f32 %v1933_v47, %v1321_v46 }
 0x63d   : > { %v1332_v33 = vmul.f32 %v1325_v48, %v2622_v55  ;;  %v1330_v57 = vadd.f32 0.5, %v1329_v56 }
 0x63f   : > { %v1334_v39 = vadd.f32 %v1333_v51, %v1332_v33  ;;  %v1483_v51 = vld [vmem:[%s1482_s20] sm:$0xff] }
 0x640   : > { %v1485_v33 = vunpack.c.l.bf16 %v1483_v51  ;;  %v1486_v53 = vunpack.c.h.bf16 %v1483_v51 }
 0x641   : > { %1936 = vtanh.f32 %v1334_v39  ;;  %v2707_v52 = vsel %vm1338_vm5, %v1334_v39, %v2622_v55  ;;  %v1980_v55 = vld [vmem:[#allocation2 + $0xa0] sm:$0xff]  ;;  %v1484_v39 = vld [vmem:[%s1482_s20 + $0x8] sm:$0xff] }
 0x64b   : > { %v1937_v29 = vpop.eup %1936 }
 0x64c   : > { %v1336_v30 = vmul.f32 %v1937_v29, %v1330_v57  ;;  %v1487_v29 = vunpack.c.l.bf16 %v1484_v39 }
 0x64e   : > { %v2710_v32 = vsel %vm1338_vm5, %v1336_v30, %v2625_v44  ;;  %v1981_v44 = vld [vmem:[#allocation2 + $0xb0] sm:$0xff] }
 0x64f   : > { %v1361_v50 = vpack.c.bf16 %v2710_v32, %v2710_v32 }
 0x651   : > { %1395 = vmatmul.mubr.bf16.vlgmr.msra.gmra.mrb[24].mxu0 %v1361_v50  ;;  %1436 = vmatmul.mubr.bf16.vlgmr.msra.gmra.mrb[24].mxu1 %v1361_v50 }
 0x652   : > { %1492 = vmatpush1.bf16.msra.mxu0 %v2629_v34  ;;  %1533 = vmatpush1.bf16.msra.mxu1 %v2632_v35  ;;  %v1982_v34 = vld [vmem:[#allocation2 + $0xc8] sm:$0xff]  ;;  %v1983_v35 = vld [vmem:[#allocation2 + $0xd8] sm:$0xff] }
 0x653   : > { %1493 = vmatprep.subr.bf16.mxu0 %v2635_v36  ;;  %1534 = vmatprep.subr.bf16.mxu1 %v2638_v37  ;;  %v1984_v36 = vld [vmem:[#allocation2 + $0xc0] sm:$0xff]  ;;  %v1985_v37 = vld [vmem:[#allocation2 + $0xd0] sm:$0xff] }
 0x654   : > { %1523 = vmatprep.mubr.bf16.mxu0 %v2090_v63  ;;  %1564 = vmatprep.mubr.bf16.mxu1 %v2090_v63  ;;  %v1978_v63 = vld [vmem:[#allocation2 + $0x90] sm:$0xff] }
 0x656   : > { %1494 = vmatpush1.bf16.msra.mxu0 %v2643_v38  ;;  %1535 = vmatpush1.bf16.msra.mxu1 %v2646_v40  ;;  %v1986_v38 = vld [vmem:[#allocation2 + $0xe8] sm:$0xff]  ;;  %v1987_v40 = vld [vmem:[#allocation2 + $0xf8] sm:$0xff] }
 0x657   : > { %1495 = vmatprep.subr.bf16.mxu0 %v2649_v25  ;;  %1536 = vmatprep.subr.bf16.mxu1 %v2652_v41  ;;  %v1988_v25 = vld [vmem:[#allocation2 + $0xe0] sm:$0xff]  ;;  %v1989_v41 = vld [vmem:[#allocation2 + $0xf0] sm:$0xff] }
 0x65a   : > { %1496 = vmatpush1.bf16.msra.mxu0 %v2655_v42  ;;  %1537 = vmatpush1.bf16.msra.mxu1 %v2658_v43  ;;  %v1354_v42 = vld [vmem:[%s1353_s26] sm:$0xff] }
 0x65b   : > { %1497 = vmatprep.subr.bf16.mxu0 %v2661_v59  ;;  %1538 = vmatprep.subr.bf16.mxu1 %v2664_v60  ;;  %v1356_v43 = vunpack.c.l.bf16 %v1354_v42  ;;  %v1355_v59 = vld [vmem:[%s1353_s26 + $0x8] sm:$0xff]  ;;  %v1357_v60 = vunpack.c.h.bf16 %v1354_v42  ;;  %s1476_s26 = smul.u32 %s1474_s22, %s2183_s30 }
 0x65c   : > { %v1359_v23 = vunpack.c.h.bf16 %v1355_v59 }
 0x65d   : > { %s1479_s6 = sadd.s32 %s1478_s27, %s1476_s26 }
 0x65e   : > { %1498 = vmatpush1.bf16.msra.mxu0 %v2667_v62  ;;  %1539 = vmatpush1.bf16.msra.mxu1 %v2670_v0 }
 0x65f   : > { %1499 = vmatprep.subr.bf16.mxu0 %v2673_v1  ;;  %1540 = vmatprep.subr.bf16.mxu1 %v2676_v2  ;;  %v1358_v2 = vunpack.c.l.bf16 %v1355_v59 }
 0x662   : > { %1500 = vmatpush1.bf16.msra.mxu0 %v2679_v3  ;;  %1541 = vmatpush1.bf16.msra.mxu1 %v1978_v63 }
 0x663   : > { %1501 = vmatprep.subr.bf16.mxu0 %v2683_v4  ;;  %1542 = vmatprep.subr.bf16.mxu1 %v1979_v28 }
 0x666   : > { %1502 = vmatpush1.bf16.msra.mxu0 %v1980_v55  ;;  %1543 = vmatpush1.bf16.msra.mxu1 %v1981_v44 }
 0x667   : > { %1503 = vmatprep.subr.bf16.mxu0 %v1982_v34  ;;  %1544 = vmatprep.subr.bf16.mxu1 %v1983_v35 }
 0x66a   : > { %1504 = vmatpush1.bf16.msra.mxu0 %v1984_v36  ;;  %1545 = vmatpush1.bf16.msra.mxu1 %v1985_v37  ;;  %v1488_v37 = vunpack.c.h.bf16 %v1484_v39 }
 0x66b   : > { %1505 = vmatprep.subr.bf16.mxu0 %v1986_v38  ;;  %1546 = vmatprep.subr.bf16.mxu1 %v1987_v40 }
 0x66e   : > { %1506 = vmatpush1.bf16.msra.mxu0 %v1988_v25  ;;  %1547 = vmatpush1.bf16.msra.mxu1 %v1989_v41 }
 0x724   : > { %v1396_v62 = vpop.f32.mrb[24].mxu0  ;;  %v1437_v0 = vpop.f32.mrb[24].mxu1 }
 0x725   : > { %v1444_v1 = vadd.f32 %v1396_v62, %v1356_v43  ;;  %v1398_v3 = vpop.f32.mrb[25].mxu0  ;;  %v1439_v4 = vpop.f32.mrb[25].mxu1  ;;  %v1446_v22 = vadd.f32 %v1437_v0, %v1358_v2  ;;  %v1596_v0 = vstv %s1479_s6 }
 0x726   : > { %v1445_v15 = vadd.f32 %v1398_v3, %v1357_v60  ;;  %v1400_v16 = vpop.f32.mrb[26].mxu0  ;;  %v1441_v17 = vpop.f32.mrb[26].mxu1  ;;  %v1447_v24 = vadd.f32 %v1439_v4, %v1359_v23  ;;  %vm1597_vm7 = vcmp.gt.s32.totalorder %v2745_v12, %v1596_v0 }
 0x727   : > { %v1448_v18 = vmul.f32 0.5, %v1444_v1  ;;  %v1401_v19 = vpop.f32.mrb[27].mxu0  ;;  %v1442_v20 = vpop.f32.mrb[27].mxu1 }
 0x728   : > { %v1452_v21 = vmul.f32 0.5, %v1445_v15  ;;  %v1457_v26 = vmul.f32 0.5, %v1447_v24 }
 0x729   : > { %1938 = vtanh.f32 %v1448_v18 }
 0x72a   : > { %1940 = vtanh.f32 %v1452_v21 }
 0x72b   : > { %1942 = vtanh.f32 %v1446_v22 }
 0x72c   : > { %1944 = vtanh.f32 %v1457_v26 }
 0x733   : > { %v1939_v27 = vpop.eup %1938 }
 0x734   : > { %v1941_v5 = vpop.eup %1940  ;;  %v1450_v6 = vmul.f32 0.5, %v1939_v27 }
 0x735   : > { %v1454_v58 = vmul.f32 0.5, %v1941_v5  ;;  %v1943_v7 = vpop.eup %1942 }
 0x736   : > { %v1451_v61 = vadd.f32 0.5, %v1450_v6  ;;  %v1945_v54 = vpop.eup %1944 }
 0x737   : > { %v1455_v8 = vadd.f32 0.5, %v1454_v58  ;;  %v1459_v31 = vmul.f32 0.5, %v1945_v54 }
 0x738   : > { %v1463_v10 = vmul.f32 %v1943_v7, %v1451_v61 }
 0x739   : > { %v1462_v11 = vmul.f32 %v1455_v8, %v2707_v52  ;;  %v1460_v45 = vadd.f32 0.5, %v1459_v31 }
 0x73b   : > { %v1464_v13 = vadd.f32 %v1463_v10, %v1462_v11 }
 0x73d   : > { %1946 = vtanh.f32 %v1464_v13  ;;  %v1472_v14 = vsel %vm1468_vm6, %v1464_v13, %v2707_v52 }
 0x747   : > { %v1947_v46 = vpop.eup %1946 }
 0x748   : > { %v1466_v47 = vmul.f32 %v1947_v46, %v1460_v45 }
 0x74a   : > { %v1469_v48 = vsel %vm1468_vm6, %v1466_v47, %v2710_v32 }
 0x74b   : > { %v1490_v49 = vpack.c.bf16 %v1469_v48, %v1469_v48 }
 0x74d   : > { %1524 = vmatmul.mubr.bf16.vlgmr.msra.gmra.mrb[28].mxu0 %v1490_v49  ;;  %1565 = vmatmul.mubr.bf16.vlgmr.msra.gmra.mrb[28].mxu1 %v1490_v49 }
 0x820   : > { %v1525_v56 = vpop.f32.mrb[28].mxu0  ;;  %v1566_v57 = vpop.f32.mrb[28].mxu1 }
 0x821   : > { %v1573_v52 = vadd.f32 %v1525_v56, %v1485_v33  ;;  %v1527_v30 = vpop.f32.mrb[29].mxu0  ;;  %v1568_v50 = vpop.f32.mrb[29].mxu1  ;;  %v1575_v36 = vadd.f32 %v1566_v57, %v1487_v29 }
 0x822   : > { %v1574_v63 = vadd.f32 %v1527_v30, %v1486_v53  ;;  %v1529_v32 = vpop.f32.mrb[30].mxu0  ;;  %v1570_v28 = vpop.f32.mrb[30].mxu1  ;;  %v1576_v38 = vadd.f32 %v1568_v50, %v1488_v37 }
 0x823   : > { %v1577_v55 = vmul.f32 0.5, %v1573_v52  ;;  %v1530_v44 = vpop.f32.mrb[31].mxu0  ;;  %v1571_v34 = vpop.f32.mrb[31].mxu1 }
 0x824   : > { %v1581_v35 = vmul.f32 0.5, %v1574_v63  ;;  %v1586_v40 = vmul.f32 0.5, %v1576_v38 }
 0x825   : > { %1948 = vtanh.f32 %v1577_v55 }
 0x826   : > { %1950 = vtanh.f32 %v1581_v35 }
 0x827   : > { %1952 = vtanh.f32 %v1575_v36 }
 0x828   : > { %1954 = vtanh.f32 %v1586_v40 }
 0x82f   : > { %v1949_v25 = vpop.eup %1948 }
 0x830   : > { %v1951_v41 = vpop.eup %1950  ;;  %v1579_v42 = vmul.f32 0.5, %v1949_v25 }
 0x831   : > { %v1583_v43 = vmul.f32 0.5, %v1951_v41  ;;  %v1953_v60 = vpop.eup %1952 }
 0x832   : > { %v1580_v59 = vadd.f32 0.5, %v1579_v42  ;;  %v1955_v15 = vpop.eup %1954 }
 0x833   : > { %v1584_v62 = vadd.f32 0.5, %v1583_v43  ;;  %v1588_v16 = vmul.f32 0.5, %v1955_v15 }
 0x834   : > { %v1592_v1 = vmul.f32 %v1953_v60, %v1580_v59 }
 0x835   : > { %v1591_v2 = vmul.f32 %v1584_v62, %v1472_v14  ;;  %v1589_v17 = vadd.f32 0.5, %v1588_v16 }
 0x837   : > { %v1593_v3 = vadd.f32 %v1592_v1, %v1591_v2 }
 0x839   : > { %1956 = vtanh.f32 %v1593_v3  ;;  %v1601_v4 = vsel %vm1597_vm7, %v1593_v3, %v1472_v14 }
 0x83a   : > { %1602 = vst [vmem:[#allocation4] sm:$0xff] %v1601_v4 }
 0x841   : > { %1606 = sbr.rel (%p1790_p1) target bundleno = 2128 (0x850), region = 73 }
 0x843   : > { %v1957_v18 = vpop.eup %1956 }
 0x844   : > { %v1595_v19 = vmul.f32 %v1957_v18, %v1589_v17 }
 0x846   : > { %v1598_v20 = vsel %vm1597_vm7, %v1595_v19, %v1469_v48 }
 0x847   : > { %1599 = vst [vmem:[#allocation3] sm:$0xff] %v1598_v20 }
 0x84e   : > { %v1607_v21 = vld [vmem:[#allocation3] sm:$0xff] }
 0x84f   : > { %1608 = vst [vmem:[%s187_s29] sm:$0xff] %v1607_v21 }
 0x850 PF: > { %s1792_s30 = sshll.u32 %s2075_s16, 7  ;;  %s1623_s8 = sshll.u32 %s187_s29, 4  ;;  %s1624_s8 = int_to_ptr.vmem [resolvable:$true] %s1623_s8 }
 0x851   : > { %s2764_s7 = scalar_lea.hbm %s2818_s3, %s1792_s30  ;;  %s2825_s15 = sand.u32 1, %s2063_s13  }
 0x852   : > { %s1610_s23 = scalar_lea.sflag [#allocation7], %s2825_s15  ;;  %s1991_s9 = scalar_lea.vmem %s1624_s8, 128 }
 0x853   : > { %p1992_p2 = scmp.ne.s32.totalorder %s1624_s8, %s1991_s9  ;;  %s2091_s11 = smov [#allocation6]  }
 0x854   : > { %s1995_s20 = sshll.u32 %s2091_s11, 4  ;;  %s1996_s20 = int_to_ptr.vmem [resolvable:$false] %s1995_s20 }
 0x855   : > { %p1993_p4 = pnand %p1992_p2, %p2161_p3  ;;  %s1997_s22 = scalar_lea.vmem %s1996_s20, 256 }
 0x856   : > { %p1998_p6 = scmp.lt.s32.totalorder %s1624_s8, %s1996_s20  ;;  %p1999_p7 = scmp.lt.s32.totalorder %s1997_s22, %s1991_s9 }
 0x857   : > { %p1994_p5 = pneg %p1993_p4 }
 0x858   : > { %p2000_p8 = por %p1999_p7, %p1998_p6 }
 0x85a   : > { %p2001_p10 = pnand %p2000_p8, %p1994_p5 }
 0x85c   : > { %2004 = shalt.err (!%p2001_p10)
}
 0x85d   : > { %s2005_s16 = scalar_lea.hbm %s2764_s7, 128  ;;  %s2009_s21 = scalar_lea.hbm %s2818_s3, 256 }
 0x85e   : > { %p2006_p11 = scmp.ne.s32.totalorder %s2764_s7, %s2005_s16  ;;  %p2010_p0 = scmp.lt.u32.totalorder %s2764_s7, %s2818_s3 }
 0x85f   : > { %p2011_p1 = scmp.lt.u32.totalorder %s2009_s21, %s2005_s16  ;;  %p2013_p4 = scmp.lt.u32.totalorder %s2005_s16, %s2764_s7 }
 0x860   : > { %p2007_p12 = pnand %p2006_p11, %p2161_p3 }
 0x861   : > { %p2012_p2 = por %p2011_p1, %p2010_p0 }
 0x862   : > { %p2008_p13 = pneg %p2007_p12 }
 0x863   : > { %p2014_p5 = por %p2013_p4, %p2012_p2 }
 0x865   : > { %p2015_p6 = pnand %p2014_p5, %p2008_p13 }
 0x867   : > { %2018 = shalt.err (!%p2015_p6)
}
 0x868   : > { %1805 = dma.vmem_to_hbm [thread:$0]  (%p2161_p3), %s1624_s8, 128, %s2764_s7, %s1610_s23  }
 0x869 PF: > { %p1811_p7 = scmp.ge.s32.totalorder %s2087_s19, 2  ;;  %s1635_s6 = sand.u32 1, %s2059_s12  }
 0x86a   : > { %s1636_s30 = scalar_lea.sflag [#allocation7], %s1635_s6 }
 0x86b   : > { %p1808_p8 = pnand %p1811_p7, %p2171_p9 }
 0x86d   : > { %2054 = dma.done.wait (!%p1808_p8), %s1636_s30, 128  }
 0x86e   : > { %2056 = vsyncadd (!%p1808_p8), %s1636_s30, 4294967168  ;;  %s16_s19 = sadd.s32 1, %s2087_s19   ;;  %s2826_s24 = sld [smem:[#allocation11_spill]] }
 0x86f   : > { %p13_p10 = scmp.ge.s32.totalorder %s16_s19, 6   ;;  %s2827_s10 = sld [smem:[#allocation12_spill]] }
 0x870   : > { %s2828_s12 = smov %s2063_s13  ;;  %s2829_s13 = smov %s2067_s14 }
 0x871   : > { %s2830_s14 = smov %s2179_s28  ;;  %s2831_s15 = smov %s2079_s17 }
 0x872   : > { %s2832_s16 = smov %s2083_s18  ;;  %15 = sbr.rel (!%p13_p10) target bundleno = 5 (0x5), region = 131 }
 0x874   : > { %s2833_s17 = smov %s2826_s24 }
 0x875   : > { %s2834_s18 = smov %s2827_s10 }
 0x879   :  { %1641 = vsyncpa [#allocation7], 1 }
 0x87a   :  { %1643 = vsyncpa [#allocation7 + $0x1], 1 }
 0x87b   :  { %1644 = vsyncmov [#allocation5] }
 0x87e   :  { %s1645_s25 = vpop.sfrf %1644 }
 0x87f   :  { %p1795_p3 = scmp.ne.s32.totalorder %s1645_s25, 0 }
 0x881   :  { %1649 = shalt.err (%p1795_p3)  }

</bundles_post_ra>
